<compile_context>
chip_gen: v7x
topology: tpu7x:2x2x1
jax: 0.10.0
libtpu: 0.0.40
codegen_flags: <defaults>
</compile_context>

<pallas_src>
import jax
import jax.numpy as jnp
from jax import lax
from jax.experimental import pallas as pl
from jax.experimental.pallas import tpu as pltpu

BN_EPS = 1e-5


def _round_up(x, m):
    return ((x + m - 1) // m) * m


def _vmem_limit_bytes():
    """~3/4 of physical VMEM (v5e/v6e 128 MiB -> 96, v7x 64 MiB -> 48), capped."""
    cap = 64 * 1024 * 1024
    try:
        cap = int(pltpu.get_tpu_info().vmem_capacity_bytes)
    except Exception:
        pass
    return int(max(min(cap * 3 // 4, 100 * 1024 * 1024), 32 * 1024 * 1024))


def _pick_row_tile(H, W, C, elem_bytes, budget_bytes, max_rows):
    """Largest divisor of H whose (tr, W, C) block fits the budget / max rows.

    Falls back to the whole image for small H (avoids pathological tr=1 tiles
    when H is prime)."""
    best = 1
    for cand in range(1, H + 1):
        if H % cand:
            continue
        if cand * W > max_rows:
            continue
        if cand * W * C * elem_bytes > budget_bytes:
            continue
        best = cand
    if best == 1 and H * W <= max_rows and H * W * C * elem_bytes <= budget_bytes:
        best = H
    return best


# ----------------------------- Pallas kernels ------------------------------

def _make_upsample_kernel(H2, W2):
    """ConvTranspose2d(k=2, s=2) as one matmul per output-row parity (dh)."""
    def kernel(x2_ref, wt_ref, bt_ref, o_ref):
        cin = x2_ref.shape[-1]
        c2 = o_ref.shape[-1]                        # 2 * mid_p (lane-dense)
        xm = x2_ref[0].reshape(H2 * W2, cin)        # bf16, K = cin_p >= 128
        for dh in range(2):
            y = jnp.dot(xm, wt_ref[dh], preferred_element_type=jnp.float32)
            y = y + bt_ref[...]
            o_ref[:, dh, :, :] = y.reshape(H2, W2, c2).astype(o_ref.dtype)
    return kernel


def _scatter_dw_bands(pad3_ref, val, H, W, kc, ch0):
    """Write `val` (H, W, C) into the 3 column-shifted dw bands of the
    zero-bordered, tap-major VMEM scratch:
        scratch[rp, c, dw*kc + k] = x_zeropad[rp, c + dw, k]
    (scratch rows rp = padded row index, i.e. unpadded row + 1)."""
    C = val.shape[-1]
    pad3_ref[1:H + 1, 1:W, ch0:ch0 + C] = val[:, 0:W - 1, :]                    # dw = 0
    pad3_ref[1:H + 1, :, kc + ch0:kc + ch0 + C] = val                           # dw = 1
    pad3_ref[1:H + 1, 0:W - 1, 2 * kc + ch0:2 * kc + ch0 + C] = val[:, 1:W, :]  # dw = 2


def _accumulate_taps(pad3_ref, w_ref, b_ref, r0, tr, W, co_p):
    """3 matmuls (one per dh), K = 3*kc, register accumulator seeded with bias."""
    acc = jnp.broadcast_to(b_ref[...], (tr * W, co_p))          # f32
    for dh in range(3):
        slab = pad3_ref[pl.ds(r0 + dh, tr), :, :]               # (tr, W, 3*kc) bf16
        acc = acc + jnp.dot(slab.reshape(tr * W, slab.shape[-1]), w_ref[dh],
                            preferred_element_type=jnp.float32)
    return acc


def _store_and_stats(acc, z_ref, s_ref, tr, W, co_p):
    z_ref[...] = acc.reshape(1, tr, W, co_p).astype(z_ref.dtype)   # bf16 store
    part = jnp.concatenate(
        [jnp.sum(acc, axis=0, keepdims=True),
         jnp.sum(acc * acc, axis=0, keepdims=True)], axis=0)       # (2, co_p) f32
    # NOTE: correct only because the row-tile grid axis is sequential
    # ("arbitrary") -- do not mark it "parallel" without per-core partials.
    s_ref[...] += part.reshape(1, 2, co_p)


def _make_conv1_kernel(H, W, tr, kc, mid_p, co_p):
    """conv1: virtual concat [x1 | y] (K = 2*mid_p) + bias + BN1 partial stats."""
    def kernel(x1_ref, y_ref, w_ref, b_ref, z_ref, s_ref, pad3_ref):
        i = pl.program_id(1)

        @pl.when(i == 0)
        def _():
            pad3_ref[...] = jnp.zeros_like(pad3_ref)
            _scatter_dw_bands(pad3_ref, x1_ref[0], H, W, kc, 0)       # skip path
            _scatter_dw_bands(pad3_ref, y_ref[0], H, W, kc, mid_p)    # upsampled path
            s_ref[...] = jnp.zeros_like(s_ref)

        r0 = pl.multiple_of(i * tr, tr)
        acc = _accumulate_taps(pad3_ref, w_ref, b_ref, r0, tr, W, co_p)
        _store_and_stats(acc, z_ref, s_ref, tr, W, co_p)
    return kernel


def _make_conv2_kernel(H, W, tr, co_p):
    """conv2: fused BN1-apply + ReLU on the raw z1 input, then 3x3 conv + stats."""
    kc = co_p

    def kernel(z1_ref, sc_ref, sh_ref, w_ref, b_ref, z_ref, s_ref, pad3_ref):
        i = pl.program_id(1)

        @pl.when(i == 0)
        def _():
            pad3_ref[...] = jnp.zeros_like(pad3_ref)
            h = z1_ref[0].astype(jnp.float32) * sc_ref[...] + sh_ref[...]
            h = jnp.maximum(h, 0.0).astype(jnp.bfloat16)              # h1 never hits HBM
            _scatter_dw_bands(pad3_ref, h, H, W, kc, 0)
            s_ref[...] = jnp.zeros_like(s_ref)

        r0 = pl.multiple_of(i * tr, tr)
        acc = _accumulate_taps(pad3_ref, w_ref, b_ref, r0, tr, W, co_p)
        _store_and_stats(acc, z_ref, s_ref, tr, W, co_p)
    return kernel


def _bn_relu_kernel(z_ref, sc_ref, sh_ref, o_ref):
    y = z_ref[...].astype(jnp.float32) * sc_ref[...] + sh_ref[...]
    o_ref[...] = jnp.maximum(y, 0.0).astype(o_ref.dtype)


# ------------------------------ kernel wrappers -----------------------------

def upsample_tconv(x2, wt_p, bt_p):
    """x2 (N,H2,W2,cin_p) bf16 -> (N*H2, 2, W2, 2*mid_p) bf16 (pixel-shuffle layout)."""
    N, H2, W2, Cin = x2.shape
    C2 = wt_p.shape[2]
    return pl.pallas_call(
        _make_upsample_kernel(H2, W2),
        grid=(N,),
        in_specs=[pl.BlockSpec((1, H2, W2, Cin), lambda n: (n, 0, 0, 0)),
                  pl.BlockSpec((2, Cin, C2), lambda n: (0, 0, 0)),
                  pl.BlockSpec((1, C2), lambda n: (0, 0))],
        out_specs=pl.BlockSpec((H2, 2, W2, C2), lambda n: (n, 0, 0, 0)),
        out_shape=jax.ShapeDtypeStruct((N * H2, 2, W2, C2), jnp.bfloat16),
        compiler_params=pltpu.CompilerParams(
            dimension_semantics=("parallel",),
            vmem_limit_bytes=_vmem_limit_bytes()),
    )(x2, wt_p, bt_p)


def conv1_stats(x1, y, w1m, b1, H, W, mid_p, co_p):
    """Fused conv1 (+bias) over the virtual concat [x1 | y]; returns z1 bf16 and
    per-image BN partial stats (N, 2, co_p) f32 (row 0 = sum, row 1 = sumsq)."""
    N = x1.shape[0]
    kc = 2 * mid_p
    tr = _pick_row_tile(H, W, co_p, 4, budget_bytes=2 << 20, max_rows=1024)
    nH = H // tr
    return pl.pallas_call(
        _make_conv1_kernel(H, W, tr, kc, mid_p, co_p),
        grid=(N, nH),
        in_specs=[pl.BlockSpec((1, H, W, mid_p), lambda n, i: (n, 0, 0, 0)),
                  pl.BlockSpec((1, H, W, mid_p), lambda n, i: (n, 0, 0, 0)),
                  pl.BlockSpec((3, 3 * kc, co_p), lambda n, i: (0, 0, 0)),
                  pl.BlockSpec((1, co_p), lambda n, i: (0, 0))],
        out_specs=(pl.BlockSpec((1, tr, W, co_p), lambda n, i: (n, i, 0, 0)),
                   pl.BlockSpec((1, 2, co_p), lambda n, i: (n, 0, 0))),
        out_shape=(jax.ShapeDtypeStruct((N, H, W, co_p), jnp.bfloat16),
                   jax.ShapeDtypeStruct((N, 2, co_p), jnp.float32)),
        scratch_shapes=[pltpu.VMEM((H + 2, W, 3 * kc), jnp.bfloat16)],
        compiler_params=pltpu.CompilerParams(
            dimension_semantics=("parallel", "arbitrary"),
            vmem_limit_bytes=_vmem_limit_bytes()),
    )(x1, y, w1m, b1)


def conv2_stats(z1, sc1, sh1, w2m, b2, H, W, co_p):
    """conv2 with BN1-apply + ReLU fused into its input path; returns z2 bf16 and
    BN2 partial stats."""
    N = z1.shape[0]
    tr = _pick_row_tile(H, W, co_p, 4, budget_bytes=2 << 20, max_rows=1024)
    nH = H // tr
    return pl.pallas_call(
        _make_conv2_kernel(H, W, tr, co_p),
        grid=(N, nH),
        in_specs=[pl.BlockSpec((1, H, W, co_p), lambda n, i: (n, 0, 0, 0)),
                  pl.BlockSpec((1, co_p), lambda n, i: (0, 0)),
                  pl.BlockSpec((1, co_p), lambda n, i: (0, 0)),
                  pl.BlockSpec((3, 3 * co_p, co_p), lambda n, i: (0, 0, 0)),
                  pl.BlockSpec((1, co_p), lambda n, i: (0, 0))],
        out_specs=(pl.BlockSpec((1, tr, W, co_p), lambda n, i: (n, i, 0, 0)),
                   pl.BlockSpec((1, 2, co_p), lambda n, i: (n, 0, 0))),
        out_shape=(jax.ShapeDtypeStruct((N, H, W, co_p), jnp.bfloat16),
                   jax.ShapeDtypeStruct((N, 2, co_p), jnp.float32)),
        scratch_shapes=[pltpu.VMEM((H + 2, W, 3 * co_p), jnp.bfloat16)],
        compiler_params=pltpu.CompilerParams(
            dimension_semantics=("parallel", "arbitrary"),
            vmem_limit_bytes=_vmem_limit_bytes()),
    )(z1, sc1, sh1, w2m, b2)


def bn_relu(z, scale, shift, out_dtype):
    """Final BN2-apply + ReLU (large elementwise tiles; f32 output)."""
    N, H, W, Cp = z.shape
    tr = _pick_row_tile(H, W, Cp, 4, budget_bytes=8 << 20, max_rows=1 << 30)
    nH = H // tr
    return pl.pallas_call(
        _bn_relu_kernel,
        grid=(N, nH),
        in_specs=[pl.BlockSpec((1, tr, W, Cp), lambda n, i: (n, i, 0, 0)),
                  pl.BlockSpec((1, Cp), lambda n, i: (0, 0)),
                  pl.BlockSpec((1, Cp), lambda n, i: (0, 0))],
        out_specs=pl.BlockSpec((1, tr, W, Cp), lambda n, i: (n, i, 0, 0)),
        out_shape=jax.ShapeDtypeStruct((N, H, W, Cp), out_dtype),
        compiler_params=pltpu.CompilerParams(
            dimension_semantics=("parallel", "parallel"),
            vmem_limit_bytes=_vmem_limit_bytes()),
    )(z, scale, shift)


def _bn_affine(stats, gamma, beta, count):
    """Fold (sum, sumsq) into per-channel scale/shift (train-mode, biased var)."""
    tot = jnp.sum(stats.astype(jnp.float32), axis=0)          # (2, Cp)
    mean = tot[0] / count
    var = jnp.maximum(tot[1] / count - mean * mean, 0.0)
    inv = lax.rsqrt(var + BN_EPS)
    scale = gamma.reshape(-1) * inv
    shift = beta.reshape(-1) - mean * scale
    return scale.reshape(1, -1), shift.reshape(1, -1)


# ----------------------- parameter packing (outside jit) --------------------

def init_params(key, in_ch, out_ch):
    """Deterministic synthetic parameters (shapes match UpCOB.__init__)."""
    mid = in_ch // 2
    ks = jax.random.split(key, 10)
    f32 = jnp.float32
    return {
        "wt": 0.1 * jax.random.normal(ks[0], (in_ch, mid, 2, 2), f32),
        "bt": 0.1 * jax.random.normal(ks[1], (mid,), f32),
        "w1": 0.1 * jax.random.normal(ks[2], (out_ch, in_ch, 3, 3), f32),
        "b1": 0.1 * jax.random.normal(ks[3], (out_ch,), f32),
        "g1": 1.0 + 0.1 * jax.random.normal(ks[4], (out_ch,), f32),
        "beta1": 0.1 * jax.random.normal(ks[5], (out_ch,), f32),
        "w2": 0.1 * jax.random.normal(ks[6], (out_ch, out_ch, 3, 3), f32),
        "b2": 0.1 * jax.random.normal(ks[7], (out_ch,), f32),
        "g2": 1.0 + 0.1 * jax.random.normal(ks[8], (out_ch,), f32),
        "beta2": 0.1 * jax.random.normal(ks[9], (out_ch,), f32),
    }


def pack_params(params, in_ch, out_ch):
    """One-time repack: bf16, tap-major merged conv weights, channel-padded."""
    mid = in_ch // 2
    mid_p = _round_up(mid, 64)        # 2*mid_p is a multiple of 128 (lane-dense)
    cin_p = _round_up(in_ch, 128)     # lane-dense upsample matmul K
    co_p = _round_up(out_ch, 128)
    kc1 = 2 * mid_p
    f32, bf16 = jnp.float32, jnp.bfloat16

    # ConvTranspose2d weight (in_ch, mid, 2, 2) -> (2[dh], cin_p, 2[dw]*mid_p)
    wt = jnp.transpose(params["wt"].astype(f32), (2, 0, 3, 1))   # (dh, Cin, dw, mid)
    wt = jnp.pad(wt, ((0, 0), (0, cin_p - in_ch), (0, 0), (0, mid_p - mid)))
    wt_p = wt.reshape(2, cin_p, 2 * mid_p).astype(bf16)
    bt = jnp.pad(params["bt"].astype(f32), (0, mid_p - mid))
    bt_p = jnp.tile(bt, 2).reshape(1, 2 * mid_p)

    # Conv1 (out_ch, in_ch, 3, 3) -> tap-major merged (3[dh], 3[dw]*2*mid_p, co_p);
    # input-channel rows: [0:mid] = skip x1, [mid_p:mid_p+mid] = upsampled path.
    w1 = jnp.transpose(params["w1"].astype(f32), (2, 3, 1, 0))   # (kh, kw, cin, cout)
    w1m = jnp.zeros((3, 3, kc1, co_p), f32)
    w1m = w1m.at[:, :, :mid, :out_ch].set(w1[:, :, :mid, :])
    w1m = w1m.at[:, :, mid_p:mid_p + mid, :out_ch].set(w1[:, :, mid:, :])
    w1m = w1m.reshape(3, 3 * kc1, co_p).astype(bf16)

    # Conv2 (out_ch, out_ch, 3, 3) -> (3[dh], 3[dw]*co_p, co_p)
    w2 = jnp.transpose(params["w2"].astype(f32), (2, 3, 1, 0))
    w2m = jnp.zeros((3, 3, co_p, co_p), f32)
    w2m = w2m.at[:, :, :out_ch, :out_ch].set(w2)
    w2m = w2m.reshape(3, 3 * co_p, co_p).astype(bf16)

    def vec(v):
        return jnp.pad(v.astype(f32), (0, co_p - out_ch)).reshape(1, co_p)

    return {
        "wt": wt_p, "bt": bt_p,
        "w1": w1m, "b1": vec(params["b1"]),
        "g1": vec(params["g1"]), "beta1": vec(params["beta1"]),
        "w2": w2m, "b2": vec(params["b2"]),
        "g2": vec(params["g2"]), "beta2": vec(params["beta2"]),
        "dims": (mid, mid_p, cin_p, co_p, out_ch),
    }


# --------------------------------- forward ----------------------------------

def up_cob_forward(pp, x1_nchw, x2_nchw):
    """UpCOB.forward(x1, x2). x1: (N, in_ch//2, H, W), x2: (N, in_ch, H/2, W/2)."""
    mid, mid_p, cin_p, co_p, out_ch = pp["dims"]
    N, _, H, W = x1_nchw.shape
    in_ch = x2_nchw.shape[1]

    # NCHW -> NHWC; channel padding is folded into the unavoidable layout op.
    x1 = jnp.transpose(x1_nchw, (0, 2, 3, 1))
    x1 = jnp.pad(x1, ((0, 0), (0, 0), (0, 0), (0, mid_p - mid))).astype(jnp.bfloat16)
    x2 = jnp.transpose(x2_nchw, (0, 2, 3, 1))
    x2 = jnp.pad(x2, ((0, 0), (0, 0), (0, 0), (0, cin_p - in_ch))).astype(jnp.bfloat16)

    # Fused ConvTranspose2d(k=2, s=2); the trailing reshape is a free pixel shuffle.
    y = upsample_tconv(x2, pp["wt"], pp["bt"]).reshape(N, H, W, mid_p)

    # conv1 over the *virtual* concat [x1, y] (never materialized), + BN1 stats.
    z1, s1 = conv1_stats(x1, y, pp["w1"], pp["b1"], H, W, mid_p, co_p)
    sc1, sh1 = _bn_affine(s1, pp["g1"], pp["beta1"], N * H * W)

    # conv2 reads raw z1 and applies BN1 + ReLU on the fly (h1 never in HBM).
    z2, s2 = conv2_stats(z1, sc1, sh1, pp["w2"], pp["b2"], H, W, co_p)
    sc2, sh2 = _bn_affine(s2, pp["g2"], pp["beta2"], N * H * W)

    h2 = bn_relu(z2, sc2, sh2, jnp.float32)
    return jnp.transpose(h2[:, :, :, :out_ch], (0, 3, 1, 2))        # NCHW f32


# ------------------------- plain-JAX f32 reference --------------------------

def reference_forward(params, x1_nchw, x2_nchw):
    f32 = jnp.float32
    x1 = x1_nchw.astype(f32)
    x2 = x2_nchw.astype(f32)
    N, _, H2, W2 = x2.shape
    wt = params["wt"].astype(f32)                                   # (Cin, mid, 2, 2)
    mid = wt.shape[1]
    y = jnp.einsum("ncij,cokl->noikjl", x2, wt).reshape(N, mid, 2 * H2, 2 * W2)
    y = y + params["bt"].astype(f32)[None, :, None, None]
    x = jnp.concatenate([x1, y], axis=1)

    def conv_bn_relu_ref(x, w, b, g, beta):
        z = lax.conv_general_dilated(x, w.astype(f32), (1, 1), "SAME",
                                     dimension_numbers=("NCHW", "OIHW", "NCHW"))
        z = z + b.astype(f32)[None, :, None, None]
        mean = jnp.mean(z, axis=(0, 2, 3), keepdims=True)
        var = jnp.mean(jnp.square(z - mean), axis=(0, 2, 3), keepdims=True)
        zn = (z - mean) * lax.rsqrt(var + BN_EPS)
        zn = zn * g.astype(f32)[None, :, None, None] + beta.astype(f32)[None, :, None, None]
        return jnp.maximum(zn, 0.0)

    h = conv_bn_relu_ref(x, params["w1"], params["b1"], params["g1"], params["beta1"])
    h = conv_bn_relu_ref(h, params["w2"], params["b2"], params["g2"], params["beta2"])
    return h


# ----------------------------------- main ------------------------------------

if __name__ == "__main__":
    in_ch, out_ch = 8, 4
    N, H, W = 2, 16, 16

    key = jax.random.PRNGKey(0)
    k_p, k_x1, k_x2 = jax.random.split(key, 3)
    params = init_params(k_p, in_ch, out_ch)

    # x1: skip connection (full resolution), x2: deeper feature map (half res)
    x1 = jax.random.normal(k_x1, (N, in_ch // 2, H, W), jnp.float32)
    x2 = jax.random.normal(k_x2, (N, in_ch, H // 2, W // 2), jnp.float32)

    packed = pack_params(params, in_ch, out_ch)            # once, outside jit
    fwd = jax.jit(lambda a, b: up_cob_forward(packed, a, b))

    out = jax.block_until_ready(fwd(x1, x2))
    ref = jax.block_until_ready(reference_forward(params, x1, x2))

    assert out.shape == (N, out_ch, H, W), out.shape
    assert bool(jnp.all(jnp.isfinite(out)))
    err = jnp.abs(out.astype(jnp.float32) - ref)
    assert float(jnp.max(err)) < 5e-2, ("max abs err", float(jnp.max(err)))
    assert float(jnp.mean(err)) < 1e-2, ("mean abs err", float(jnp.mean(err)))

    print("KERNEL_OK")
</pallas_src>

<mosaic_0001>
module attributes {stable_mosaic.version = 11 : i64} {
  func.func @kernel(%arg0: i32, %arg1: memref<1x8x8x128xbf16, #tpu.memory_space<vmem>>, %arg2: memref<2x128x128xbf16, #tpu.memory_space<vmem>>, %arg3: memref<1x128xf32, #tpu.memory_space<vmem>>, %arg4: memref<8x2x8x128xbf16, #tpu.memory_space<vmem>>) attributes {dimension_semantics = [#tpu.dimension_semantics<parallel>], iteration_bounds = array<i64: 2>, scalar_prefetch = 0 : i64, scratch_operands = 0 : i64, tpu.core_type = #tpu.core_type<tc>, window_params = [{transform_indices = @transform_0, window_bounds = array<i64: 1, 8, 8, 128>}, {pipeline_mode = #tpu.pipeline_mode<synchronous>, transform_indices = @transform_1, window_bounds = array<i64: 2, 128, 128>}, {pipeline_mode = #tpu.pipeline_mode<synchronous>, transform_indices = @transform_2, window_bounds = array<i64: 1, 128>}, {transform_indices = @transform_3, window_bounds = array<i64: 8, 2, 8, 128>}]} {
    %c0 = arith.constant 0 : index
    %c0_0 = arith.constant 0 : index
    %c0_1 = arith.constant 0 : index
    %c0_2 = arith.constant 0 : index
    %0 = vector.load %arg1[%c0, %c0_0, %c0_1, %c0_2] : memref<1x8x8x128xbf16, #tpu.memory_space<vmem>>, vector<1x8x8x128xbf16>
    %1 = vector.shape_cast %0 : vector<1x8x8x128xbf16> to vector<8x8x128xbf16>
    %2 = vector.shape_cast %1 : vector<8x8x128xbf16> to vector<64x128xbf16>
    %c0_3 = arith.constant 0 : index
    %c0_4 = arith.constant 0 : index
    %c0_5 = arith.constant 0 : index
    %3 = vector.load %arg2[%c0_3, %c0_4, %c0_5] : memref<2x128x128xbf16, #tpu.memory_space<vmem>>, vector<1x128x128xbf16>
    %4 = vector.shape_cast %3 : vector<1x128x128xbf16> to vector<128x128xbf16>
    %cst = arith.constant dense<0.000000e+00> : vector<64x128xf32>
    %5 = tpu.matmul %2, %4, %cst {dimension_numbers = #tpu.dot_dimension_numbers<[1], [0], [0], [1], [0, 0, 1, 1], [], []>} : vector<64x128xbf16>, vector<128x128xbf16>, vector<64x128xf32> -> vector<64x128xf32>
    %c0_6 = arith.constant 0 : index
    %c0_7 = arith.constant 0 : index
    %6 = vector.load %arg3[%c0_6, %c0_7] : memref<1x128xf32, #tpu.memory_space<vmem>>, vector<1x128xf32>
    %7 = vector.broadcast %6 : vector<1x128xf32> to vector<64x128xf32>
    %8 = arith.addf %5, %7 : vector<64x128xf32>
    %9 = vector.shape_cast %8 : vector<64x128xf32> to vector<8x8x128xf32>
    %10 = arith.truncf %9 : vector<8x8x128xf32> to vector<8x8x128xbf16>
    %c0_8 = arith.constant 0 : index
    %c0_9 = arith.constant 0 : index
    %c0_10 = arith.constant 0 : index
    %c0_11 = arith.constant 0 : index
    %11 = vector.load %arg4[%c0_8, %c0_9, %c0_10, %c0_11] : memref<8x2x8x128xbf16, #tpu.memory_space<vmem>>, vector<8x1x8x128xbf16>
    %12 = vector.shape_cast %11 : vector<8x1x8x128xbf16> to vector<8x8x128xbf16>
    %13 = vector.shape_cast %10 : vector<8x8x128xbf16> to vector<8x1x8x128xbf16>
    tpu.vector_store %arg4[%c0_8, %c0_9, %c0_10, %c0_11], %13 {strides = array<i32>} : memref<8x2x8x128xbf16, #tpu.memory_space<vmem>>, vector<8x1x8x128xbf16>,
    %c1 = arith.constant 1 : index
    %c0_12 = arith.constant 0 : index
    %c0_13 = arith.constant 0 : index
    %14 = vector.load %arg2[%c1, %c0_12, %c0_13] : memref<2x128x128xbf16, #tpu.memory_space<vmem>>, vector<1x128x128xbf16>
    %15 = vector.shape_cast %14 : vector<1x128x128xbf16> to vector<128x128xbf16>
    %cst_14 = arith.constant dense<0.000000e+00> : vector<64x128xf32>
    %16 = tpu.matmul %2, %15, %cst_14 {dimension_numbers = #tpu.dot_dimension_numbers<[1], [0], [0], [1], [0, 0, 1, 1], [], []>} : vector<64x128xbf16>, vector<128x128xbf16>, vector<64x128xf32> -> vector<64x128xf32>
    %c0_15 = arith.constant 0 : index
    %c0_16 = arith.constant 0 : index
    %17 = vector.load %arg3[%c0_15, %c0_16] : memref<1x128xf32, #tpu.memory_space<vmem>>, vector<1x128xf32>
    %18 = vector.broadcast %17 : vector<1x128xf32> to vector<64x128xf32>
    %19 = arith.addf %16, %18 : vector<64x128xf32>
    %20 = vector.shape_cast %19 : vector<64x128xf32> to vector<8x8x128xf32>
    %21 = arith.truncf %20 : vector<8x8x128xf32> to vector<8x8x128xbf16>
    %c0_17 = arith.constant 0 : index
    %c1_18 = arith.constant 1 : index
    %c0_19 = arith.constant 0 : index
    %c0_20 = arith.constant 0 : index
    %22 = vector.load %arg4[%c0_17, %c1_18, %c0_19, %c0_20] : memref<8x2x8x128xbf16, #tpu.memory_space<vmem>>, vector<8x1x8x128xbf16>
    %23 = vector.shape_cast %22 : vector<8x1x8x128xbf16> to vector<8x8x128xbf16>
    %24 = vector.shape_cast %21 : vector<8x8x128xbf16> to vector<8x1x8x128xbf16>
    tpu.vector_store %arg4[%c0_17, %c1_18, %c0_19, %c0_20], %24 {strides = array<i32>} : memref<8x2x8x128xbf16, #tpu.memory_space<vmem>>, vector<8x1x8x128xbf16>,
    return
  }
  func.func @transform_0(%arg0: i32) -> (i32, i32, i32, i32) {
    %c0_i32 = arith.constant 0 : i32
    %c0_i32_0 = arith.constant 0 : i32
    %c0_i32_1 = arith.constant 0 : i32
    %c0_i32_2 = arith.constant 0 : i32
    return %arg0, %c0_i32, %c0_i32_0, %c0_i32_1 : i32, i32, i32, i32
  }
  func.func @transform_1(%arg0: i32) -> (i32, i32, i32) {
    %c0_i32 = arith.constant 0 : i32
    %c0_i32_0 = arith.constant 0 : i32
    %c0_i32_1 = arith.constant 0 : i32
    %c0_i32_2 = arith.constant 0 : i32
    return %c0_i32, %c0_i32_0, %c0_i32_1 : i32, i32, i32
  }
  func.func @transform_2(%arg0: i32) -> (i32, i32) {
    %c0_i32 = arith.constant 0 : i32
    %c0_i32_0 = arith.constant 0 : i32
    %c0_i32_1 = arith.constant 0 : i32
    return %c0_i32, %c0_i32_0 : i32, i32
  }
  func.func @transform_3(%arg0: i32) -> (i32, i32, i32, i32) {
    %c0_i32 = arith.constant 0 : i32
    %c0_i32_0 = arith.constant 0 : i32
    %c0_i32_1 = arith.constant 0 : i32
    %c0_i32_2 = arith.constant 0 : i32
    return %arg0, %c0_i32, %c0_i32_0, %c0_i32_1 : i32, i32, i32, i32
  }
}

module attributes {stable_mosaic.version = 11 : i64} {
  func.func @kernel(%arg0: i32, %arg1: i32, %arg2: memref<1x16x16x64xbf16, #tpu.memory_space<vmem>>, %arg3: memref<1x16x16x64xbf16, #tpu.memory_space<vmem>>, %arg4: memref<3x384x128xbf16, #tpu.memory_space<vmem>>, %arg5: memref<1x128xf32, #tpu.memory_space<vmem>>, %arg6: memref<1x16x16x128xbf16, #tpu.memory_space<vmem>>, %arg7: memref<1x2x128xf32, #tpu.memory_space<vmem>>, %arg8: memref<18x16x384xbf16, #tpu.memory_space<vmem>>) attributes {dimension_semantics = [#tpu.dimension_semantics<parallel>, #tpu.dimension_semantics<arbitrary>], iteration_bounds = array<i64: 2, 1>, scalar_prefetch = 0 : i64, scratch_operands = 1 : i64, tpu.core_type = #tpu.core_type<tc>, window_params = [{transform_indices = @transform_0, window_bounds = array<i64: 1, 16, 16, 64>}, {transform_indices = @transform_1, window_bounds = array<i64: 1, 16, 16, 64>}, {pipeline_mode = #tpu.pipeline_mode<synchronous>, transform_indices = @transform_2, window_bounds = array<i64: 3, 384, 128>}, {pipeline_mode = #tpu.pipeline_mode<synchronous>, transform_indices = @transform_3, window_bounds = array<i64: 1, 128>}, {transform_indices = @transform_4, window_bounds = array<i64: 1, 16, 16, 128>}, {transform_indices = @transform_5, window_bounds = array<i64: 1, 2, 128>}]} {
    %c0_i32 = arith.constant 0 : i32
    %0 = arith.cmpi eq, %arg1, %c0_i32 : i32
    %1 = arith.extui %0 : i1 to i32
    %c0_i32_0 = arith.constant 0 : i32
    %2 = arith.cmpi ne, %1, %c0_i32_0 : i32
    scf.if %2 {
      %cst_30 = arith.constant 0.000000e+00 : bf16
      %45 = vector.broadcast %cst_30 : bf16 to vector<18x16x384xbf16>
      %c0_31 = arith.constant 0 : index
      %c0_32 = arith.constant 0 : index
      %c0_33 = arith.constant 0 : index
      %46 = vector.load %arg8[%c0_31, %c0_32, %c0_33] : memref<18x16x384xbf16, #tpu.memory_space<vmem>>, vector<18x16x384xbf16>
      tpu.vector_store %arg8[%c0_31, %c0_32, %c0_33], %45 {strides = array<i32>} : memref<18x16x384xbf16, #tpu.memory_space<vmem>>, vector<18x16x384xbf16>,
      %c0_34 = arith.constant 0 : index
      %c0_35 = arith.constant 0 : index
      %c0_36 = arith.constant 0 : index
      %c0_37 = arith.constant 0 : index
      %47 = vector.load %arg2[%c0_34, %c0_35, %c0_36, %c0_37] : memref<1x16x16x64xbf16, #tpu.memory_space<vmem>>, vector<1x16x16x64xbf16>
      %48 = vector.shape_cast %47 : vector<1x16x16x64xbf16> to vector<16x16x64xbf16>
      %49 = vector.extract_strided_slice %48 {offsets = [0, 0, 0], sizes = [16, 15, 64], strides = [1, 1, 1]} : vector<16x16x64xbf16> to vector<16x15x64xbf16>
      %c1_38 = arith.constant 1 : index
      %c1_39 = arith.constant 1 : index
      %c0_40 = arith.constant 0 : index
      %50 = vector.load %arg8[%c1_38, %c1_39, %c0_40] : memref<18x16x384xbf16, #tpu.memory_space<vmem>>, vector<16x15x64xbf16>
      tpu.vector_store %arg8[%c1_38, %c1_39, %c0_40], %49 {strides = array<i32>} : memref<18x16x384xbf16, #tpu.memory_space<vmem>>, vector<16x15x64xbf16>,
      %c1_41 = arith.constant 1 : index
      %c0_42 = arith.constant 0 : index
      %c128 = arith.constant 128 : index
      %51 = vector.load %arg8[%c1_41, %c0_42, %c128] : memref<18x16x384xbf16, #tpu.memory_space<vmem>>, vector<16x16x64xbf16>
      tpu.vector_store %arg8[%c1_41, %c0_42, %c128], %48 {strides = array<i32>} : memref<18x16x384xbf16, #tpu.memory_space<vmem>>, vector<16x16x64xbf16>,
      %52 = vector.extract_strided_slice %48 {offsets = [0, 1, 0], sizes = [16, 15, 64], strides = [1, 1, 1]} : vector<16x16x64xbf16> to vector<16x15x64xbf16>
      %c1_43 = arith.constant 1 : index
      %c0_44 = arith.constant 0 : index
      %c256 = arith.constant 256 : index
      %53 = vector.load %arg8[%c1_43, %c0_44, %c256] : memref<18x16x384xbf16, #tpu.memory_space<vmem>>, vector<16x15x64xbf16>
      tpu.vector_store %arg8[%c1_43, %c0_44, %c256], %52 {strides = array<i32>} : memref<18x16x384xbf16, #tpu.memory_space<vmem>>, vector<16x15x64xbf16>,
      %c0_45 = arith.constant 0 : index
      %c0_46 = arith.constant 0 : index
      %c0_47 = arith.constant 0 : index
      %c0_48 = arith.constant 0 : index
      %54 = vector.load %arg3[%c0_45, %c0_46, %c0_47, %c0_48] : memref<1x16x16x64xbf16, #tpu.memory_space<vmem>>, vector<1x16x16x64xbf16>
      %55 = vector.shape_cast %54 : vector<1x16x16x64xbf16> to vector<16x16x64xbf16>
      %56 = vector.extract_strided_slice %55 {offsets = [0, 0, 0], sizes = [16, 15, 64], strides = [1, 1, 1]} : vector<16x16x64xbf16> to vector<16x15x64xbf16>
      %c1_49 = arith.constant 1 : index
      %c1_50 = arith.constant 1 : index
      %c64 = arith.constant 64 : index
      %57 = vector.load %arg8[%c1_49, %c1_50, %c64] : memref<18x16x384xbf16, #tpu.memory_space<vmem>>, vector<16x15x64xbf16>
      tpu.vector_store %arg8[%c1_49, %c1_50, %c64], %56 {strides = array<i32>} : memref<18x16x384xbf16, #tpu.memory_space<vmem>>, vector<16x15x64xbf16>,
      %c1_51 = arith.constant 1 : index
      %c0_52 = arith.constant 0 : index
      %c192 = arith.constant 192 : index
      %58 = vector.load %arg8[%c1_51, %c0_52, %c192] : memref<18x16x384xbf16, #tpu.memory_space<vmem>>, vector<16x16x64xbf16>
      tpu.vector_store %arg8[%c1_51, %c0_52, %c192], %55 {strides = array<i32>} : memref<18x16x384xbf16, #tpu.memory_space<vmem>>, vector<16x16x64xbf16>,
      %59 = vector.extract_strided_slice %55 {offsets = [0, 1, 0], sizes = [16, 15, 64], strides = [1, 1, 1]} : vector<16x16x64xbf16> to vector<16x15x64xbf16>
      %c1_53 = arith.constant 1 : index
      %c0_54 = arith.constant 0 : index
      %c320 = arith.constant 320 : index
      %60 = vector.load %arg8[%c1_53, %c0_54, %c320] : memref<18x16x384xbf16, #tpu.memory_space<vmem>>, vector<16x15x64xbf16>
      tpu.vector_store %arg8[%c1_53, %c0_54, %c320], %59 {strides = array<i32>} : memref<18x16x384xbf16, #tpu.memory_space<vmem>>, vector<16x15x64xbf16>,
      %cst_55 = arith.constant 0.000000e+00 : f32
      %61 = vector.broadcast %cst_55 : f32 to vector<1x2x128xf32>
      %c0_56 = arith.constant 0 : index
      %c0_57 = arith.constant 0 : index
      %c0_58 = arith.constant 0 : index
      %62 = vector.load %arg7[%c0_56, %c0_57, %c0_58] : memref<1x2x128xf32, #tpu.memory_space<vmem>>, vector<1x2x128xf32>
      tpu.vector_store %arg7[%c0_56, %c0_57, %c0_58], %61 {strides = array<i32>} : memref<1x2x128xf32, #tpu.memory_space<vmem>>, vector<1x2x128xf32>,
    } else {
    }
    %c16_i32 = arith.constant 16 : i32
    %3 = arith.muli %arg1, %c16_i32 : i32
    %4 = tpu.assume_multiple %3, 16 : i32
    %c0 = arith.constant 0 : index
    %c0_1 = arith.constant 0 : index
    %5 = vector.load %arg5[%c0, %c0_1] : memref<1x128xf32, #tpu.memory_space<vmem>>, vector<1x128xf32>
    %6 = vector.shape_cast %5 : vector<1x128xf32> to vector<1x128xf32>
    %7 = vector.broadcast %6 : vector<1x128xf32> to vector<256x128xf32>
    %c0_i32_2 = arith.constant 0 : i32
    %8 = arith.addi %4, %c0_i32_2 : i32
    %9 = arith.index_cast %8 : i32 to index
    %c0_3 = arith.constant 0 : index
    %c0_4 = arith.constant 0 : index
    %10 = vector.load %arg8[%9, %c0_3, %c0_4] : memref<18x16x384xbf16, #tpu.memory_space<vmem>>, vector<16x16x384xbf16>
    %11 = vector.shape_cast %10 : vector<16x16x384xbf16> to vector<256x384xbf16>
    %c0_5 = arith.constant 0 : index
    %c0_6 = arith.constant 0 : index
    %c0_7 = arith.constant 0 : index
    %12 = vector.load %arg4[%c0_5, %c0_6, %c0_7] : memref<3x384x128xbf16, #tpu.memory_space<vmem>>, vector<1x384x128xbf16>
    %13 = vector.shape_cast %12 : vector<1x384x128xbf16> to vector<384x128xbf16>
    %cst = arith.constant dense<0.000000e+00> : vector<256x128xf32>
    %14 = tpu.matmul %11, %13, %cst {dimension_numbers = #tpu.dot_dimension_numbers<[1], [0], [0], [1], [0, 0, 1, 1], [], []>} : vector<256x384xbf16>, vector<384x128xbf16>, vector<256x128xf32> -> vector<256x128xf32>
    %15 = arith.addf %7, %14 : vector<256x128xf32>
    %c1_i32 = arith.constant 1 : i32
    %16 = arith.addi %4, %c1_i32 : i32
    %17 = arith.index_cast %16 : i32 to index
    %c0_8 = arith.constant 0 : index
    %c0_9 = arith.constant 0 : index
    %18 = vector.load %arg8[%17, %c0_8, %c0_9] : memref<18x16x384xbf16, #tpu.memory_space<vmem>>, vector<16x16x384xbf16>
    %19 = vector.shape_cast %18 : vector<16x16x384xbf16> to vector<256x384xbf16>
    %c1 = arith.constant 1 : index
    %c0_10 = arith.constant 0 : index
    %c0_11 = arith.constant 0 : index
    %20 = vector.load %arg4[%c1, %c0_10, %c0_11] : memref<3x384x128xbf16, #tpu.memory_space<vmem>>, vector<1x384x128xbf16>
    %21 = vector.shape_cast %20 : vector<1x384x128xbf16> to vector<384x128xbf16>
    %cst_12 = arith.constant dense<0.000000e+00> : vector<256x128xf32>
    %22 = tpu.matmul %19, %21, %cst_12 {dimension_numbers = #tpu.dot_dimension_numbers<[1], [0], [0], [1], [0, 0, 1, 1], [], []>} : vector<256x384xbf16>, vector<384x128xbf16>, vector<256x128xf32> -> vector<256x128xf32>
    %23 = arith.addf %15, %22 : vector<256x128xf32>
    %c2_i32 = arith.constant 2 : i32
    %24 = arith.addi %4, %c2_i32 : i32
    %25 = arith.index_cast %24 : i32 to index
    %c0_13 = arith.constant 0 : index
    %c0_14 = arith.constant 0 : index
    %26 = vector.load %arg8[%25, %c0_13, %c0_14] : memref<18x16x384xbf16, #tpu.memory_space<vmem>>, vector<16x16x384xbf16>
    %27 = vector.shape_cast %26 : vector<16x16x384xbf16> to vector<256x384xbf16>
    %c2 = arith.constant 2 : index
    %c0_15 = arith.constant 0 : index
    %c0_16 = arith.constant 0 : index
    %28 = vector.load %arg4[%c2, %c0_15, %c0_16] : memref<3x384x128xbf16, #tpu.memory_space<vmem>>, vector<1x384x128xbf16>
    %29 = vector.shape_cast %28 : vector<1x384x128xbf16> to vector<384x128xbf16>
    %cst_17 = arith.constant dense<0.000000e+00> : vector<256x128xf32>
    %30 = tpu.matmul %27, %29, %cst_17 {dimension_numbers = #tpu.dot_dimension_numbers<[1], [0], [0], [1], [0, 0, 1, 1], [], []>} : vector<256x384xbf16>, vector<384x128xbf16>, vector<256x128xf32> -> vector<256x128xf32>
    %31 = arith.addf %23, %30 : vector<256x128xf32>
    %32 = vector.shape_cast %31 : vector<256x128xf32> to vector<1x16x16x128xf32>
    %33 = arith.truncf %32 : vector<1x16x16x128xf32> to vector<1x16x16x128xbf16>
    %c0_18 = arith.constant 0 : index
    %c0_19 = arith.constant 0 : index
    %c0_20 = arith.constant 0 : index
    %c0_21 = arith.constant 0 : index
    %34 = vector.load %arg6[%c0_18, %c0_19, %c0_20, %c0_21] : memref<1x16x16x128xbf16, #tpu.memory_space<vmem>>, vector<1x16x16x128xbf16>
    tpu.vector_store %arg6[%c0_18, %c0_19, %c0_20, %c0_21], %33 {strides = array<i32>} : memref<1x16x16x128xbf16, #tpu.memory_space<vmem>>, vector<1x16x16x128xbf16>,
    %cst_22 = arith.constant dense<0.000000e+00> : vector<128xf32>
    %35 = vector.multi_reduction <add>, %31, %cst_22 [0] : vector<256x128xf32> to vector<128xf32>
    %36 = vector.shape_cast %35 : vector<128xf32> to vector<1x128xf32>
    %37 = arith.mulf %31, %31 : vector<256x128xf32>
    %cst_23 = arith.constant dense<0.000000e+00> : vector<128xf32>
    %38 = vector.multi_reduction <add>, %37, %cst_23 [0] : vector<256x128xf32> to vector<128xf32>
    %39 = vector.shape_cast %38 : vector<128xf32> to vector<1x128xf32>
    %40 = tpu.concatenate %36, %39 in 0 : vector<1x128xf32>, vector<1x128xf32> -> vector<2x128xf32>
    %c0_24 = arith.constant 0 : index
    %c0_25 = arith.constant 0 : index
    %c0_26 = arith.constant 0 : index
    %41 = vector.load %arg7[%c0_24, %c0_25, %c0_26] : memref<1x2x128xf32, #tpu.memory_space<vmem>>, vector<1x2x128xf32>
    %42 = vector.shape_cast %40 : vector<2x128xf32> to vector<1x2x128xf32>
    %43 = arith.addf %41, %42 : vector<1x2x128xf32>
    %c0_27 = arith.constant 0 : index
    %c0_28 = arith.constant 0 : index
    %c0_29 = arith.constant 0 : index
    %44 = vector.load %arg7[%c0_27, %c0_28, %c0_29] : memref<1x2x128xf32, #tpu.memory_space<vmem>>, vector<1x2x128xf32>
    tpu.vector_store %arg7[%c0_27, %c0_28, %c0_29], %43 {strides = array<i32>} : memref<1x2x128xf32, #tpu.memory_space<vmem>>, vector<1x2x128xf32>,
    return
  }
  func.func @transform_0(%arg0: i32, %arg1: i32) -> (i32, i32, i32, i32) {
    %c0_i32 = arith.constant 0 : i32
    %c0_i32_0 = arith.constant 0 : i32
    %c0_i32_1 = arith.constant 0 : i32
    %c0_i32_2 = arith.constant 0 : i32
    return %arg0, %c0_i32, %c0_i32_0, %c0_i32_1 : i32, i32, i32, i32
  }
  func.func @transform_1(%arg0: i32, %arg1: i32) -> (i32, i32, i32, i32) {
    %c0_i32 = arith.constant 0 : i32
    %c0_i32_0 = arith.constant 0 : i32
    %c0_i32_1 = arith.constant 0 : i32
    %c0_i32_2 = arith.constant 0 : i32
    return %arg0, %c0_i32, %c0_i32_0, %c0_i32_1 : i32, i32, i32, i32
  }
  func.func @transform_2(%arg0: i32, %arg1: i32) -> (i32, i32, i32) {
    %c0_i32 = arith.constant 0 : i32
    %c0_i32_0 = arith.constant 0 : i32
    %c0_i32_1 = arith.constant 0 : i32
    %c0_i32_2 = arith.constant 0 : i32
    return %c0_i32, %c0_i32_0, %c0_i32_1 : i32, i32, i32
  }
  func.func @transform_3(%arg0: i32, %arg1: i32) -> (i32, i32) {
    %c0_i32 = arith.constant 0 : i32
    %c0_i32_0 = arith.constant 0 : i32
    %c0_i32_1 = arith.constant 0 : i32
    return %c0_i32, %c0_i32_0 : i32, i32
  }
  func.func @transform_4(%arg0: i32, %arg1: i32) -> (i32, i32, i32, i32) {
    %c0_i32 = arith.constant 0 : i32
    %c0_i32_0 = arith.constant 0 : i32
    %c0_i32_1 = arith.constant 0 : i32
    return %arg0, %arg1, %c0_i32, %c0_i32_0 : i32, i32, i32, i32
  }
  func.func @transform_5(%arg0: i32, %arg1: i32) -> (i32, i32, i32) {
    %c0_i32 = arith.constant 0 : i32
    %c0_i32_0 = arith.constant 0 : i32
    %c0_i32_1 = arith.constant 0 : i32
    return %arg0, %c0_i32, %c0_i32_0 : i32, i32, i32
  }
}

module attributes {stable_mosaic.version = 11 : i64} {
  func.func @kernel(%arg0: i32, %arg1: i32, %arg2: memref<1x16x16x128xbf16, #tpu.memory_space<vmem>>, %arg3: memref<1x128xf32, #tpu.memory_space<vmem>>, %arg4: memref<1x128xf32, #tpu.memory_space<vmem>>, %arg5: memref<3x384x128xbf16, #tpu.memory_space<vmem>>, %arg6: memref<1x128xf32, #tpu.memory_space<vmem>>, %arg7: memref<1x16x16x128xbf16, #tpu.memory_space<vmem>>, %arg8: memref<1x2x128xf32, #tpu.memory_space<vmem>>, %arg9: memref<18x16x384xbf16, #tpu.memory_space<vmem>>) attributes {dimension_semantics = [#tpu.dimension_semantics<parallel>, #tpu.dimension_semantics<arbitrary>], iteration_bounds = array<i64: 2, 1>, scalar_prefetch = 0 : i64, scratch_operands = 1 : i64, tpu.core_type = #tpu.core_type<tc>, window_params = [{transform_indices = @transform_0, window_bounds = array<i64: 1, 16, 16, 128>}, {pipeline_mode = #tpu.pipeline_mode<synchronous>, transform_indices = @transform_1, window_bounds = array<i64: 1, 128>}, {pipeline_mode = #tpu.pipeline_mode<synchronous>, transform_indices = @transform_2, window_bounds = array<i64: 1, 128>}, {pipeline_mode = #tpu.pipeline_mode<synchronous>, transform_indices = @transform_3, window_bounds = array<i64: 3, 384, 128>}, {pipeline_mode = #tpu.pipeline_mode<synchronous>, transform_indices = @transform_4, window_bounds = array<i64: 1, 128>}, {transform_indices = @transform_5, window_bounds = array<i64: 1, 16, 16, 128>}, {transform_indices = @transform_6, window_bounds = array<i64: 1, 2, 128>}]} {
    %c0_i32 = arith.constant 0 : i32
    %0 = arith.cmpi eq, %arg1, %c0_i32 : i32
    %1 = arith.extui %0 : i1 to i32
    %c0_i32_0 = arith.constant 0 : i32
    %2 = arith.cmpi ne, %1, %c0_i32_0 : i32
    scf.if %2 {
      %cst_30 = arith.constant 0.000000e+00 : bf16
      %45 = vector.broadcast %cst_30 : bf16 to vector<18x16x384xbf16>
      %c0_31 = arith.constant 0 : index
      %c0_32 = arith.constant 0 : index
      %c0_33 = arith.constant 0 : index
      %46 = vector.load %arg9[%c0_31, %c0_32, %c0_33] : memref<18x16x384xbf16, #tpu.memory_space<vmem>>, vector<18x16x384xbf16>
      tpu.vector_store %arg9[%c0_31, %c0_32, %c0_33], %45 {strides = array<i32>} : memref<18x16x384xbf16, #tpu.memory_space<vmem>>, vector<18x16x384xbf16>,
      %c0_34 = arith.constant 0 : index
      %c0_35 = arith.constant 0 : index
      %c0_36 = arith.constant 0 : index
      %c0_37 = arith.constant 0 : index
      %47 = vector.load %arg2[%c0_34, %c0_35, %c0_36, %c0_37] : memref<1x16x16x128xbf16, #tpu.memory_space<vmem>>, vector<1x16x16x128xbf16>
      %48 = vector.shape_cast %47 : vector<1x16x16x128xbf16> to vector<16x16x128xbf16>
      %49 = arith.extf %48 : vector<16x16x128xbf16> to vector<16x16x128xf32>
      %c0_38 = arith.constant 0 : index
      %c0_39 = arith.constant 0 : index
      %50 = vector.load %arg3[%c0_38, %c0_39] : memref<1x128xf32, #tpu.memory_space<vmem>>, vector<1x128xf32>
      %51 = vector.shape_cast %50 : vector<1x128xf32> to vector<1x1x128xf32>
      %52 = vector.broadcast %51 : vector<1x1x128xf32> to vector<16x16x128xf32>
      %53 = arith.mulf %49, %52 : vector<16x16x128xf32>
      %c0_40 = arith.constant 0 : index
      %c0_41 = arith.constant 0 : index
      %54 = vector.load %arg4[%c0_40, %c0_41] : memref<1x128xf32, #tpu.memory_space<vmem>>, vector<1x128xf32>
      %55 = vector.shape_cast %54 : vector<1x128xf32> to vector<1x1x128xf32>
      %56 = vector.broadcast %55 : vector<1x1x128xf32> to vector<16x16x128xf32>
      %57 = arith.addf %53, %56 : vector<16x16x128xf32>
      %cst_42 = arith.constant 0.000000e+00 : f32
      %58 = vector.broadcast %cst_42 : f32 to vector<16x16x128xf32>
      %59 = arith.maximumf %57, %58 : vector<16x16x128xf32>
      %60 = arith.truncf %59 : vector<16x16x128xf32> to vector<16x16x128xbf16>
      %61 = vector.extract_strided_slice %60 {offsets = [0, 0, 0], sizes = [16, 15, 128], strides = [1, 1, 1]} : vector<16x16x128xbf16> to vector<16x15x128xbf16>
      %c1_43 = arith.constant 1 : index
      %c1_44 = arith.constant 1 : index
      %c0_45 = arith.constant 0 : index
      %62 = vector.load %arg9[%c1_43, %c1_44, %c0_45] : memref<18x16x384xbf16, #tpu.memory_space<vmem>>, vector<16x15x128xbf16>
      tpu.vector_store %arg9[%c1_43, %c1_44, %c0_45], %61 {strides = array<i32>} : memref<18x16x384xbf16, #tpu.memory_space<vmem>>, vector<16x15x128xbf16>,
      %c1_46 = arith.constant 1 : index
      %c0_47 = arith.constant 0 : index
      %c128 = arith.constant 128 : index
      %63 = vector.load %arg9[%c1_46, %c0_47, %c128] : memref<18x16x384xbf16, #tpu.memory_space<vmem>>, vector<16x16x128xbf16>
      tpu.vector_store %arg9[%c1_46, %c0_47, %c128], %60 {strides = array<i32>} : memref<18x16x384xbf16, #tpu.memory_space<vmem>>, vector<16x16x128xbf16>,
      %64 = vector.extract_strided_slice %60 {offsets = [0, 1, 0], sizes = [16, 15, 128], strides = [1, 1, 1]} : vector<16x16x128xbf16> to vector<16x15x128xbf16>
      %c1_48 = arith.constant 1 : index
      %c0_49 = arith.constant 0 : index
      %c256 = arith.constant 256 : index
      %65 = vector.load %arg9[%c1_48, %c0_49, %c256] : memref<18x16x384xbf16, #tpu.memory_space<vmem>>, vector<16x15x128xbf16>
      tpu.vector_store %arg9[%c1_48, %c0_49, %c256], %64 {strides = array<i32>} : memref<18x16x384xbf16, #tpu.memory_space<vmem>>, vector<16x15x128xbf16>,
      %cst_50 = arith.constant 0.000000e+00 : f32
      %66 = vector.broadcast %cst_50 : f32 to vector<1x2x128xf32>
      %c0_51 = arith.constant 0 : index
      %c0_52 = arith.constant 0 : index
      %c0_53 = arith.constant 0 : index
      %67 = vector.load %arg8[%c0_51, %c0_52, %c0_53] : memref<1x2x128xf32, #tpu.memory_space<vmem>>, vector<1x2x128xf32>
      tpu.vector_store %arg8[%c0_51, %c0_52, %c0_53], %66 {strides = array<i32>} : memref<1x2x128xf32, #tpu.memory_space<vmem>>, vector<1x2x128xf32>,
    } else {
    }
    %c16_i32 = arith.constant 16 : i32
    %3 = arith.muli %arg1, %c16_i32 : i32
    %4 = tpu.assume_multiple %3, 16 : i32
    %c0 = arith.constant 0 : index
    %c0_1 = arith.constant 0 : index
    %5 = vector.load %arg6[%c0, %c0_1] : memref<1x128xf32, #tpu.memory_space<vmem>>, vector<1x128xf32>
    %6 = vector.shape_cast %5 : vector<1x128xf32> to vector<1x128xf32>
    %7 = vector.broadcast %6 : vector<1x128xf32> to vector<256x128xf32>
    %c0_i32_2 = arith.constant 0 : i32
    %8 = arith.addi %4, %c0_i32_2 : i32
    %9 = arith.index_cast %8 : i32 to index
    %c0_3 = arith.constant 0 : index
    %c0_4 = arith.constant 0 : index
    %10 = vector.load %arg9[%9, %c0_3, %c0_4] : memref<18x16x384xbf16, #tpu.memory_space<vmem>>, vector<16x16x384xbf16>
    %11 = vector.shape_cast %10 : vector<16x16x384xbf16> to vector<256x384xbf16>
    %c0_5 = arith.constant 0 : index
    %c0_6 = arith.constant 0 : index
    %c0_7 = arith.constant 0 : index
    %12 = vector.load %arg5[%c0_5, %c0_6, %c0_7] : memref<3x384x128xbf16, #tpu.memory_space<vmem>>, vector<1x384x128xbf16>
    %13 = vector.shape_cast %12 : vector<1x384x128xbf16> to vector<384x128xbf16>
    %cst = arith.constant dense<0.000000e+00> : vector<256x128xf32>
    %14 = tpu.matmul %11, %13, %cst {dimension_numbers = #tpu.dot_dimension_numbers<[1], [0], [0], [1], [0, 0, 1, 1], [], []>} : vector<256x384xbf16>, vector<384x128xbf16>, vector<256x128xf32> -> vector<256x128xf32>
    %15 = arith.addf %7, %14 : vector<256x128xf32>
    %c1_i32 = arith.constant 1 : i32
    %16 = arith.addi %4, %c1_i32 : i32
    %17 = arith.index_cast %16 : i32 to index
    %c0_8 = arith.constant 0 : index
    %c0_9 = arith.constant 0 : index
    %18 = vector.load %arg9[%17, %c0_8, %c0_9] : memref<18x16x384xbf16, #tpu.memory_space<vmem>>, vector<16x16x384xbf16>
    %19 = vector.shape_cast %18 : vector<16x16x384xbf16> to vector<256x384xbf16>
    %c1 = arith.constant 1 : index
    %c0_10 = arith.constant 0 : index
    %c0_11 = arith.constant 0 : index
    %20 = vector.load %arg5[%c1, %c0_10, %c0_11] : memref<3x384x128xbf16, #tpu.memory_space<vmem>>, vector<1x384x128xbf16>
    %21 = vector.shape_cast %20 : vector<1x384x128xbf16> to vector<384x128xbf16>
    %cst_12 = arith.constant dense<0.000000e+00> : vector<256x128xf32>
    %22 = tpu.matmul %19, %21, %cst_12 {dimension_numbers = #tpu.dot_dimension_numbers<[1], [0], [0], [1], [0, 0, 1, 1], [], []>} : vector<256x384xbf16>, vector<384x128xbf16>, vector<256x128xf32> -> vector<256x128xf32>
    %23 = arith.addf %15, %22 : vector<256x128xf32>
    %c2_i32 = arith.constant 2 : i32
    %24 = arith.addi %4, %c2_i32 : i32
    %25 = arith.index_cast %24 : i32 to index
    %c0_13 = arith.constant 0 : index
    %c0_14 = arith.constant 0 : index
    %26 = vector.load %arg9[%25, %c0_13, %c0_14] : memref<18x16x384xbf16, #tpu.memory_space<vmem>>, vector<16x16x384xbf16>
    %27 = vector.shape_cast %26 : vector<16x16x384xbf16> to vector<256x384xbf16>
    %c2 = arith.constant 2 : index
    %c0_15 = arith.constant 0 : index
    %c0_16 = arith.constant 0 : index
    %28 = vector.load %arg5[%c2, %c0_15, %c0_16] : memref<3x384x128xbf16, #tpu.memory_space<vmem>>, vector<1x384x128xbf16>
    %29 = vector.shape_cast %28 : vector<1x384x128xbf16> to vector<384x128xbf16>
    %cst_17 = arith.constant dense<0.000000e+00> : vector<256x128xf32>
    %30 = tpu.matmul %27, %29, %cst_17 {dimension_numbers = #tpu.dot_dimension_numbers<[1], [0], [0], [1], [0, 0, 1, 1], [], []>} : vector<256x384xbf16>, vector<384x128xbf16>, vector<256x128xf32> -> vector<256x128xf32>
    %31 = arith.addf %23, %30 : vector<256x128xf32>
    %32 = vector.shape_cast %31 : vector<256x128xf32> to vector<1x16x16x128xf32>
    %33 = arith.truncf %32 : vector<1x16x16x128xf32> to vector<1x16x16x128xbf16>
    %c0_18 = arith.constant 0 : index
    %c0_19 = arith.constant 0 : index
    %c0_20 = arith.constant 0 : index
    %c0_21 = arith.constant 0 : index
    %34 = vector.load %arg7[%c0_18, %c0_19, %c0_20, %c0_21] : memref<1x16x16x128xbf16, #tpu.memory_space<vmem>>, vector<1x16x16x128xbf16>
    tpu.vector_store %arg7[%c0_18, %c0_19, %c0_20, %c0_21], %33 {strides = array<i32>} : memref<1x16x16x128xbf16, #tpu.memory_space<vmem>>, vector<1x16x16x128xbf16>,
    %cst_22 = arith.constant dense<0.000000e+00> : vector<128xf32>
    %35 = vector.multi_reduction <add>, %31, %cst_22 [0] : vector<256x128xf32> to vector<128xf32>
    %36 = vector.shape_cast %35 : vector<128xf32> to vector<1x128xf32>
    %37 = arith.mulf %31, %31 : vector<256x128xf32>
    %cst_23 = arith.constant dense<0.000000e+00> : vector<128xf32>
    %38 = vector.multi_reduction <add>, %37, %cst_23 [0] : vector<256x128xf32> to vector<128xf32>
    %39 = vector.shape_cast %38 : vector<128xf32> to vector<1x128xf32>
    %40 = tpu.concatenate %36, %39 in 0 : vector<1x128xf32>, vector<1x128xf32> -> vector<2x128xf32>
    %c0_24 = arith.constant 0 : index
    %c0_25 = arith.constant 0 : index
    %c0_26 = arith.constant 0 : index
    %41 = vector.load %arg8[%c0_24, %c0_25, %c0_26] : memref<1x2x128xf32, #tpu.memory_space<vmem>>, vector<1x2x128xf32>
    %42 = vector.shape_cast %40 : vector<2x128xf32> to vector<1x2x128xf32>
    %43 = arith.addf %41, %42 : vector<1x2x128xf32>
    %c0_27 = arith.constant 0 : index
    %c0_28 = arith.constant 0 : index
    %c0_29 = arith.constant 0 : index
    %44 = vector.load %arg8[%c0_27, %c0_28, %c0_29] : memref<1x2x128xf32, #tpu.memory_space<vmem>>, vector<1x2x128xf32>
    tpu.vector_store %arg8[%c0_27, %c0_28, %c0_29], %43 {strides = array<i32>} : memref<1x2x128xf32, #tpu.memory_space<vmem>>, vector<1x2x128xf32>,
    return
  }
  func.func @transform_0(%arg0: i32, %arg1: i32) -> (i32, i32, i32, i32) {
    %c0_i32 = arith.constant 0 : i32
    %c0_i32_0 = arith.constant 0 : i32
    %c0_i32_1 = arith.constant 0 : i32
    %c0_i32_2 = arith.constant 0 : i32
    return %arg0, %c0_i32, %c0_i32_0, %c0_i32_1 : i32, i32, i32, i32
  }
  func.func @transform_1(%arg0: i32, %arg1: i32) -> (i32, i32) {
    %c0_i32 = arith.constant 0 : i32
    %c0_i32_0 = arith.constant 0 : i32
    %c0_i32_1 = arith.constant 0 : i32
    return %c0_i32, %c0_i32_0 : i32, i32
  }
  func.func @transform_2(%arg0: i32, %arg1: i32) -> (i32, i32) {
    %c0_i32 = arith.constant 0 : i32
    %c0_i32_0 = arith.constant 0 : i32
    %c0_i32_1 = arith.constant 0 : i32
    return %c0_i32, %c0_i32_0 : i32, i32
  }
  func.func @transform_3(%arg0: i32, %arg1: i32) -> (i32, i32, i32) {
    %c0_i32 = arith.constant 0 : i32
    %c0_i32_0 = arith.constant 0 : i32
    %c0_i32_1 = arith.constant 0 : i32
    %c0_i32_2 = arith.constant 0 : i32
    return %c0_i32, %c0_i32_0, %c0_i32_1 : i32, i32, i32
  }
  func.func @transform_4(%arg0: i32, %arg1: i32) -> (i32, i32) {
    %c0_i32 = arith.constant 0 : i32
    %c0_i32_0 = arith.constant 0 : i32
    %c0_i32_1 = arith.constant 0 : i32
    return %c0_i32, %c0_i32_0 : i32, i32
  }
  func.func @transform_5(%arg0: i32, %arg1: i32) -> (i32, i32, i32, i32) {
    %c0_i32 = arith.constant 0 : i32
    %c0_i32_0 = arith.constant 0 : i32
    %c0_i32_1 = arith.constant 0 : i32
    return %arg0, %arg1, %c0_i32, %c0_i32_0 : i32, i32, i32, i32
  }
  func.func @transform_6(%arg0: i32, %arg1: i32) -> (i32, i32, i32) {
    %c0_i32 = arith.constant 0 : i32
    %c0_i32_0 = arith.constant 0 : i32
    %c0_i32_1 = arith.constant 0 : i32
    return %arg0, %c0_i32, %c0_i32_0 : i32, i32, i32
  }
}

module attributes {stable_mosaic.version = 11 : i64} {
  func.func @_bn_relu_kernel(%arg0: i32, %arg1: i32, %arg2: memref<1x16x16x128xbf16, #tpu.memory_space<vmem>>, %arg3: memref<1x128xf32, #tpu.memory_space<vmem>>, %arg4: memref<1x128xf32, #tpu.memory_space<vmem>>, %arg5: memref<1x16x16x128xf32, #tpu.memory_space<vmem>>) attributes {dimension_semantics = [#tpu.dimension_semantics<parallel>, #tpu.dimension_semantics<parallel>], iteration_bounds = array<i64: 2, 1>, scalar_prefetch = 0 : i64, scratch_operands = 0 : i64, tpu.core_type = #tpu.core_type<tc>, window_params = [{transform_indices = @transform_0, window_bounds = array<i64: 1, 16, 16, 128>}, {pipeline_mode = #tpu.pipeline_mode<synchronous>, transform_indices = @transform_1, window_bounds = array<i64: 1, 128>}, {pipeline_mode = #tpu.pipeline_mode<synchronous>, transform_indices = @transform_2, window_bounds = array<i64: 1, 128>}, {transform_indices = @transform_3, window_bounds = array<i64: 1, 16, 16, 128>}]} {
    %c0 = arith.constant 0 : index
    %c0_0 = arith.constant 0 : index
    %c0_1 = arith.constant 0 : index
    %c0_2 = arith.constant 0 : index
    %0 = vector.load %arg2[%c0, %c0_0, %c0_1, %c0_2] : memref<1x16x16x128xbf16, #tpu.memory_space<vmem>>, vector<1x16x16x128xbf16>
    %1 = arith.extf %0 : vector<1x16x16x128xbf16> to vector<1x16x16x128xf32>
    %c0_3 = arith.constant 0 : index
    %c0_4 = arith.constant 0 : index
    %2 = vector.load %arg3[%c0_3, %c0_4] : memref<1x128xf32, #tpu.memory_space<vmem>>, vector<1x128xf32>
    %3 = vector.shape_cast %2 : vector<1x128xf32> to vector<1x1x1x128xf32>
    %4 = vector.broadcast %3 : vector<1x1x1x128xf32> to vector<1x16x16x128xf32>
    %5 = arith.mulf %1, %4 : vector<1x16x16x128xf32>
    %c0_5 = arith.constant 0 : index
    %c0_6 = arith.constant 0 : index
    %6 = vector.load %arg4[%c0_5, %c0_6] : memref<1x128xf32, #tpu.memory_space<vmem>>, vector<1x128xf32>
    %7 = vector.shape_cast %6 : vector<1x128xf32> to vector<1x1x1x128xf32>
    %8 = vector.broadcast %7 : vector<1x1x1x128xf32> to vector<1x16x16x128xf32>
    %9 = arith.addf %5, %8 : vector<1x16x16x128xf32>
    %cst = arith.constant 0.000000e+00 : f32
    %10 = vector.broadcast %cst : f32 to vector<1x16x16x128xf32>
    %11 = arith.maximumf %9, %10 : vector<1x16x16x128xf32>
    %c0_7 = arith.constant 0 : index
    %c0_8 = arith.constant 0 : index
    %c0_9 = arith.constant 0 : index
    %c0_10 = arith.constant 0 : index
    %12 = vector.load %arg5[%c0_7, %c0_8, %c0_9, %c0_10] : memref<1x16x16x128xf32, #tpu.memory_space<vmem>>, vector<1x16x16x128xf32>
    tpu.vector_store %arg5[%c0_7, %c0_8, %c0_9, %c0_10], %11 {strides = array<i32>} : memref<1x16x16x128xf32, #tpu.memory_space<vmem>>, vector<1x16x16x128xf32>,
    return
  }
  func.func @transform_0(%arg0: i32, %arg1: i32) -> (i32, i32, i32, i32) {
    %c0_i32 = arith.constant 0 : i32
    %c0_i32_0 = arith.constant 0 : i32
    %c0_i32_1 = arith.constant 0 : i32
    return %arg0, %arg1, %c0_i32, %c0_i32_0 : i32, i32, i32, i32
  }
  func.func @transform_1(%arg0: i32, %arg1: i32) -> (i32, i32) {
    %c0_i32 = arith.constant 0 : i32
    %c0_i32_0 = arith.constant 0 : i32
    %c0_i32_1 = arith.constant 0 : i32
    return %c0_i32, %c0_i32_0 : i32, i32
  }
  func.func @transform_2(%arg0: i32, %arg1: i32) -> (i32, i32) {
    %c0_i32 = arith.constant 0 : i32
    %c0_i32_0 = arith.constant 0 : i32
    %c0_i32_1 = arith.constant 0 : i32
    return %c0_i32, %c0_i32_0 : i32, i32
  }
  func.func @transform_3(%arg0: i32, %arg1: i32) -> (i32, i32, i32, i32) {
    %c0_i32 = arith.constant 0 : i32
    %c0_i32_0 = arith.constant 0 : i32
    %c0_i32_1 = arith.constant 0 : i32
    return %arg0, %arg1, %c0_i32, %c0_i32_0 : i32, i32, i32, i32
  }
}

</mosaic_0001>

<bundles_post_ra>
// kernel: _lambda_.4
= control target key start
LH: loop header
LB: loop body
LE: loop exit
PB: predicated region body
PF: predicated region fallthrough
CT: control target
= control target key end

     0   :  { %s759_s12 = smov 0   ;;  %s856_s0 = inlined_call_operand.vmem [shape: bf16[2,8,8,128], index: 0, kind: input, shape index: {}]   ;;  %s857_s1 = inlined_call_operand.vmem [shape: bf16[2,128,128], index: 1, kind: input, shape index: {}]   ;;  %s858_s2 = inlined_call_operand.vmem [shape: f32[1,128], index: 2, kind: input, shape index: {}]   ;;  %s859_s3 = inlined_call_operand.vmem [shape: bf16[16,2,8,128], index: 3, kind: output, shape index: {}]  }
   0x1 LB: > { %s765_s13 = sadd.s32 4294967295, %s737_s12   ;;  %p575_p0 = scmp.ge.s32.totalorder %s737_s12, 1  ;;  %s737_s12 = sphi %s759_s12, %s13_s12  }
   0x2   : > { %p137_p1 = scmp.lt.s32.totalorder %s737_s12, 3 }
   0x4   : > { %p138_p2 = pnand %p575_p0, %p137_p1 }
   0x5   : > { %v711_v0 = vld [vmem:[%s857_s1] sm:$0xff] (!%p138_p2)   ;;  %v713_v2 = vld [vmem:[%s857_s1 + $0x8] sm:$0xff] (!%p138_p2)   ;;  %p162_p3 = scmp.lt.s32.totalorder (!%p138_p2), %s765_s13, 1  ;;  %v715_v4 = vld [vmem:[%s857_s1 + $0x10] sm:$0xff] (!%p138_p2)  }
   0x6   : > { %141 = sbr.rel (%p138_p2) target bundleno = 267 (0x10b), region = 32  ;;  %v712_v1 = vld [vmem:[%s857_s1 + $0x40] sm:$0xff] (!%p138_p2)   ;;  %655 = vmatprep.subr.bf16.mxu0 (!%p138_p2), %v711_v0  ;;  %v714_v3 = vld [vmem:[%s857_s1 + $0x48] sm:$0xff] (!%p138_p2)   ;;  %v716_v5 = vld [vmem:[%s857_s1 + $0x50] sm:$0xff] (!%p138_p2)  }
   0x7   : > { %679 = vmatprep.subr.bf16.mxu1 (!%p138_p2), %v712_v1  ;;  %656 = vmatpush3.bf16.msra.mxu0 (!%p138_p2), %v711_v0  ;;  %v717_v6 = vld [vmem:[%s857_s1 + $0x18] sm:$0xff] (!%p138_p2)   ;;  %v719_v8 = vld [vmem:[%s857_s1 + $0x20] sm:$0xff] (!%p138_p2)   ;;  %v721_v10 = vld [vmem:[%s857_s1 + $0x28] sm:$0xff] (!%p138_p2)  }
   0x8   : > { %680 = vmatpush3.bf16.msra.mxu1 (!%p138_p2), %v712_v1  ;;  %657 = vmatprep.subr.bf16.mxu0 (!%p138_p2), %v713_v2  ;;  %v718_v7 = vld [vmem:[%s857_s1 + $0x58] sm:$0xff] (!%p138_p2)   ;;  %v720_v9 = vld [vmem:[%s857_s1 + $0x60] sm:$0xff] (!%p138_p2)   ;;  %v722_v12 = vld [vmem:[%s857_s1 + $0x68] sm:$0xff] (!%p138_p2)  }
   0x9   : > { %681 = vmatprep.subr.bf16.mxu1 (!%p138_p2), %v714_v3  ;;  %v723_v13 = vld [vmem:[%s857_s1 + $0x30] sm:$0xff] (!%p138_p2)   ;;  %v725_v15 = vld [vmem:[%s857_s1 + $0x38] sm:$0xff] (!%p138_p2)   ;;  %v581_v20 = vld [vmem:[%s858_s2] ss:$0 sm:$0xff] (!%p138_p2) }
   0xa   : > { %v724_v14 = vld [vmem:[%s857_s1 + $0x70] sm:$0xff] (!%p138_p2)   ;;  %v726_v16 = vld [vmem:[%s857_s1 + $0x78] sm:$0xff] (!%p138_p2)  }
   0xb   : > { %658 = vmatpush3.bf16.msra.mxu0 (!%p138_p2), %v713_v2 }
   0xc   : > { %682 = vmatpush3.bf16.msra.mxu1 (!%p138_p2), %v714_v3  ;;  %659 = vmatprep.subr.bf16.mxu0 (!%p138_p2), %v715_v4 }
   0xd   : > { %s163_s26 = scalar_select %p162_p3, %s765_s13, 1  ;;  %683 = vmatprep.subr.bf16.mxu1 %v716_v5 }
   0xf   : > { %s629_s4 = sshll.u32 %s163_s26, 5  ;;  %660 = vmatpush3.bf16.msra.mxu0 %v715_v4  ;;  %s578_s26 = sshll.u32 %s765_s13, 3 }
  0x10   : > { %684 = vmatpush3.bf16.msra.mxu1 %v716_v5  ;;  %661 = vmatprep.subr.bf16.mxu0 %v717_v6  ;;  %s804_s11 = scalar_lea.vmem %s856_s0, %s629_s4  ;;  %p168_p4 = scmp.lt.s32.totalorder %s578_s26, 15 }
  0x11   : > { %685 = vmatprep.subr.bf16.mxu1 %v718_v7  ;;  %v727_v11 = vld [vmem:[%s804_s11] sm:$0xff]   ;;  %v728_v17 = vld [vmem:[%s804_s11 + $0x8] sm:$0xff]   ;;  %v729_v18 = vld [vmem:[%s804_s11 + $0x10] sm:$0xff]  }
  0x12   : > { %671 = vmatprep.mubr.bf16.mxu0 %v727_v11  ;;  %695 = vmatprep.mubr.bf16.mxu1 %v727_v11  ;;  %v730_v19 = vld [vmem:[%s804_s11 + $0x18] sm:$0xff]   ;;  %s861_s26 = smov (!%p168_p4, %s578_s26), 15 }
  0x13   : > { %662 = vmatpush3.bf16.msra.mxu0 %v717_v6  ;;  %s630_s29 = sshll.u32 %s861_s26, 3 }
  0x14   : > { %686 = vmatpush3.bf16.msra.mxu1 %v718_v7  ;;  %663 = vmatprep.subr.bf16.mxu0 %v719_v8  ;;  %s835_s5 = scalar_lea.vmem %s859_s3, %s630_s29 }
  0x15   : > { %687 = vmatprep.subr.bf16.mxu1 %v720_v9 }
  0x17   : > { %664 = vmatpush3.bf16.msra.mxu0 %v719_v8 }
  0x18   : > { %688 = vmatpush3.bf16.msra.mxu1 %v720_v9  ;;  %665 = vmatprep.subr.bf16.mxu0 %v721_v10 }
  0x19   : > { %689 = vmatprep.subr.bf16.mxu1 %v722_v12 }
  0x1b   : > { %666 = vmatpush3.bf16.msra.mxu0 %v721_v10 }
  0x1c   : > { %690 = vmatpush3.bf16.msra.mxu1 %v722_v12  ;;  %667 = vmatprep.subr.bf16.mxu0 %v723_v13 }
  0x1d   : > { %691 = vmatprep.subr.bf16.mxu1 %v724_v14 }
  0x1f   : > { %668 = vmatpush3.bf16.msra.mxu0 %v723_v13 }
  0x20   : > { %692 = vmatpush3.bf16.msra.mxu1 %v724_v14  ;;  %669 = vmatprep.subr.bf16.mxu0 %v725_v15 }
  0x21   : > { %693 = vmatprep.subr.bf16.mxu1 %v726_v16 }
  0x23   : > { %670 = vmatpush3.bf16.msra.mxu0 %v725_v15 }
  0x24   : > { %694 = vmatpush3.bf16.msra.mxu1 %v726_v16 }
  0x26   : > { %672 = vmatmul.mubr.bf16.vlgmr.msra.gmra.mrb[0].mxu0 %v728_v17 }
  0x27   : > { %696 = vmatmul.mubr.bf16.vlgmr.msra.gmra.mrb[0].mxu1 %v728_v17  ;;  %675 = vmatprep.mubr.bf16.mxu0 %v729_v18 }
  0x28   : > { %699 = vmatprep.mubr.bf16.mxu1 %v729_v18 }
  0x2e   : > { %676 = vmatmul.mubr.bf16.gmra.mrb[4].mxu0 %v730_v19 }
  0x2f   : > { %700 = vmatmul.mubr.bf16.gmra.mrb[4].mxu1 %v730_v19 }
  0xf9   : > { %v673_v21 = vpop.f32.mrb[0].mxu0 }
  0xfa   : > { %v321_v22 = vadd.f32 %v673_v21, %v581_v20  ;;  %v697_v23 = vpop.f32.mrb[0].mxu1  ;;  %v312_v24 = vpop.f32.mrb[1].mxu0 }
  0xfb   : > { %v474_v25 = vadd.f32 %v697_v23, %v581_v20  ;;  %v313_v26 = vadd.f32 %v581_v20, %v312_v24  ;;  %v465_v27 = vpop.f32.mrb[1].mxu1  ;;  %v674_v28 = vpop.f32.mrb[2].mxu0 }
  0xfc   : > { %v345_v29 = vpack.c.bf16 %v321_v22, %v321_v22  ;;  %v466_v30 = vadd.f32 %v581_v20, %v465_v27  ;;  %v324_v31 = vadd.f32 %v674_v28, %v581_v20  ;;  %v698_v32 = vpop.f32.mrb[2].mxu1  ;;  %v315_v33 = vpop.f32.mrb[3].mxu0 }
  0xfd   : > { %v498_v34 = vpack.c.bf16 %v474_v25, %v474_v25  ;;  %v343_v35 = vpack.c.bf16 %v313_v26, %v313_v26  ;;  %v477_v36 = vadd.f32 %v698_v32, %v581_v20  ;;  %v316_v37 = vadd.f32 %v581_v20, %v315_v33  ;;  %v468_v38 = vpop.f32.mrb[3].mxu1 }
  0xfe   : > { %353 = vst [vmem:[%s835_s5 + $0x10] sm:$0xf] %v345_v29  ;;  %v496_v39 = vpack.c.bf16 %v466_v30, %v466_v30  ;;  %v346_v40 = vpack.c.bf16 %v324_v31, %v324_v31  ;;  %v469_v41 = vadd.f32 %v581_v20, %v468_v38 }
  0xff   : > { %621 = vst [vmem:[%s835_s5 + $0x14] sm:$0xf] %v498_v34  ;;  %351 = vst [vmem:[%s835_s5] sm:$0xf] %v343_v35  ;;  %v499_v42 = vpack.c.bf16 %v477_v36, %v477_v36  ;;  %v344_v43 = vpack.c.bf16 %v316_v37, %v316_v37 }
 0x100   : > { %619 = vst [vmem:[%s835_s5 + $0x4] sm:$0xf] %v496_v39  ;;  %354 = vst [vmem:[%s835_s5 + $0x18] sm:$0xf] %v346_v40  ;;  %v497_v44 = vpack.c.bf16 %v469_v41, %v469_v41 }
 0x101   : > { %622 = vst [vmem:[%s835_s5 + $0x1c] sm:$0xf] %v499_v42  ;;  %352 = vst [vmem:[%s835_s5 + $0x8] sm:$0xf] %v344_v43  ;;  %v677_v45 = vpop.f32.mrb[4].mxu0 }
 0x102   : > { %620 = vst [vmem:[%s835_s5 + $0xc] sm:$0xf] %v497_v44  ;;  %v337_v46 = vadd.f32 %v677_v45, %v581_v20  ;;  %v701_v47 = vpop.f32.mrb[4].mxu1  ;;  %v328_v48 = vpop.f32.mrb[5].mxu0 }
 0x103   : > { %v490_v49 = vadd.f32 %v701_v47, %v581_v20  ;;  %v329_v50 = vadd.f32 %v581_v20, %v328_v48  ;;  %v481_v51 = vpop.f32.mrb[5].mxu1  ;;  %v678_v52 = vpop.f32.mrb[6].mxu0 }
 0x104   : > { %v349_v53 = vpack.c.bf16 %v337_v46, %v337_v46  ;;  %v482_v54 = vadd.f32 %v581_v20, %v481_v51  ;;  %v340_v55 = vadd.f32 %v678_v52, %v581_v20  ;;  %v702_v56 = vpop.f32.mrb[6].mxu1  ;;  %v331_v57 = vpop.f32.mrb[7].mxu0 }
 0x105   : > { %v502_v58 = vpack.c.bf16 %v490_v49, %v490_v49  ;;  %v347_v59 = vpack.c.bf16 %v329_v50, %v329_v50  ;;  %v493_v60 = vadd.f32 %v702_v56, %v581_v20  ;;  %v332_v61 = vadd.f32 %v581_v20, %v331_v57  ;;  %v484_v62 = vpop.f32.mrb[7].mxu1 }
 0x106   : > { %357 = vst [vmem:[%s835_s5 + $0x30] sm:$0xf] %v349_v53  ;;  %v500_v63 = vpack.c.bf16 %v482_v54, %v482_v54  ;;  %v350_v0 = vpack.c.bf16 %v340_v55, %v340_v55  ;;  %v485_v1 = vadd.f32 %v581_v20, %v484_v62 }
 0x107   : > { %625 = vst [vmem:[%s835_s5 + $0x34] sm:$0xf] %v502_v58  ;;  %355 = vst [vmem:[%s835_s5 + $0x20] sm:$0xf] %v347_v59  ;;  %v503_v2 = vpack.c.bf16 %v493_v60, %v493_v60  ;;  %v348_v3 = vpack.c.bf16 %v332_v61, %v332_v61 }
 0x108   : > { %623 = vst [vmem:[%s835_s5 + $0x24] sm:$0xf] %v500_v63  ;;  %358 = vst [vmem:[%s835_s5 + $0x38] sm:$0xf] %v350_v0  ;;  %v501_v4 = vpack.c.bf16 %v485_v1, %v485_v1 }
 0x109   : > { %626 = vst [vmem:[%s835_s5 + $0x3c] sm:$0xf] %v503_v2  ;;  %356 = vst [vmem:[%s835_s5 + $0x28] sm:$0xf] %v348_v3 }
 0x10a   : > { %624 = vst [vmem:[%s835_s5 + $0x2c] sm:$0xf] %v501_v4 }
 0x10b PF: > { %s13_s12 = sadd.s32 1, %s737_s12  }
 0x10c   : > { %p10_p5 = scmp.ge.s32.totalorder %s13_s12, 4  }
 0x10e   :  { %12 = sbr.rel (!%p10_p5) target bundleno = 1 (0x1), region = 64 }

// kernel: _lambda_.7
= control target key start
LH: loop header
LB: loop body
LE: loop exit
PB: predicated region body
PF: predicated region fallthrough
CT: control target
= control target key end

     0   :  { %s679_s12 = smov 0   ;;  %s681_s13 = smov 0   ;;  %s842_s0 = inlined_call_operand.vmem [shape: bf16[2,16,16,128], index: 0, kind: input, shape index: {}]   ;;  %s843_s1 = inlined_call_operand.vmem [shape: f32[1,128], index: 1, kind: input, shape index: {}]   ;;  %s844_s2 = inlined_call_operand.vmem [shape: f32[1,128], index: 2, kind: input, shape index: {}]   ;;  %s845_s3 = inlined_call_operand.vmem [shape: f32[2,16,16,128], index: 3, kind: output, shape index: {}]  }
   0x1   :  { %s683_s14 = smov 0  }
   0x2 LB: > { %s25_s15 = sadd.s32 1, %s653_s13  ;;  %p521_p0 = scmp.ge.s32.totalorder %s657_s14, 1  ;;  %s657_s14 = sphi %s683_s14, %s13_s14   ;;  %s653_s13 = sphi %s681_s13, %s847_s13   ;;  %s649_s12 = sphi %s679_s12, %s846_s12  }
   0x3   : > { %p27_p1 = scmp.ge.s32.totalorder %s25_s15, 2  ;;  %p159_p2 = scmp.lt.s32.totalorder %s657_s14, 3 }
   0x5   : > { %s849_s15 = smov (%p27_p1, %s25_s15), 0  ;;  %p160_p3 = pnand %p521_p0, %p159_p2 }
   0x6   : > { %p194_p4 = scmp.lt.s32.totalorder (!%p160_p3), %s649_s12, 1  ;;  %v708_v0 = vld [vmem:[%s843_s1] ss:$0 sm:$0xff] (!%p160_p3) }
   0x7   : > { %163 = sbr.rel (%p160_p3) target bundleno = 54 (0x36), region = 32  ;;  %v717_v9 = vld [vmem:[%s844_s2] ss:$0 sm:$0xff] (!%p160_p3) }
   0xe   : > { %s851_s12 = smov (!%p194_p4, %s649_s12), 1 }
   0xf   : > { %s530_s16 = sshll.u32 %s851_s12, 7  ;;  %s531_s24 = sshll.u32 %s851_s12, 8 }
  0x10   : > { %s703_s19 = scalar_lea.vmem %s842_s0, %s530_s16  ;;  %s735_s27 = scalar_lea.vmem %s845_s3, %s531_s24 }
  0x11   : > { %v533_v1 = vld [vmem:[%s703_s19] sm:$0xff]   ;;  %v596_v2 = vld [vmem:[%s703_s19 + $0x8] sm:$0xff]   ;;  %v597_v3 = vld [vmem:[%s703_s19 + $0x10] sm:$0xff]  }
  0x12   : > { %v534_v4 = vunpack.c.l.bf16 %v533_v1  ;;  %v535_v5 = vunpack.c.h.bf16 %v533_v1  ;;  %v538_v6 = vunpack.c.l.bf16 %v596_v2  ;;  %v539_v7 = vunpack.c.h.bf16 %v596_v2  ;;  %v598_v8 = vld [vmem:[%s703_s19 + $0x18] sm:$0xff]   ;;  %v599_v30 = vld [vmem:[%s703_s19 + $0x20] sm:$0xff]   ;;  %v600_v31 = vld [vmem:[%s703_s19 + $0x28] sm:$0xff]  }
  0x13   : > { %v542_v10 = vunpack.c.l.bf16 %v597_v3  ;;  %v543_v11 = vunpack.c.h.bf16 %v597_v3  ;;  %v546_v12 = vunpack.c.l.bf16 %v598_v8  ;;  %v547_v13 = vunpack.c.h.bf16 %v598_v8  ;;  %v601_v36 = vld [vmem:[%s703_s19 + $0x30] sm:$0xff]   ;;  %v602_v37 = vld [vmem:[%s703_s19 + $0x38] sm:$0xff]   ;;  %v603_v3 = vld [vmem:[%s703_s19 + $0x40] sm:$0xff]  }
  0x14   : > { %v286_v14 = vmul.f32 %v534_v4, %v708_v0  ;;  %v287_v15 = vmul.f32 %v535_v5, %v708_v0  ;;  %v288_v16 = vmul.f32 %v538_v6, %v708_v0  ;;  %v289_v17 = vmul.f32 %v539_v7, %v708_v0  ;;  %v604_v4 = vld [vmem:[%s703_s19 + $0x48] sm:$0xff]  }
  0x15   : > { %v290_v18 = vmul.f32 %v542_v10, %v708_v0  ;;  %v291_v19 = vmul.f32 %v543_v11, %v708_v0  ;;  %v292_v20 = vmul.f32 %v546_v12, %v708_v0  ;;  %v293_v21 = vmul.f32 %v547_v13, %v708_v0  ;;  %v605_v10 = vld [vmem:[%s703_s19 + $0x50] sm:$0xff]   ;;  %v606_v11 = vld [vmem:[%s703_s19 + $0x58] sm:$0xff]  }
  0x16   : > { %v325_v22 = vadd.f32 %v717_v9, %v286_v14  ;;  %v326_v23 = vadd.f32 %v717_v9, %v287_v15  ;;  %v327_v24 = vadd.f32 %v717_v9, %v288_v16  ;;  %v328_v25 = vadd.f32 %v717_v9, %v289_v17 }
  0x17   : > { %v329_v26 = vadd.f32 %v717_v9, %v290_v18  ;;  %v330_v27 = vadd.f32 %v717_v9, %v291_v19  ;;  %v331_v28 = vadd.f32 %v717_v9, %v292_v20  ;;  %v332_v29 = vadd.f32 %v717_v9, %v293_v21 }
  0x18   : > { %v357_v32 = vmax.f32 %v325_v22, 0.0  ;;  %v358_v33 = vmax.f32 %v326_v23, 0.0  ;;  %v359_v34 = vmax.f32 %v327_v24, 0.0  ;;  %v360_v35 = vmax.f32 %v328_v25, 0.0 }
  0x19   : > { %v361_v38 = vmax.f32 %v329_v26, 0.0  ;;  %v362_v39 = vmax.f32 %v330_v27, 0.0  ;;  %v363_v40 = vmax.f32 %v331_v28, 0.0  ;;  %v364_v41 = vmax.f32 %v332_v29, 0.0 }
  0x1a   : > { %389 = vst [vmem:[%s735_s27] sm:$0xff] %v357_v32  ;;  %390 = vst [vmem:[%s735_s27 + $0x8] sm:$0xff] %v358_v33  ;;  %v550_v42 = vunpack.c.l.bf16 %v599_v30  ;;  %v551_v43 = vunpack.c.h.bf16 %v599_v30  ;;  %v554_v44 = vunpack.c.l.bf16 %v600_v31  ;;  %v555_v45 = vunpack.c.h.bf16 %v600_v31 }
  0x1b   : > { %391 = vst [vmem:[%s735_s27 + $0x10] sm:$0xff] %v359_v34  ;;  %392 = vst [vmem:[%s735_s27 + $0x18] sm:$0xff] %v360_v35  ;;  %v558_v46 = vunpack.c.l.bf16 %v601_v36  ;;  %v559_v47 = vunpack.c.h.bf16 %v601_v36  ;;  %v562_v48 = vunpack.c.l.bf16 %v602_v37  ;;  %v563_v49 = vunpack.c.h.bf16 %v602_v37 }
  0x1c   : > { %393 = vst [vmem:[%s735_s27 + $0x20] sm:$0xff] %v361_v38  ;;  %394 = vst [vmem:[%s735_s27 + $0x28] sm:$0xff] %v362_v39  ;;  %v294_v50 = vmul.f32 %v550_v42, %v708_v0  ;;  %v295_v51 = vmul.f32 %v551_v43, %v708_v0  ;;  %v296_v52 = vmul.f32 %v554_v44, %v708_v0  ;;  %v566_v16 = vunpack.c.l.bf16 %v603_v3 }
  0x1d   : > { %395 = vst [vmem:[%s735_s27 + $0x30] sm:$0xff] %v363_v40  ;;  %396 = vst [vmem:[%s735_s27 + $0x38] sm:$0xff] %v364_v41  ;;  %v297_v53 = vmul.f32 %v555_v45, %v708_v0  ;;  %v298_v54 = vmul.f32 %v558_v46, %v708_v0  ;;  %v299_v55 = vmul.f32 %v559_v47, %v708_v0  ;;  %v567_v17 = vunpack.c.h.bf16 %v603_v3  ;;  %v607_v40 = vld [vmem:[%s703_s19 + $0x60] sm:$0xff]   ;;  %v608_v41 = vld [vmem:[%s703_s19 + $0x68] sm:$0xff]  }
  0x1e   : > { %v300_v56 = vmul.f32 %v562_v48, %v708_v0  ;;  %v301_v57 = vmul.f32 %v563_v49, %v708_v0  ;;  %v333_v58 = vadd.f32 %v717_v9, %v294_v50  ;;  %v334_v59 = vadd.f32 %v717_v9, %v295_v51  ;;  %v609_v46 = vld [vmem:[%s703_s19 + $0x70] sm:$0xff]   ;;  %v610_v47 = vld [vmem:[%s703_s19 + $0x78] sm:$0xff]  }
  0x1f   : > { %v335_v60 = vadd.f32 %v717_v9, %v296_v52  ;;  %v336_v61 = vadd.f32 %v717_v9, %v297_v53  ;;  %v337_v62 = vadd.f32 %v717_v9, %v298_v54  ;;  %v338_v63 = vadd.f32 %v717_v9, %v299_v55 }
  0x20   : > { %v339_v1 = vadd.f32 %v717_v9, %v300_v56  ;;  %v340_v2 = vadd.f32 %v717_v9, %v301_v57  ;;  %v365_v5 = vmax.f32 %v333_v58, 0.0  ;;  %v366_v6 = vmax.f32 %v334_v59, 0.0 }
  0x21   : > { %v367_v7 = vmax.f32 %v335_v60, 0.0  ;;  %v368_v8 = vmax.f32 %v336_v61, 0.0  ;;  %v369_v12 = vmax.f32 %v337_v62, 0.0  ;;  %v370_v13 = vmax.f32 %v338_v63, 0.0 }
  0x22   : > { %v371_v14 = vmax.f32 %v339_v1, 0.0  ;;  %v372_v15 = vmax.f32 %v340_v2, 0.0  ;;  %397 = vst [vmem:[%s735_s27 + $0x40] sm:$0xff] %v365_v5  ;;  %398 = vst [vmem:[%s735_s27 + $0x48] sm:$0xff] %v366_v6  ;;  %v570_v18 = vunpack.c.l.bf16 %v604_v4  ;;  %v571_v19 = vunpack.c.h.bf16 %v604_v4 }
  0x23   : > { %399 = vst [vmem:[%s735_s27 + $0x50] sm:$0xff] %v367_v7  ;;  %400 = vst [vmem:[%s735_s27 + $0x58] sm:$0xff] %v368_v8  ;;  %v574_v20 = vunpack.c.l.bf16 %v605_v10  ;;  %v575_v21 = vunpack.c.h.bf16 %v605_v10  ;;  %v578_v22 = vunpack.c.l.bf16 %v606_v11  ;;  %v579_v23 = vunpack.c.h.bf16 %v606_v11 }
  0x24   : > { %401 = vst [vmem:[%s735_s27 + $0x60] sm:$0xff] %v369_v12  ;;  %402 = vst [vmem:[%s735_s27 + $0x68] sm:$0xff] %v370_v13  ;;  %v302_v24 = vmul.f32 %v566_v16, %v708_v0  ;;  %v303_v25 = vmul.f32 %v567_v17, %v708_v0  ;;  %v304_v26 = vmul.f32 %v570_v18, %v708_v0  ;;  %v582_v52 = vunpack.c.l.bf16 %v607_v40 }
  0x25   : > { %403 = vst [vmem:[%s735_s27 + $0x70] sm:$0xff] %v371_v14  ;;  %404 = vst [vmem:[%s735_s27 + $0x78] sm:$0xff] %v372_v15  ;;  %v305_v27 = vmul.f32 %v571_v19, %v708_v0  ;;  %v306_v28 = vmul.f32 %v574_v20, %v708_v0  ;;  %v307_v29 = vmul.f32 %v575_v21, %v708_v0  ;;  %v583_v53 = vunpack.c.h.bf16 %v607_v40 }
  0x26   : > { %v308_v30 = vmul.f32 %v578_v22, %v708_v0  ;;  %v309_v31 = vmul.f32 %v579_v23, %v708_v0  ;;  %v341_v32 = vadd.f32 %v717_v9, %v302_v24  ;;  %v342_v33 = vadd.f32 %v717_v9, %v303_v25 }
  0x27   : > { %v343_v34 = vadd.f32 %v717_v9, %v304_v26  ;;  %v344_v35 = vadd.f32 %v717_v9, %v305_v27  ;;  %v345_v36 = vadd.f32 %v717_v9, %v306_v28  ;;  %v346_v37 = vadd.f32 %v717_v9, %v307_v29 }
  0x28   : > { %v347_v38 = vadd.f32 %v717_v9, %v308_v30  ;;  %v348_v39 = vadd.f32 %v717_v9, %v309_v31  ;;  %v373_v42 = vmax.f32 %v341_v32, 0.0  ;;  %v374_v43 = vmax.f32 %v342_v33, 0.0 }
  0x29   : > { %v375_v44 = vmax.f32 %v343_v34, 0.0  ;;  %v376_v45 = vmax.f32 %v344_v35, 0.0  ;;  %v377_v48 = vmax.f32 %v345_v36, 0.0  ;;  %v378_v49 = vmax.f32 %v346_v37, 0.0 }
  0x2a   : > { %v379_v50 = vmax.f32 %v347_v38, 0.0  ;;  %v380_v51 = vmax.f32 %v348_v39, 0.0  ;;  %405 = vst [vmem:[%s735_s27 + $0x80] sm:$0xff] %v373_v42  ;;  %406 = vst [vmem:[%s735_s27 + $0x88] sm:$0xff] %v374_v43  ;;  %v586_v54 = vunpack.c.l.bf16 %v608_v41  ;;  %v587_v55 = vunpack.c.h.bf16 %v608_v41 }
  0x2b   : > { %407 = vst [vmem:[%s735_s27 + $0x90] sm:$0xff] %v375_v44  ;;  %408 = vst [vmem:[%s735_s27 + $0x98] sm:$0xff] %v376_v45  ;;  %v590_v56 = vunpack.c.l.bf16 %v609_v46  ;;  %v591_v57 = vunpack.c.h.bf16 %v609_v46  ;;  %v594_v58 = vunpack.c.l.bf16 %v610_v47  ;;  %v595_v59 = vunpack.c.h.bf16 %v610_v47 }
  0x2c   : > { %409 = vst [vmem:[%s735_s27 + $0xa0] sm:$0xff] %v377_v48  ;;  %410 = vst [vmem:[%s735_s27 + $0xa8] sm:$0xff] %v378_v49  ;;  %v310_v60 = vmul.f32 %v582_v52, %v708_v0  ;;  %v311_v61 = vmul.f32 %v583_v53, %v708_v0  ;;  %v312_v62 = vmul.f32 %v586_v54, %v708_v0 }
  0x2d   : > { %411 = vst [vmem:[%s735_s27 + $0xb0] sm:$0xff] %v379_v50  ;;  %412 = vst [vmem:[%s735_s27 + $0xb8] sm:$0xff] %v380_v51  ;;  %v313_v63 = vmul.f32 %v587_v55, %v708_v0  ;;  %v314_v1 = vmul.f32 %v590_v56, %v708_v0  ;;  %v315_v2 = vmul.f32 %v591_v57, %v708_v0 }
  0x2e   : > { %v316_v3 = vmul.f32 %v594_v58, %v708_v0  ;;  %v317_v4 = vmul.f32 %v595_v59, %v708_v0  ;;  %v349_v5 = vadd.f32 %v717_v9, %v310_v60  ;;  %v350_v6 = vadd.f32 %v717_v9, %v311_v61 }
  0x2f   : > { %v351_v7 = vadd.f32 %v717_v9, %v312_v62  ;;  %v352_v8 = vadd.f32 %v717_v9, %v313_v63  ;;  %v353_v10 = vadd.f32 %v717_v9, %v314_v1  ;;  %v354_v11 = vadd.f32 %v717_v9, %v315_v2 }
  0x30   : > { %v355_v0 = vadd.f32 %v717_v9, %v316_v3  ;;  %v356_v12 = vadd.f32 %v717_v9, %v317_v4  ;;  %v381_v13 = vmax.f32 %v349_v5, 0.0  ;;  %v382_v14 = vmax.f32 %v350_v6, 0.0 }
  0x31   : > { %v383_v15 = vmax.f32 %v351_v7, 0.0  ;;  %v384_v16 = vmax.f32 %v352_v8, 0.0  ;;  %v385_v17 = vmax.f32 %v353_v10, 0.0  ;;  %v386_v18 = vmax.f32 %v354_v11, 0.0 }
  0x32   : > { %v387_v19 = vmax.f32 %v355_v0, 0.0  ;;  %v388_v20 = vmax.f32 %v356_v12, 0.0  ;;  %413 = vst [vmem:[%s735_s27 + $0xc0] sm:$0xff] %v381_v13  ;;  %414 = vst [vmem:[%s735_s27 + $0xc8] sm:$0xff] %v382_v14 }
  0x33   : > { %415 = vst [vmem:[%s735_s27 + $0xd0] sm:$0xff] %v383_v15  ;;  %416 = vst [vmem:[%s735_s27 + $0xd8] sm:$0xff] %v384_v16 }
  0x34   : > { %417 = vst [vmem:[%s735_s27 + $0xe0] sm:$0xff] %v385_v17  ;;  %418 = vst [vmem:[%s735_s27 + $0xe8] sm:$0xff] %v386_v18 }
  0x35   : > { %419 = vst [vmem:[%s735_s27 + $0xf0] sm:$0xff] %v387_v19  ;;  %420 = vst [vmem:[%s735_s27 + $0xf8] sm:$0xff] %v388_v20 }
  0x36 PF: > { %s13_s14 = sadd.s32 1, %s657_s14   ;;  %s846_s12 = smov %s653_s13 }
  0x37   : > { %p10_p5 = scmp.ge.s32.totalorder %s13_s14, 4   ;;  %s847_s13 = smov %s849_s15 }
  0x39   :  { %12 = sbr.rel (!%p10_p5) target bundleno = 2 (0x2), region = 62 }

// kernel: _lambda_.6
= control target key start
LH: loop header
LB: loop body
LE: loop exit
PB: predicated region body
PF: predicated region fallthrough
CT: control target
= control target key end

     0   :  { %s4472_s21 = smov 0   ;;  %s4474_s22 = smov 0   ;;  %s5716_s0 = inlined_call_operand.vmem [shape: bf16[2,16,16,128], index: 0, kind: input, shape index: {}]   ;;  %s5717_s1 = inlined_call_operand.vmem [shape: f32[1,128], index: 1, kind: input, shape index: {}]   ;;  %s5718_s2 = inlined_call_operand.vmem [shape: f32[1,128], index: 2, kind: input, shape index: {}]   ;;  %s5719_s3 = inlined_call_operand.vmem [shape: bf16[3,384,128], index: 3, kind: input, shape index: {}]   ;;  %s5720_s4 = inlined_call_operand.vmem [shape: f32[1,128], index: 4, kind: input, shape index: {}]   ;;  %s5721_s5 = inlined_call_operand.vmem [shape: bf16[2,16,16,128], index: 5, kind: output, shape index: {0}]   ;;  %s5722_s6 = inlined_call_operand.vmem [shape: f32[2,2,128], index: 6, kind: output, shape index: {1}]  }
   0x1   :  { %s4476_s23 = smov 0  }
   0x2 LB: > { %s29_s24 = sadd.s32 1, %s4429_s22  ;;  %p3038_p0 = scmp.ge.s32.totalorder %s4433_s23, 1  ;;  %s4433_s23 = sphi %s4476_s23, %s17_s23   ;;  %s4429_s22 = sphi %s4474_s22, %s5743_s22   ;;  %s4425_s21 = sphi %s4472_s21, %s5742_s21  }
   0x3   : > { %p31_p1 = scmp.ge.s32.totalorder %s29_s24, 2  ;;  %p229_p2 = scmp.lt.s32.totalorder %s4433_s23, 3 }
   0x5   : > { %s5745_s24 = smov (%p31_p1, %s29_s24), 0  ;;  %p230_p3 = pnand %p3038_p0, %p229_p2 }
   0x7   : > { %233 = sbr.rel (%p230_p3) target bundleno = 582 (0x246), region = 40 }
   0xe   : > { %v4339_v0 = vld [vmem:[%s5719_s3 + $0x40] sm:$0xff]   ;;  %v5723_v2 = vmov 0   ;;  %v4342_v4 = vld [vmem:[%s5719_s3 + $0x48] sm:$0xff]   ;;  %v4345_v7 = vld [vmem:[%s5719_s3 + $0x50] sm:$0xff]   ;;  %p268_p4 = scmp.lt.s32.totalorder %s4425_s21, 1  ;;  %vm666_vm0 = vcmask 1047552  }
   0xf   : > { %v4498_v1 = vld [vmem:[%s5719_s3 + $0x80] sm:$0xff]   ;;  %1115 = vmatprep.mubr.bf16.mxu0 %v5723_v2  ;;  %3553 = vmatprep.subr.bf16.mxu0 %v4339_v0  ;;  %v4512_v5 = vld [vmem:[%s5719_s3 + $0x88] sm:$0xff]   ;;  %v4524_v8 = vld [vmem:[%s5719_s3 + $0x90] sm:$0xff]   ;;  %vm781_vm1 = vsmask.f32 7424  ;;  %vm2901_vm5 = vcmask 1040384  }
  0x10   : > { %v4341_v3 = vld [vmem:[%s5719_s3] sm:$0xff]   ;;  %4105 = vmatprep.subr.bf16.mxu1 %v4498_v1  ;;  %v4344_v6 = vld [vmem:[%s5719_s3 + $0x8] sm:$0xff]   ;;  %v4347_v9 = vld [vmem:[%s5719_s3 + $0x10] sm:$0xff]   ;;  %s5747_s21 = smov (!%p268_p4, %s4425_s21), 1  ;;  %vm667_vm2 = vsmask.f32 7938 }
  0x11   : > { %3554 = vmatpush3.bf16.msra.mxu0 %v4341_v3  ;;  %4113 = vmatpush3.bf16.msra.mxu1 %v4498_v1  ;;  %v4348_v10 = vld [vmem:[%s5719_s3 + $0x58] sm:$0xff]   ;;  %v4351_v13 = vld [vmem:[%s5719_s3 + $0x60] sm:$0xff]   ;;  %v4354_v16 = vld [vmem:[%s5719_s3 + $0x68] sm:$0xff]   ;;  %s3345_s15 = sshll.u32 %s5747_s21, 7  ;;  %s3043_s26 = sshll.u32 %s5747_s21, 1 }
  0x12   : > { %3555 = vmatprep.subr.bf16.mxu0 %v4342_v4  ;;  %4106 = vmatprep.subr.bf16.mxu1 %v4512_v5  ;;  %v4537_v11 = vld [vmem:[%s5719_s3 + $0x98] sm:$0xff]   ;;  %v4551_v14 = vld [vmem:[%s5719_s3 + $0xa0] sm:$0xff]   ;;  %v4567_v17 = vld [vmem:[%s5719_s3 + $0xa8] sm:$0xff]   ;;  %s4588_s28 = scalar_lea.vmem %s5716_s0, %s3345_s15  ;;  %s5578_s30 = scalar_lea.vmem %s5722_s6, %s3043_s26 }
  0x13   : > { %v4350_v12 = vld [vmem:[%s5719_s3 + $0x18] sm:$0xff]   ;;  %v4353_v15 = vld [vmem:[%s5719_s3 + $0x20] sm:$0xff]   ;;  %v4356_v18 = vld [vmem:[%s5719_s3 + $0x28] sm:$0xff]   ;;  %s5634_s9 = scalar_lea.vmem %s5721_s5, %s3345_s15 }
  0x14   : > { %v4357_v19 = vld [vmem:[%s5719_s3 + $0x70] sm:$0xff]   ;;  %v4360_v22 = vld [vmem:[%s5719_s3 + $0x78] sm:$0xff]   ;;  %v4601_v24 = vld [vmem:[%s5717_s1] ss:$0 sm:$0xff] }
  0x15   : > { %3556 = vmatpush3.bf16.msra.mxu0 %v4344_v6  ;;  %4114 = vmatpush3.bf16.msra.mxu1 %v4512_v5  ;;  %v4581_v20 = vld [vmem:[%s5719_s3 + $0xb0] sm:$0xff]   ;;  %v3529_v23 = vld [vmem:[%s4588_s28 + $0x38] sm:$0xff]   ;;  %v3530_v28 = vld [vmem:[%s4588_s28 + $0x40] sm:$0xff]  }
  0x16   : > { %3557 = vmatprep.subr.bf16.mxu0 %v4345_v7  ;;  %4107 = vmatprep.subr.bf16.mxu1 %v4524_v8  ;;  %v4359_v21 = vld [vmem:[%s5719_s3 + $0x30] sm:$0xff]   ;;  %v4607_v25 = vld [vmem:[%s5719_s3 + $0xb8] sm:$0xff]   ;;  %v3409_v26 = vunpack.c.l.bf16 %v3529_v23  ;;  %v3410_v27 = vunpack.c.h.bf16 %v3529_v23  ;;  %v4613_v29 = vld [vmem:[%s5718_s2] ss:$0 sm:$0xff]  ;;  %v3413_v30 = vunpack.c.l.bf16 %v3530_v28  ;;  %v3414_v31 = vunpack.c.h.bf16 %v3530_v28 }
  0x17   : > { %v4362_v34 = vld [vmem:[%s5719_s3 + $0x38] sm:$0xff]   ;;  %v4363_v39 = vld [vmem:[%s5719_s3 + $0x100] sm:$0xff]   ;;  %v3531_v45 = vld [vmem:[%s4588_s28 + $0x48] sm:$0xff]  }
  0x18   : > { %v432_v32 = vmul.f32 %v3409_v26, %v4601_v24  ;;  %v433_v33 = vmul.f32 %v3410_v27, %v4601_v24  ;;  %v434_v35 = vmul.f32 %v3413_v30, %v4601_v24  ;;  %v435_v36 = vmul.f32 %v3414_v31, %v4601_v24  ;;  %v3380_v40 = vld [vmem:[%s4588_s28] sm:$0xff]   ;;  %v3532_v46 = vld [vmem:[%s4588_s28 + $0x50] sm:$0xff]   ;;  %v3523_v6 = vld [vmem:[%s4588_s28 + $0x8] sm:$0xff]  }
  0x19   : > { %3558 = vmatpush3.bf16.msra.mxu0 %v4347_v9  ;;  %4115 = vmatpush3.bf16.msra.mxu1 %v4524_v8  ;;  %v3381_v43 = vunpack.c.l.bf16 %v3380_v40  ;;  %v3382_v44 = vunpack.c.h.bf16 %v3380_v40  ;;  %v3417_v49 = vunpack.c.l.bf16 %v3531_v45  ;;  %v3418_v50 = vunpack.c.h.bf16 %v3531_v45  ;;  %vm4659_vm3 = vmand %vm666_vm0, %vm781_vm1  ;;  %v3533_v27 = vld [vmem:[%s4588_s28 + $0x58] sm:$0xff]  }
  0x1a   : > { %3559 = vmatprep.subr.bf16.mxu0 %v4348_v10  ;;  %4108 = vmatprep.subr.bf16.mxu1 %v4537_v11  ;;  %v471_v37 = vadd.f32 %v4613_v29, %v432_v32  ;;  %v472_v38 = vadd.f32 %v4613_v29, %v433_v33  ;;  %v473_v41 = vadd.f32 %v4613_v29, %v434_v35  ;;  %v3421_v58 = vunpack.c.l.bf16 %v3532_v46  ;;  %vm4709_vm4 = vmand %vm666_vm0, %vm667_vm2 }
  0x1b   : > { %v474_v42 = vadd.f32 %v4613_v29, %v435_v36  ;;  %v418_v53 = vmul.f32 %v3381_v43, %v4601_v24  ;;  %v419_v54 = vmul.f32 %v3382_v44, %v4601_v24  ;;  %v436_v56 = vmul.f32 %v3417_v49, %v4601_v24 }
  0x1c   : > { %v503_v47 = vmax.f32 %v471_v37, 0.0  ;;  %v504_v48 = vmax.f32 %v472_v38, 0.0  ;;  %v505_v51 = vmax.f32 %v473_v41, 0.0  ;;  %v437_v57 = vmul.f32 %v3418_v50, %v4601_v24  ;;  %v4365_v38 = vld [vmem:[%s5719_s3 + $0x108] sm:$0xff]  }
  0x1d   : > { %3560 = vmatpush3.bf16.msra.mxu0 %v4350_v12  ;;  %4116 = vmatpush3.bf16.msra.mxu1 %v4537_v11  ;;  %v506_v52 = vmax.f32 %v474_v42, 0.0  ;;  %v457_v60 = vadd.f32 %v4613_v29, %v418_v53  ;;  %v458_v61 = vadd.f32 %v4613_v29, %v419_v54  ;;  %v3422_v62 = vunpack.c.h.bf16 %v3532_v46  ;;  %v3534_v42 = vld [vmem:[%s4588_s28 + $0x60] sm:$0xff]   ;;  %v4366_v50 = vld [vmem:[%s5719_s3 + $0xc8] sm:$0xff]   ;;  %v4405_v46 = vld [vmem:[%s5719_s3 + $0x210] sm:$0xff]  }
  0x1e   : > { %3561 = vmatprep.subr.bf16.mxu0 %v4351_v13  ;;  %4109 = vmatprep.subr.bf16.mxu1 %v4551_v14  ;;  %v4637_v55 = vpack.c.bf16 %v504_v48, %v503_v47  ;;  %v475_v3 = vadd.f32 %v4613_v29, %v436_v56  ;;  %v476_v4 = vadd.f32 %v4613_v29, %v437_v57  ;;  %v3385_v26 = vunpack.c.l.bf16 %v3523_v6  ;;  %v4367_v57 = vld [vmem:[%s5719_s3 + $0x110] sm:$0xff]  }
  0x1f   : > { %v4642_v59 = vpack.c.bf16 %v506_v52, %v505_v51  ;;  %v489_v10 = vmax.f32 %v457_v60, 0.0  ;;  %v490_v12 = vmax.f32 %v458_v61, 0.0  ;;  %v439_v23 = vmul.f32 %v3422_v62, %v4601_v24 }
  0x20   : > { %v587_v63 = vshrl.u32 %v4637_v55, 16  ;;  %v590_v0 = vshll.u32 %v4637_v55, 16  ;;  %v3386_v32 = vunpack.c.h.bf16 %v3523_v6  ;;  %v420_v47 = vmul.f32 %v3385_v26, %v4601_v24  ;;  %v3524_v6 = vld [vmem:[%s4588_s28 + $0x10] sm:$0xff]   ;;  %v4369_v26 = vld [vmem:[%s5719_s3 + $0x118] sm:$0xff]  }
  0x21   : > { %3562 = vmatpush3.bf16.msra.mxu0 %v4353_v15  ;;  %4117 = vmatpush3.bf16.msra.mxu1 %v4551_v14  ;;  %v594_v7 = vshrl.u32 %v4642_v59, 16  ;;  %v597_v9 = vshll.u32 %v4642_v59, 16  ;;  %v478_v36 = vadd.f32 %v4613_v29, %v439_v23  ;;  %v3425_v49 = vunpack.c.l.bf16 %v3533_v27 }
  0x22   : > { %3563 = vmatprep.subr.bf16.mxu0 %v4354_v16  ;;  %4110 = vmatprep.subr.bf16.mxu1 %v4567_v17  ;;  %v747_v13 = vrot.slane %v590_v0, 1  ;;  %v507_v16 = vmax.f32 %v475_v3, 0.0  ;;  %v421_v48 = vmul.f32 %v3386_v32, %v4601_v24  ;;  %v3426_v53 = vunpack.c.h.bf16 %v3533_v27 }
  0x23   : > { %v510_v44 = vmax.f32 %v478_v36, 0.0  ;;  %v3429_v54 = vunpack.c.l.bf16 %v3534_v42  ;;  %v440_v61 = vmul.f32 %v3425_v49, %v4601_v24  ;;  %v3390_v32 = vunpack.c.h.bf16 %v3524_v6 }
  0x24   : > { %v748_v28 = vor.u32 %v747_v13, %v587_v63  ;;  %v460_v60 = vadd.f32 %v4613_v29, %v421_v48  ;;  %v4370_v48 = vld [vmem:[%s5719_s3 + $0xd8] sm:$0xff]  }
  0x25   : > { %3564 = vmatpush3.bf16.msra.mxu0 %v4356_v18  ;;  %4118 = vmatpush3.bf16.msra.mxu1 %v4567_v17  ;;  %v508_v18 = vmax.f32 %v476_v4, 0.0  ;;  %v441_v4 = vmul.f32 %v3426_v53, %v4601_v24  ;;  %v442_v23 = vmul.f32 %v3429_v54, %v4601_v24  ;;  %v4371_v53 = vld [vmem:[%s5719_s3 + $0x120] sm:$0xff]  }
  0x26   : > { %3565 = vmatprep.subr.bf16.mxu0 %v4357_v19  ;;  %4111 = vmatprep.subr.bf16.mxu1 %v4581_v20  ;;  %v438_v19 = vmul.f32 %v3421_v58, %v4601_v24  ;;  %v4688_v37 = vsel %vm4659_vm3, %v748_v28, 0  ;;  %v459_v58 = vadd.f32 %v4613_v29, %v420_v47  ;;  %v492_v13 = vmax.f32 %v460_v60, 0.0  ;;  %v3536_v60 = vld [vmem:[%s4588_s28 + $0x70] sm:$0xff]  }
  0x27   : > { %v4676_v30 = vpack.c.bf16 %v508_v18, %v507_v16  ;;  %3993 = vmatprep.mubr.bf16.mxu1 %v4688_v37  ;;  %v479_v16 = vadd.f32 %v4613_v29, %v440_v61 }
  0x28   : > { %v477_v31 = vadd.f32 %v4613_v29, %v438_v19  ;;  %v4368_v19 = vld [vmem:[%s5719_s3 + $0xd0] sm:$0xff]  }
  0x29   : > { %3566 = vmatpush3.bf16.msra.mxu0 %v4359_v21  ;;  %4119 = vmatpush3.bf16.msra.mxu1 %v4581_v20  ;;  %v4364_v21 = vld [vmem:[%s5719_s3 + $0xc0] sm:$0xff]   ;;  %v604_v40 = vshll.u32 %v4676_v30, 16  ;;  %v511_v28 = vmax.f32 %v479_v16, 0.0 }
  0x2a   : > { %3567 = vmatprep.subr.bf16.mxu0 %v4360_v22  ;;  %4112 = vmatprep.subr.bf16.mxu1 %v4607_v25  ;;  %v4670_v22 = vpack.c.bf16 %v490_v12, %v489_v10  ;;  %v509_v41 = vmax.f32 %v477_v31, 0.0  ;;  %v491_v12 = vmax.f32 %v459_v58, 0.0  ;;  %v3389_v31 = vunpack.c.l.bf16 %v3524_v6 }
  0x2b   : > { %v751_v45 = vrot.slane %v604_v40, 1 }
  0x2c   : > { %v541_v35 = vshll.u32 %v4670_v22, 16  ;;  %v4720_v52 = vpack.c.bf16 %v510_v44, %v509_v41  ;;  %v4757_v27 = vpack.c.bf16 %v492_v13, %v491_v12  ;;  %v481_v41 = vadd.f32 %v4613_v29, %v442_v23  ;;  %v4372_v12 = vld [vmem:[%s5719_s3 + $0xe0] sm:$0xff]  }
  0x2d   : > { %3568 = vmatpush3.bf16.msra.mxu0 %v4362_v34  ;;  %4120 = vmatpush3.bf16.msra.mxu1 %v4607_v25  ;;  %v538_v34 = vshrl.u32 %v4670_v22, 16 }
  0x2e   : > { %3961 = vmatprep.subr.bf16.mxu0 %v4498_v1  ;;  %3689 = vmatprep.subr.bf16.mxu1 %v4363_v39  ;;  %v601_v39 = vshrl.u32 %v4676_v30, 16  ;;  %v611_v3 = vshll.u32 %v4720_v52, 16  ;;  %v5728_v44 = vshll.u32 %v4757_v27, 16 }
  0x2f   : > { %v540_v43 = vrot.slane %v538_v34, 7 }
  0x30   : > { %1116 = vmatmul.mubr.bf16.vlgmr.msra.gmra.mrb[0].mxu0 %v5723_v2  ;;  %v752_v56 = vor.u32 %v751_v45, %v601_v39  ;;  %v753_v18 = vrot.slane %v611_v3, 1  ;;  %v423_v45 = vmul.f32 %v3390_v32, %v4601_v24 }
  0x31   : > { %3962 = vmatpush3.bf16.msra.mxu0 %v4498_v1  ;;  %v749_v1 = vrot.slane %v597_v9, 1  ;;  %1123 = vmatprep.mubr.bf16.mxu0 %v4670_v22  ;;  %v543_v51 = vor.u32 %v541_v35, %v540_v43  ;;  %v5726_v43 = vshrl.u32 %v4757_v27, 16 }
  0x32   : > { %3963 = vmatprep.subr.bf16.mxu0 %v4512_v5  ;;  %v4742_v10 = vsel %vm4659_vm3, %v752_v56, 0 }
  0x33   : > { %v750_v33 = vor.u32 %v749_v1, %v594_v7  ;;  %v4733_v62 = vsel %vm4709_vm4, %v543_v51, 0  ;;  %v480_v1 = vadd.f32 %v4613_v29, %v441_v4  ;;  %v513_v51 = vmax.f32 %v481_v41, 0.0 }
  0x34   : > { %v547_v54 = vrot.slane %v5726_v43, 7 }
  0x35   : > { %3964 = vmatpush3.bf16.msra.mxu0 %v4512_v5  ;;  %v4700_v5 = vsel %vm4659_vm3, %v750_v33, 0  ;;  %v512_v36 = vmax.f32 %v480_v1, 0.0 }
  0x36   : > { %3965 = vmatprep.subr.bf16.mxu0 %v4524_v8  ;;  %3994 = vmatmul.mubr.bf16.vlgmr.msra.gmra.mrb[0].mxu1 %v4700_v5  ;;  %v550_v16 = vor.u32 %v5728_v44, %v547_v54  ;;  %v3526_v54 = vld [vmem:[%s4588_s28 + $0x20] sm:$0xff]  }
  0x37   : > { %3690 = vmatpush3.bf16.msra.mxu1 %v4364_v21  ;;  %3997 = vmatprep.mubr.bf16.mxu1 %v4742_v10  ;;  %v3430_v21 = vunpack.c.h.bf16 %v3534_v42  ;;  %v3535_v42 = vld [vmem:[%s4588_s28 + $0x68] sm:$0xff]   ;;  %v4778_v49 = vpack.c.bf16 %v512_v36, %v511_v28  ;;  %v3437_v28 = vunpack.c.l.bf16 %v3536_v60  ;;  %v3438_v36 = vunpack.c.h.bf16 %v3536_v60 }
  0x38   : > { %3691 = vmatprep.subr.bf16.mxu1 %v4365_v38  ;;  %1124 = vmatmul.mubr.bf16.gmra.mrb[4].mxu0 %v4733_v62  ;;  %v3433_v58 = vunpack.c.l.bf16 %v3535_v42  ;;  %v3434_v13 = vunpack.c.h.bf16 %v3535_v42 }
  0x39   : > { %3966 = vmatpush3.bf16.msra.mxu0 %v4524_v8  ;;  %v608_v8 = vshrl.u32 %v4720_v52, 16  ;;  %v443_v38 = vmul.f32 %v3430_v21, %v4601_v24  ;;  %1131 = vmatprep.mubr.bf16.mxu0 %v4757_v27  ;;  %v615_v61 = vshrl.u32 %v4778_v49, 16  ;;  %v618_v4 = vshll.u32 %v4778_v49, 16 }
  0x3a   : > { %3967 = vmatprep.subr.bf16.mxu0 %v4537_v11  ;;  %v444_v1 = vmul.f32 %v3433_v58, %v4601_v24  ;;  %v4374_v58 = vld [vmem:[%s5719_s3 + $0xe8] sm:$0xff]  }
  0x3b   : > { %3692 = vmatpush3.bf16.msra.mxu1 %v4366_v50  ;;  %v754_v33 = vor.u32 %v753_v18, %v608_v8  ;;  %v482_v50 = vadd.f32 %v4613_v29, %v443_v38  ;;  %v755_v21 = vrot.slane %v618_v4, 1  ;;  %v3525_v38 = vld [vmem:[%s4588_s28 + $0x18] sm:$0xff]  }
  0x3c   : > { %3693 = vmatprep.subr.bf16.mxu1 %v4367_v57  ;;  %v462_v57 = vadd.f32 %v4613_v29, %v423_v45 }
  0x3d   : > { %3968 = vmatpush3.bf16.msra.mxu0 %v4537_v11  ;;  %v422_v11 = vmul.f32 %v3389_v31, %v4601_v24  ;;  %v4773_v47 = vsel %vm4659_vm3, %v754_v33, 0  ;;  %v514_v6 = vmax.f32 %v482_v50, 0.0  ;;  %v4810_v31 = vsel %vm4709_vm4, %v550_v16, 0 }
  0x3e   : > { %3969 = vmatprep.subr.bf16.mxu0 %v4551_v14  ;;  %3998 = vmatmul.mubr.bf16.gmra.mrb[4].mxu1 %v4773_v47  ;;  %v483_v33 = vadd.f32 %v4613_v29, %v444_v1  ;;  %v756_v41 = vor.u32 %v755_v21, %v615_v61  ;;  %v3393_v16 = vunpack.c.l.bf16 %v3525_v38 }
  0x3f   : > { %3694 = vmatpush3.bf16.msra.mxu1 %v4368_v19  ;;  %v461_v56 = vadd.f32 %v4613_v29, %v422_v11  ;;  %v494_v19 = vmax.f32 %v462_v57, 0.0  ;;  %v4802_v23 = vpack.c.bf16 %v514_v6, %v513_v51  ;;  %v447_v6 = vmul.f32 %v3438_v36, %v4601_v24 }
  0x40   : > { %3695 = vmatprep.subr.bf16.mxu1 %v4369_v26  ;;  %v445_v26 = vmul.f32 %v3434_v13, %v4601_v24  ;;  %1132 = vmatmul.mubr.bf16.gmra.mrb[8].mxu0 %v4810_v31 }
  0x41   : > { %3970 = vmatpush3.bf16.msra.mxu0 %v4551_v14  ;;  %v493_v18 = vmax.f32 %v461_v56, 0.0  ;;  %v4373_v14 = vld [vmem:[%s5719_s3 + $0x128] sm:$0xff]   ;;  %v622_v42 = vshrl.u32 %v4802_v23, 16  ;;  %v625_v11 = vshll.u32 %v4802_v23, 16  ;;  %v4830_v56 = vsel %vm4659_vm3, %v756_v41, 0 }
  0x42   : > { %3971 = vmatprep.subr.bf16.mxu0 %v4567_v17  ;;  %v484_v45 = vadd.f32 %v4613_v29, %v445_v26  ;;  %4001 = vmatprep.mubr.bf16.mxu1 %v4830_v56  ;;  %v486_v21 = vadd.f32 %v4613_v29, %v447_v6  ;;  %v3397_v26 = vunpack.c.l.bf16 %v3526_v54  ;;  %v424_v41 = vmul.f32 %v3393_v16, %v4601_v24  ;;  %v4377_v6 = vld [vmem:[%s5719_s3 + $0x138] sm:$0xff]  }
  0x43   : > { %3696 = vmatpush3.bf16.msra.mxu1 %v4370_v48  ;;  %v4812_v32 = vpack.c.bf16 %v494_v19, %v493_v18  ;;  %v515_v48 = vmax.f32 %v483_v33, 0.0  ;;  %v757_v57 = vrot.slane %v625_v11, 1  ;;  %v3394_v18 = vunpack.c.h.bf16 %v3525_v38 }
  0x44   : > { %3697 = vmatprep.subr.bf16.mxu1 %v4371_v53  ;;  %v446_v53 = vmul.f32 %v3437_v28, %v4601_v24  ;;  %v516_v60 = vmax.f32 %v484_v45, 0.0  ;;  %v3527_v28 = vld [vmem:[%s4588_s28 + $0x28] sm:$0xff]   ;;  %v4386_v45 = vld [vmem:[%s5719_s3 + $0x1c0] sm:$0xff]  }
  0x45   : > { %1139 = vmatprep.mubr.bf16.mxu0 %v4812_v32  ;;  %v5725_v50 = vshrl.u32 %v4812_v32, 16  ;;  %v5727_v51 = vshll.u32 %v4812_v32, 16  ;;  %3972 = vmatpush3.bf16.msra.mxu0 %v4567_v17  ;;  %v758_v19 = vor.u32 %v757_v57, %v622_v42  ;;  %v425_v38 = vmul.f32 %v3394_v18, %v4601_v24 }
  0x46   : > { %3973 = vmatprep.subr.bf16.mxu0 %v4581_v20  ;;  %v485_v13 = vadd.f32 %v4613_v29, %v446_v53  ;;  %v4848_v1 = vpack.c.bf16 %v516_v60, %v515_v48  ;;  %v518_v60 = vmax.f32 %v486_v21, 0.0  ;;  %v3401_v21 = vunpack.c.l.bf16 %v3527_v28 }
  0x47   : > { %3698 = vmatpush3.bf16.msra.mxu1 %v4372_v12  ;;  %v554_v17 = vrot.slane %v5725_v50, 7  ;;  %v4375_v12 = vld [vmem:[%s5719_s3 + $0x130] sm:$0xff]   ;;  %v4865_v48 = vsel %vm4659_vm3, %v758_v19, 0  ;;  %v426_v19 = vmul.f32 %v3397_v26, %v4601_v24 }
  0x48   : > { %3699 = vmatprep.subr.bf16.mxu1 %v4373_v14  ;;  %v4376_v14 = vld [vmem:[%s5719_s3 + $0xf0] sm:$0xff]   ;;  %v517_v36 = vmax.f32 %v485_v13, 0.0  ;;  %v629_v53 = vshrl.u32 %v4848_v1, 16  ;;  %v632_v57 = vshll.u32 %v4848_v1, 16  ;;  %4002 = vmatmul.mubr.bf16.gmra.mrb[8].mxu1 %v4865_v48  ;;  %v3398_v13 = vunpack.c.h.bf16 %v3526_v54 }
  0x49   : > { %v557_v33 = vor.u32 %v5727_v51, %v554_v17  ;;  %3974 = vmatpush3.bf16.msra.mxu0 %v4581_v20  ;;  %v464_v17 = vadd.f32 %v4613_v29, %v425_v38  ;;  %v3402_v38 = vunpack.c.h.bf16 %v3527_v28  ;;  %v3528_v54 = vld [vmem:[%s4588_s28 + $0x30] sm:$0xff]   ;;  %v4902_v28 = vld [vmem:[%s5719_s3 + $0x140] sm:$0xff]  }
  0x4a   : > { %3975 = vmatprep.subr.bf16.mxu0 %v4607_v25  ;;  %v759_v16 = vrot.slane %v632_v57, 1  ;;  %v4883_v18 = vpack.c.bf16 %v518_v60, %v517_v36  ;;  %v465_v60 = vadd.f32 %v4613_v29, %v426_v19 }
  0x4b   : > { %3700 = vmatpush3.bf16.msra.mxu1 %v4374_v58  ;;  %v4873_v20 = vsel %vm4709_vm4, %v557_v33, 0  ;;  %v463_v58 = vadd.f32 %v4613_v29, %v424_v41  ;;  %v496_v2 = vmax.f32 %v464_v17, 0.0  ;;  %v427_v41 = vmul.f32 %v3398_v13, %v4601_v24 }
  0x4c   : > { %3701 = vmatprep.subr.bf16.mxu1 %v4375_v12  ;;  %1140 = vmatmul.mubr.bf16.gmra.mrb[12].mxu0 %v4873_v20  ;;  %v4378_v12 = vld [vmem:[%s5719_s3 + $0xf8] sm:$0xff]   ;;  %v760_v50 = vor.u32 %v759_v16, %v629_v53  ;;  %v636_v36 = vshrl.u32 %v4883_v18, 16  ;;  %v639_v26 = vshll.u32 %v4883_v18, 16  ;;  %v428_v17 = vmul.f32 %v3401_v21, %v4601_v24 }
  0x4d   : > { %v495_v33 = vmax.f32 %v463_v58, 0.0  ;;  %3976 = vmatpush3.bf16.msra.mxu0 %v4607_v25  ;;  %v466_v25 = vadd.f32 %v4613_v29, %v427_v41  ;;  %v429_v13 = vmul.f32 %v3402_v38, %v4601_v24  ;;  %v3406_v38 = vunpack.c.h.bf16 %v3528_v54 }
  0x4e   : > { %3825 = vmatprep.subr.bf16.mxu0 %v4386_v45  ;;  %v761_v45 = vrot.slane %v639_v26, 1 }
  0x4f   : > { %3702 = vmatpush3.bf16.msra.mxu1 %v4376_v14  ;;  %v4897_v58 = vpack.c.bf16 %v496_v2, %v495_v33  ;;  %v4909_v14 = vsel %vm4659_vm3, %v760_v50, 0  ;;  %v497_v2 = vmax.f32 %v465_v60, 0.0  ;;  %v498_v21 = vmax.f32 %v466_v25, 0.0 }
  0x50   : > { %3703 = vmatprep.subr.bf16.mxu1 %v4377_v6  ;;  %v3405_v6 = vunpack.c.l.bf16 %v3528_v54  ;;  %4005 = vmatprep.mubr.bf16.mxu1 %v4909_v14  ;;  %v467_v33 = vadd.f32 %v4613_v29, %v428_v17  ;;  %v762_v50 = vor.u32 %v761_v45, %v636_v36  ;;  %v468_v41 = vadd.f32 %v4613_v29, %v429_v13 }
  0x51   : > { %1147 = vmatprep.mubr.bf16.mxu0 %v4897_v58  ;;  %v559_v16 = vshrl.u32 %v4897_v58, 16  ;;  %v562_v19 = vshll.u32 %v4897_v58, 16  ;;  %v4925_v51 = vpack.c.bf16 %v498_v21, %v497_v2  ;;  %v589_v25 = vrot.slane %v587_v63, 7 }
  0x52   : > { %v430_v60 = vmul.f32 %v3405_v6, %v4601_v24  ;;  %v499_v44 = vmax.f32 %v467_v33, 0.0  ;;  %v4931_v17 = vsel %vm4659_vm3, %v762_v50, 0  ;;  %v431_v54 = vmul.f32 %v3406_v38, %v4601_v24 }
  0x53   : > { %3704 = vmatpush3.bf16.msra.mxu1 %v4378_v12  ;;  %v561_v43 = vrot.slane %v559_v16, 7  ;;  %v500_v12 = vmax.f32 %v468_v41, 0.0  ;;  %v566_v2 = vshrl.u32 %v4925_v51, 16  ;;  %v569_v6 = vshll.u32 %v4925_v51, 16 }
  0x54   : > { %4009 = vmatprep.subr.bf16.mxu1 %v4902_v28  ;;  %v469_v13 = vadd.f32 %v4613_v29, %v430_v60  ;;  %4006 = vmatmul.mubr.bf16.gmra.mrb[12].mxu1 %v4931_v17  ;;  %v4942_v63 = vor.u32 %v590_v0, %v589_v25  ;;  %v470_v33 = vadd.f32 %v4613_v29, %v431_v54  ;;  %v596_v50 = vrot.slane %v594_v7, 7 }
  0x55   : > { %v564_v45 = vor.u32 %v562_v19, %v561_v43  ;;  %1714 = vmatprep.mubr.bf16.mxu1 %v4670_v22  ;;  %v4945_v21 = vpack.c.bf16 %v500_v12, %v499_v44  ;;  %v568_v41 = vrot.slane %v566_v2, 7  ;;  %v603_v38 = vrot.slane %v601_v39, 7 }
  0x56   : > { %v501_v60 = vmax.f32 %v469_v13, 0.0  ;;  %v502_v44 = vmax.f32 %v470_v33, 0.0  ;;  %v599_v25 = vor.u32 %v597_v9, %v596_v50  ;;  %v610_v54 = vrot.slane %v608_v8, 7  ;;  %v4380_v13 = vld [vmem:[%s5719_s3 + $0x148] sm:$0xff]  }
  0x57   : > { %v4952_v43 = vsel %vm4709_vm4, %v564_v45, 0  ;;  %v573_v0 = vshrl.u32 %v4945_v21, 16  ;;  %v571_v7 = vor.u32 %v569_v6, %v568_v41  ;;  %v606_v12 = vor.u32 %v604_v40, %v603_v38 }
  0x58   : > { %1148 = vmatmul.mubr.bf16.gmra.mrb[16].mxu0 %v4952_v43  ;;  %v617_v39 = vrot.slane %v615_v61, 7  ;;  %v733_v45 = vrot.slane %v541_v35, 1  ;;  %v4974_v9 = vsel %vm4709_vm4, %v599_v25, 0  ;;  %v624_v40 = vrot.slane %v622_v42, 7 }
  0x59   : > { %1155 = vmatprep.mubr.bf16.mxu0 %v4925_v51  ;;  %v576_v33 = vshll.u32 %v4945_v21, 16  ;;  %v4981_v8 = vsel %vm4709_vm4, %v606_v12, 0  ;;  %v613_v35 = vor.u32 %v611_v3, %v610_v54  ;;  %v4989_v50 = vsel %vm4709_vm4, %v571_v7, 0 }
  0x5a   : > { %v620_v61 = vor.u32 %v618_v4, %v617_v39  ;;  %v575_v41 = vrot.slane %v573_v0, 7  ;;  %v4991_v38 = vpack.c.bf16 %v502_v44, %v501_v60  ;;  %v627_v42 = vor.u32 %v625_v11, %v624_v40  ;;  %v3537_v40 = vld [vmem:[%s4588_s28 + $0x78] sm:$0xff]  }
  0x5b   : > { %v4998_v25 = vsel %vm4709_vm4, %v613_v35, 0  ;;  %v631_v4 = vrot.slane %v629_v53, 7  ;;  %v638_v60 = vrot.slane %v636_v36, 7  ;;  %v5019_v44 = vor.u32 %v733_v45, %v538_v34 }
  0x5c   : > { %1715 = vmatmul.mubr.bf16.vlgmr.msra.gmra.mrb[16].mxu1 %v4733_v62  ;;  %v5002_v3 = vsel %vm4709_vm4, %v620_v61, 0  ;;  %v4381_v62 = vld [vmem:[%s5719_s3 + $0x150] sm:$0xff]   ;;  %v5015_v11 = vsel %vm4709_vm4, %v627_v42, 0  ;;  %v5734_v12 = vshll.u32 %v4812_v32, 16  ;;  %v578_v39 = vor.u32 %v576_v33, %v575_v41 }
  0x5d   : > { %4010 = vmatpush3.bf16.msra.mxu1 %v4902_v28  ;;  %1722 = vmatprep.mubr.bf16.mxu1 %v4757_v27  ;;  %v634_v53 = vor.u32 %v632_v57, %v631_v4  ;;  %v641_v36 = vor.u32 %v639_v26, %v638_v60  ;;  %v5733_v28 = vshll.u32 %v4757_v27, 16  ;;  %v580_v22 = vshrl.u32 %v4991_v38, 16 }
  0x5e   : > { %4011 = vmatprep.subr.bf16.mxu1 %v4380_v13  ;;  %v737_v54 = vrot.slane %v5734_v12, 1  ;;  %v739_v34 = vrot.slane %v562_v19, 1  ;;  %v741_v45 = vrot.slane %v569_v6, 1  ;;  %v5735_v35 = vshrl.u32 %v4757_v27, 16 }
  0x5f   : > { %v735_v7 = vrot.slane %v5733_v28, 1  ;;  %v5037_v57 = vsel %vm4709_vm4, %v634_v53, 0  ;;  %v5041_v26 = vsel %vm4709_vm4, %v641_v36, 0  ;;  %v5736_v41 = vshrl.u32 %v4812_v32, 16  ;;  %v4382_v53 = vld [vmem:[%s5719_s3 + $0x158] sm:$0xff]  }
  0x60   : > { %1156 = vmatmul.mubr.bf16.gmra.mrb[20].mxu0 %v4989_v50  ;;  %v583_v19 = vshll.u32 %v4991_v38, 16  ;;  %v5054_v6 = vor.u32 %v739_v34, %v559_v16  ;;  %v5056_v4 = vor.u32 %v741_v45, %v566_v2  ;;  %v743_v60 = vrot.slane %v576_v33, 1 }
  0x61   : > { %1163 = vmatprep.mubr.bf16.mxu0 %v4945_v21  ;;  %v5045_v61 = vor.u32 %v735_v7, %v5735_v35  ;;  %v5049_v42 = vor.u32 %v737_v54, %v5736_v41  ;;  %4012 = vmatpush3.bf16.msra.mxu1 %v4380_v13  ;;  %v3441_v36 = vunpack.c.l.bf16 %v3537_v40  ;;  %v3442_v28 = vunpack.c.h.bf16 %v3537_v40  ;;  %v4385_v35 = vld [vmem:[%s5719_s3 + $0x170] sm:$0xff]   ;;  %v4394_v41 = vld [vmem:[%s5719_s3 + $0x178] sm:$0xff]  }
  0x62   : > { %4013 = vmatprep.subr.bf16.mxu1 %v4381_v62  ;;  %v5061_v7 = vor.u32 %v743_v60, %v573_v0  ;;  %v745_v12 = vrot.slane %v583_v19, 1  ;;  %v5066_v13 = vsel %vm4709_vm4, %v578_v39, 0  ;;  %v582_v16 = vrot.slane %v580_v22, 7  ;;  %v4383_v0 = vld [vmem:[%s5719_s3 + $0x160] sm:$0xff]  }
  0x63   : > { %v448_v2 = vmul.f32 %v3441_v36, %v4601_v24  ;;  %v449_v33 = vmul.f32 %v3442_v28, %v4601_v24  ;;  %v5109_v60 = vld [vmem:[%s5719_s3 + $0x200] sm:$0xff]   ;;  %v4388_v28 = vld [vmem:[%s5719_s3 + $0x1c8] sm:$0xff]  }
  0x64   : > { %1723 = vmatmul.mubr.bf16.gmra.mrb[20].mxu1 %v4810_v31  ;;  %v5071_v54 = vor.u32 %v745_v12, %v580_v22  ;;  %v585_v45 = vor.u32 %v583_v19, %v582_v16  ;;  %v5103_v19 = vsel %vm4709_vm4, %v4942_v63, 0  ;;  %v5737_v63 = vmov 0   ;;  %v4387_v36 = vld [vmem:[%s5719_s3 + $0x180] sm:$0xff]   ;;  %v4390_v16 = vld [vmem:[%s5719_s3 + $0x1d0] sm:$0xff]  }
  0x65   : > { %1730 = vmatprep.mubr.bf16.mxu1 %v4812_v32  ;;  %4014 = vmatpush3.bf16.msra.mxu1 %v4381_v62  ;;  %v487_v34 = vadd.f32 %v4613_v29, %v448_v2  ;;  %v488_v39 = vadd.f32 %v4613_v29, %v449_v33  ;;  %v4384_v62 = vld [vmem:[%s5719_s3 + $0x168] sm:$0xff]   ;;  %v5156_v12 = vsel %vm4659_vm3, %v5045_v61, 0  ;;  %v5169_v61 = vsel %vm4659_vm3, %v5049_v42, 0  ;;  %v4391_v2 = vld [vmem:[%s5719_s3 + $0x190] sm:$0xff]   ;;  %v4392_v33 = vld [vmem:[%s5719_s3 + $0x1d8] sm:$0xff]  }
  0x66   : > { %4015 = vmatprep.subr.bf16.mxu1 %v4382_v53  ;;  %v5088_v29 = vsel %vm4709_vm4, %v585_v45, 0  ;;  %v4393_v42 = vld [vmem:[%s5719_s3 + $0x198] sm:$0xff]   ;;  %v4397_v45 = vld [vmem:[%s5719_s3 + $0x1e8] sm:$0xff]  }
  0x67   : > { %v519_v24 = vmax.f32 %v487_v34, 0.0  ;;  %v520_v40 = vmax.f32 %v488_v39, 0.0  ;;  %v4395_v34 = vld [vmem:[%s5719_s3 + $0x1e0] sm:$0xff]  }
  0x68   : > { %1164 = vmatmul.mubr.bf16.gmra.mrb[24].mxu0 %v5066_v13  ;;  %v4396_v39 = vld [vmem:[%s5719_s3 + $0x1a0] sm:$0xff]  }
  0x69   : > { %1171 = vmatprep.mubr.bf16.mxu0 %v4991_v38  ;;  %4016 = vmatpush3.bf16.msra.mxu1 %v4382_v53  ;;  %v5083_v22 = vpack.c.bf16 %v520_v40, %v519_v24  ;;  %v784_v53 = vsel %vm4659_vm3, %v5019_v44, 0  ;;  %v4389_v44 = vld [vmem:[%s5719_s3 + $0x188] sm:$0xff]   ;;  %v5207_v24 = vsel %vm4659_vm3, %v5061_v7, 0  ;;  %v4399_v7 = vld [vmem:[%s5719_s3 + $0x1f0] sm:$0xff]  }
  0x6a   : > { %4017 = vmatprep.subr.bf16.mxu1 %v4383_v0 }
  0x6b   : > { %v643_v40 = vshrl.u32 %v5083_v22, 16 }
  0x6c   : > { %1731 = vmatmul.mubr.bf16.gmra.mrb[24].mxu1 %v4873_v20 }
  0x6d   : > { %1738 = vmatprep.mubr.bf16.mxu1 %v4897_v58  ;;  %4018 = vmatpush3.bf16.msra.mxu1 %v4383_v0  ;;  %v5181_v0 = vsel %vm4659_vm3, %v5054_v6, 0  ;;  %v5195_v6 = vsel %vm4659_vm3, %v5056_v4, 0  ;;  %v4398_v4 = vld [vmem:[%s5719_s3 + $0x1a8] sm:$0xff]  }
  0x6e   : > { %4019 = vmatprep.subr.bf16.mxu1 %v4384_v62 }
  0x70   : > { %1172 = vmatmul.mubr.bf16.gmra.mrb[28].mxu0 %v5088_v29 }
  0x71   : > { %1179 = vmatprep.mubr.bf16.mxu0 %v4637_v55  ;;  %4020 = vmatpush3.bf16.msra.mxu1 %v4384_v62  ;;  %v645_v62 = vrot.slane %v643_v40, 7 }
  0x72   : > { %4021 = vmatprep.subr.bf16.mxu1 %v4385_v35 }
  0x74   : > { %1739 = vmatmul.mubr.bf16.gmra.mrb[28].mxu1 %v4952_v43 }
  0x75   : > { %1746 = vmatprep.mubr.bf16.mxu1 %v4925_v51  ;;  %4022 = vmatpush3.bf16.msra.mxu1 %v4385_v35  ;;  %v646_v35 = vshll.u32 %v5083_v22, 16 }
  0x76   : > { %4023 = vmatprep.subr.bf16.mxu1 %v4394_v41 }
  0x78   : > { %1180 = vmatmul.mubr.bf16.gmra.mrb[32].mxu0 %v5103_v19 }
  0x79   : > { %1187 = vmatprep.mubr.bf16.mxu0 %v4642_v59  ;;  %4024 = vmatpush3.bf16.msra.mxu1 %v4394_v41  ;;  %v5225_v41 = vsel %vm4659_vm3, %v5071_v54, 0  ;;  %v4402_v54 = vld [vmem:[%s5719_s3 + $0x1b8] sm:$0xff]  }
  0x7a   : > { %4057 = vmatprep.subr.bf16.mxu1 %v5109_v60 }
  0x7c   : > { %1747 = vmatmul.mubr.bf16.gmra.mrb[32].mxu1 %v4989_v50 }
  0x7d   : > { %1754 = vmatprep.mubr.bf16.mxu1 %v4945_v21 }
  0x80   : > { %1188 = vmatmul.mubr.bf16.gmra.mrb[36].mxu0 %v4974_v9 }
  0x81   : > { %1195 = vmatprep.mubr.bf16.mxu0 %v4676_v30 }
  0x84   : > { %1755 = vmatmul.mubr.bf16.gmra.mrb[36].mxu1 %v5066_v13 }
  0x85   : > { %1762 = vmatprep.mubr.bf16.mxu1 %v4991_v38 }
  0x88   : > { %1196 = vmatmul.mubr.bf16.gmra.mrb[40].mxu0 %v4981_v8 }
  0x89   : > { %1203 = vmatprep.mubr.bf16.mxu0 %v4720_v52 }
  0x8c   : > { %1763 = vmatmul.mubr.bf16.gmra.mrb[40].mxu1 %v5088_v29 }
  0x8d   : > { %1770 = vmatprep.mubr.bf16.mxu1 %v4637_v55 }
  0x90   : > { %1204 = vmatmul.mubr.bf16.gmra.mrb[44].mxu0 %v4998_v25 }
  0x91   : > { %1211 = vmatprep.mubr.bf16.mxu0 %v4778_v49 }
  0x94   : > { %1771 = vmatmul.mubr.bf16.gmra.mrb[44].mxu1 %v5103_v19 }
  0x95   : > { %1778 = vmatprep.mubr.bf16.mxu1 %v4642_v59 }
  0x98   : > { %1212 = vmatmul.mubr.bf16.gmra.mrb[48].mxu0 %v5002_v3 }
  0x99   : > { %1219 = vmatprep.mubr.bf16.mxu0 %v4802_v23 }
  0x9c   : > { %1779 = vmatmul.mubr.bf16.gmra.mrb[48].mxu1 %v4974_v9 }
  0x9d   : > { %1786 = vmatprep.mubr.bf16.mxu1 %v4676_v30 }
  0xa0   : > { %1220 = vmatmul.mubr.bf16.gmra.mrb[52].mxu0 %v5015_v11 }
  0xa1   : > { %1227 = vmatprep.mubr.bf16.mxu0 %v4848_v1 }
  0xa4   : > { %1787 = vmatmul.mubr.bf16.gmra.mrb[52].mxu1 %v4981_v8 }
  0xa5   : > { %1794 = vmatprep.mubr.bf16.mxu1 %v4720_v52 }
  0xa8   : > { %1228 = vmatmul.mubr.bf16.gmra.mrb[56].mxu0 %v5037_v57 }
  0xa9   : > { %1235 = vmatprep.mubr.bf16.mxu0 %v4883_v18 }
  0xac   : > { %1795 = vmatmul.mubr.bf16.gmra.mrb[56].mxu1 %v4998_v25 }
  0xad   : > { %1802 = vmatprep.mubr.bf16.mxu1 %v4778_v49 }
  0xb0   : > { %1236 = vmatmul.mubr.bf16.gmra.mrb[60].mxu0 %v5041_v26 }
  0xb1   : > { %3977 = vmatprep.mubr.bf16.mxu0 %v5737_v63 }
  0xb4   : > { %1803 = vmatmul.mubr.bf16.gmra.mrb[60].mxu1 %v5002_v3 }
  0xb5   : > { %1810 = vmatprep.mubr.bf16.mxu1 %v4802_v23 }
  0xb8   : > { %3978 = vmatmul.mubr.bf16.vlgmr.msra.gmra.mrb[64].mxu0 %v784_v53 }
  0xb9   : > { %3826 = vmatpush3.bf16.msra.mxu0 %v4387_v36  ;;  %3981 = vmatprep.mubr.bf16.mxu0 %v5156_v12  ;;  %v4400_v36 = vld [vmem:[%s5719_s3 + $0x1b0] sm:$0xff]  }
  0xba   : > { %3827 = vmatprep.subr.bf16.mxu0 %v4388_v28  ;;  %v648_v28 = vor.u32 %v646_v35, %v645_v62 }
  0xbc   : > { %1811 = vmatmul.mubr.bf16.gmra.mrb[64].mxu1 %v5015_v11 }
  0xbd   : > { %3828 = vmatpush3.bf16.msra.mxu0 %v4389_v44  ;;  %1818 = vmatprep.mubr.bf16.mxu1 %v4848_v1  ;;  %v4401_v44 = vld [vmem:[%s5719_s3 + $0x1f8] sm:$0xff]  }
  0xbe   : > { %3829 = vmatprep.subr.bf16.mxu0 %v4390_v16  ;;  %v5243_v16 = vsel %vm4709_vm4, %v648_v28, 0 }
  0xc0   : > { %3982 = vmatmul.mubr.bf16.gmra.mrb[68].mxu0 %v5169_v61 }
  0xc1   : > { %3830 = vmatpush3.bf16.msra.mxu0 %v4391_v2  ;;  %3985 = vmatprep.mubr.bf16.mxu0 %v5181_v0  ;;  %v4404_v2 = vld [vmem:[%s5719_s3 + $0x208] sm:$0xff]  }
  0xc2   : > { %3831 = vmatprep.subr.bf16.mxu0 %v4392_v33 }
  0xc4   : > { %1819 = vmatmul.mubr.bf16.gmra.mrb[68].mxu1 %v5037_v57 }
  0xc5   : > { %3832 = vmatpush3.bf16.msra.mxu0 %v4393_v42  ;;  %1826 = vmatprep.mubr.bf16.mxu1 %v4883_v18 }
  0xc6   : > { %3833 = vmatprep.subr.bf16.mxu0 %v4395_v34 }
  0xc8   : > { %3986 = vmatmul.mubr.bf16.gmra.mrb[72].mxu0 %v5195_v6 }
  0xc9   : > { %3834 = vmatpush3.bf16.msra.mxu0 %v4396_v39  ;;  %3989 = vmatprep.mubr.bf16.mxu0 %v5207_v24 }
  0xca   : > { %3835 = vmatprep.subr.bf16.mxu0 %v4397_v45 }
  0xcc   : > { %1827 = vmatmul.mubr.bf16.gmra.mrb[72].mxu1 %v5041_v26 }
  0xcd   : > { %3836 = vmatpush3.bf16.msra.mxu0 %v4398_v4  ;;  %1834 = vmatprep.mubr.bf16.mxu1 %v5083_v22 }
  0xce   : > { %3837 = vmatprep.subr.bf16.mxu0 %v4399_v7 }
  0xd0   : > { %3990 = vmatmul.mubr.bf16.gmra.mrb[76].mxu0 %v5225_v41 }
  0xd1   : > { %3838 = vmatpush3.bf16.msra.mxu0 %v4400_v36  ;;  %2313 = vmatprep.mubr.bf16.mxu0 %v4757_v27  ;;  %v4406_v27 = vld [vmem:[%s5719_s3 + $0x218] sm:$0xff]  }
  0xd2   : > { %3839 = vmatprep.subr.bf16.mxu0 %v4401_v44 }
  0xd4   : > { %1835 = vmatmul.mubr.bf16.gmra.mrb[76].mxu1 %v5243_v16 }
  0xd5   : > { %3840 = vmatpush3.bf16.msra.mxu0 %v4402_v54  ;;  %4025 = vmatprep.mubr.bf16.mxu1 %v784_v53 }
  0xd8   : > { %2314 = vmatmul.mubr.bf16.vlgmr.msra.gmra.mrb[80].mxu0 %v4810_v31  ;;  %v4407_v31 = vld [vmem:[%s5719_s3 + $0x220] sm:$0xff]  }
  0xd9   : > { %2321 = vmatprep.mubr.bf16.mxu0 %v4812_v32  ;;  %v4408_v32 = vld [vmem:[%s5719_s3 + $0x228] sm:$0xff]  }
  0xdc   : > { %4026 = vmatmul.mubr.bf16.vlgmr.msra.gmra.mrb[80].mxu1 %v5156_v12 }
  0xdd   : > { %4058 = vmatpush3.bf16.msra.mxu1 %v5109_v60  ;;  %4029 = vmatprep.mubr.bf16.mxu1 %v5169_v61 }
  0xde   : > { %4059 = vmatprep.subr.bf16.mxu1 %v4404_v2 }
  0xe0   : > { %2322 = vmatmul.mubr.bf16.gmra.mrb[84].mxu0 %v4873_v20  ;;  %v4409_v20 = vld [vmem:[%s5719_s3 + $0x230] sm:$0xff]  }
  0xe1   : > { %2329 = vmatprep.mubr.bf16.mxu0 %v4897_v58  ;;  %4060 = vmatpush3.bf16.msra.mxu1 %v4404_v2 }
  0xe2   : > { %4061 = vmatprep.subr.bf16.mxu1 %v4405_v46 }
  0xe4   : > { %4030 = vmatmul.mubr.bf16.gmra.mrb[84].mxu1 %v5181_v0 }
  0xe5   : > { %4033 = vmatprep.mubr.bf16.mxu1 %v5195_v6  ;;  %4062 = vmatpush3.bf16.msra.mxu1 %v4405_v46 }
  0xe6   : > { %4063 = vmatprep.subr.bf16.mxu1 %v4406_v27 }
  0xe8   : > { %2330 = vmatmul.mubr.bf16.gmra.mrb[88].mxu0 %v4952_v43 }
  0xe9   : > { %2337 = vmatprep.mubr.bf16.mxu0 %v4925_v51  ;;  %4064 = vmatpush3.bf16.msra.mxu1 %v4406_v27  ;;  %v4410_v51 = vld [vmem:[%s5719_s3 + $0x238] sm:$0xff]  }
  0xea   : > { %4065 = vmatprep.subr.bf16.mxu1 %v4407_v31 }
  0xec   : > { %4034 = vmatmul.mubr.bf16.gmra.mrb[88].mxu1 %v5207_v24 }
  0xed   : > { %4037 = vmatprep.mubr.bf16.mxu1 %v5225_v41  ;;  %4066 = vmatpush3.bf16.msra.mxu1 %v4407_v31 }
  0xee   : > { %4067 = vmatprep.subr.bf16.mxu1 %v4408_v32 }
  0xf0   : > { %2338 = vmatmul.mubr.bf16.gmra.mrb[92].mxu0 %v4989_v50 }
  0xf1   : > { %2345 = vmatprep.mubr.bf16.mxu0 %v4945_v21  ;;  %4068 = vmatpush3.bf16.msra.mxu1 %v4408_v32 }
  0xf2   : > { %4069 = vmatprep.subr.bf16.mxu1 %v4409_v20 }
  0xf4   : > { %4038 = vmatmul.mubr.bf16.gmra.mrb[92].mxu1 %v4688_v37 }
  0xf5   : > { %4041 = vmatprep.mubr.bf16.mxu1 %v4700_v5  ;;  %4070 = vmatpush3.bf16.msra.mxu1 %v4409_v20 }
  0xf6   : > { %4071 = vmatprep.subr.bf16.mxu1 %v4410_v51 }
  0xf8   : > { %2346 = vmatmul.mubr.bf16.gmra.mrb[96].mxu0 %v5066_v13 }
  0xf9   : > { %2353 = vmatprep.mubr.bf16.mxu0 %v4991_v38  ;;  %4072 = vmatpush3.bf16.msra.mxu1 %v4410_v51  ;;  %v763_v38 = vrot.slane %v646_v35, 1 }
  0xfc   : > { %4042 = vmatmul.mubr.bf16.gmra.mrb[0].mxu1 %v4742_v10 }
  0xfd   : > { %4045 = vmatprep.mubr.bf16.mxu1 %v4773_v47 }
 0x100   : > { %2354 = vmatmul.mubr.bf16.gmra.mrb[100].mxu0 %v5088_v29  ;;  %v764_v29 = vor.u32 %v763_v38, %v643_v40 }
 0x101   : > { %2361 = vmatprep.mubr.bf16.mxu0 %v4637_v55 }
 0x103   : > { %v3569_v58 = vpop.f32.mrb[0].mxu0 }
 0x104   : > { %v3570_v21 = vpop.f32.mrb[1].mxu0  ;;  %4046 = vmatmul.mubr.bf16.gmra.mrb[4].mxu1 %v4830_v56 }
 0x105   : > { %v5290_v43 = vadd.f32 %v3570_v21, %v3569_v58  ;;  %v3572_v50 = vpop.f32.mrb[2].mxu0  ;;  %4049 = vmatprep.mubr.bf16.mxu1 %v4865_v48 }
 0x106   : > { %v3573_v60 = vpop.f32.mrb[3].mxu0 }
 0x107   : > { %v5292_v53 = vadd.f32 %v3573_v60, %v3572_v50 }
 0x108   : > { %2362 = vmatmul.mubr.bf16.gmra.mrb[104].mxu0 %v5103_v19 }
 0x109   : > { %2369 = vmatprep.mubr.bf16.mxu0 %v4642_v59  ;;  %v5312_v59 = vsel %vm4659_vm3, %v764_v29, 0 }
 0x10b   : > { %v3575_v13 = vpop.f32.mrb[4].mxu0 }
 0x10c   : > { %4050 = vmatmul.mubr.bf16.gmra.mrb[8].mxu1 %v4909_v14  ;;  %v3576_v55 = vpop.f32.mrb[5].mxu0 }
 0x10d   : > { %4053 = vmatprep.mubr.bf16.mxu1 %v4931_v17  ;;  %v5304_v33 = vadd.f32 %v3576_v55, %v3575_v13  ;;  %v3578_v42 = vpop.f32.mrb[6].mxu0 }
 0x10e   : > { %v3579_v34 = vpop.f32.mrb[7].mxu0 }
 0x10f   : > { %v5307_v19 = vadd.f32 %v3579_v34, %v3578_v42 }
 0x110   : > { %2370 = vmatmul.mubr.bf16.gmra.mrb[108].mxu0 %v4974_v9 }
 0x111   : > { %2377 = vmatprep.mubr.bf16.mxu0 %v4676_v30 }
 0x113   : > { %v3581_v39 = vpop.f32.mrb[8].mxu0 }
 0x114   : > { %4054 = vmatmul.mubr.bf16.gmra.mrb[12].mxu1 %v5312_v59  ;;  %v3582_v45 = vpop.f32.mrb[9].mxu0 }
 0x115   : > { %4073 = vmatprep.mubr.bf16.mxu1 %v5156_v12  ;;  %v5317_v40 = vadd.f32 %v3582_v45, %v3581_v39  ;;  %v3584_v4 = vpop.f32.mrb[10].mxu0 }
 0x116   : > { %v3585_v9 = vpop.f32.mrb[11].mxu0 }
 0x117   : > { %v5320_v62 = vadd.f32 %v3585_v9, %v3584_v4 }
 0x118   : > { %2378 = vmatmul.mubr.bf16.gmra.mrb[112].mxu0 %v4981_v8 }
 0x119   : > { %2385 = vmatprep.mubr.bf16.mxu0 %v4720_v52 }
 0x11c   : > { %4074 = vmatmul.mubr.bf16.vlgmr.msra.gmra.mrb[80].mxu1 %v5169_v61 }
 0x11d   : > { %4077 = vmatprep.mubr.bf16.mxu1 %v5181_v0 }
 0x11f   : > { %v3587_v15 = vpop.f32.mrb[12].mxu0 }
 0x120   : > { %2386 = vmatmul.mubr.bf16.gmra.mrb[116].mxu0 %v4998_v25  ;;  %v3588_v30 = vpop.f32.mrb[13].mxu0 }
 0x121   : > { %v5325_v12 = vadd.f32 %v3588_v30, %v3587_v15  ;;  %v3590_v8 = vpop.f32.mrb[14].mxu0  ;;  %2393 = vmatprep.mubr.bf16.mxu0 %v4778_v49 }
 0x122   : > { %v3591_v35 = vpop.f32.mrb[15].mxu0 }
 0x123   : > { %v5328_v7 = vadd.f32 %v3591_v35, %v3590_v8 }
 0x124   : > { %4078 = vmatmul.mubr.bf16.gmra.mrb[84].mxu1 %v5195_v6 }
 0x125   : > { %4081 = vmatprep.mubr.bf16.mxu1 %v5207_v24 }
 0x128   : > { %2394 = vmatmul.mubr.bf16.gmra.mrb[120].mxu0 %v5002_v3 }
 0x129   : > { %2401 = vmatprep.mubr.bf16.mxu0 %v4802_v23 }
 0x12b   : > { %v3593_v52 = vpop.f32.mrb[16].mxu0 }
 0x12c   : > { %v3594_v61 = vpop.f32.mrb[17].mxu0  ;;  %4082 = vmatmul.mubr.bf16.gmra.mrb[88].mxu1 %v5225_v41 }
 0x12d   : > { %v5335_v25 = vadd.f32 %v3594_v61, %v3593_v52  ;;  %v3596_v0 = vpop.f32.mrb[18].mxu0  ;;  %4085 = vmatprep.mubr.bf16.mxu1 %v4688_v37 }
 0x12e   : > { %v3597_v36 = vpop.f32.mrb[19].mxu0 }
 0x12f   : > { %v5338_v49 = vadd.f32 %v3597_v36, %v3596_v0  ;;  %v3705_v28 = vpop.f32.mrb[16].mxu1 }
 0x130   : > { %2402 = vmatmul.mubr.bf16.gmra.mrb[124].mxu0 %v5015_v11  ;;  %v3706_v6 = vpop.f32.mrb[17].mxu1 }
 0x131   : > { %2409 = vmatprep.mubr.bf16.mxu0 %v4848_v1  ;;  %v5342_v3 = vadd.f32 %v3706_v6, %v3705_v28  ;;  %v3708_v23 = vpop.f32.mrb[18].mxu1 }
 0x132   : > { %v3709_v24 = vpop.f32.mrb[19].mxu1 }
 0x133   : > { %v3599_v44 = vpop.f32.mrb[20].mxu0  ;;  %v5344_v41 = vadd.f32 %v3709_v24, %v3708_v23 }
 0x134   : > { %v3600_v54 = vpop.f32.mrb[21].mxu0  ;;  %4086 = vmatmul.mubr.bf16.gmra.mrb[92].mxu1 %v4700_v5 }
 0x135   : > { %v5347_v2 = vadd.f32 %v3600_v54, %v3599_v44  ;;  %v3602_v37 = vpop.f32.mrb[22].mxu0  ;;  %4089 = vmatprep.mubr.bf16.mxu1 %v4742_v10 }
 0x136   : > { %v3603_v46 = vpop.f32.mrb[23].mxu0 }
 0x137   : > { %v5350_v11 = vadd.f32 %v3603_v46, %v3602_v37  ;;  %v3711_v27 = vpop.f32.mrb[20].mxu1 }
 0x138   : > { %2410 = vmatmul.mubr.bf16.gmra.mrb[128].mxu0 %v5037_v57  ;;  %v3712_v1 = vpop.f32.mrb[21].mxu1 }
 0x139   : > { %2417 = vmatprep.mubr.bf16.mxu0 %v4883_v18  ;;  %v5354_v31 = vadd.f32 %v3712_v1, %v3711_v27  ;;  %v3714_v32 = vpop.f32.mrb[22].mxu1 }
 0x13a   : > { %v3715_v20 = vpop.f32.mrb[23].mxu1 }
 0x13b   : > { %v3605_v51 = vpop.f32.mrb[24].mxu0  ;;  %v5356_v5 = vadd.f32 %v3715_v20, %v3714_v32 }
 0x13c   : > { %v3606_v58 = vpop.f32.mrb[25].mxu0  ;;  %4090 = vmatmul.mubr.bf16.gmra.mrb[0].mxu1 %v4773_v47 }
 0x13d   : > { %v5359_v21 = vadd.f32 %v3606_v58, %v3605_v51  ;;  %v3608_v10 = vpop.f32.mrb[26].mxu0  ;;  %4093 = vmatprep.mubr.bf16.mxu1 %v4830_v56 }
 0x13e   : > { %v3609_v50 = vpop.f32.mrb[27].mxu0 }
 0x13f   : > { %v5362_v57 = vadd.f32 %v3609_v50, %v3608_v10  ;;  %v3717_v60 = vpop.f32.mrb[24].mxu1 }
 0x140   : > { %2418 = vmatmul.mubr.bf16.gmra.mrb[132].mxu0 %v5041_v26  ;;  %v3718_v18 = vpop.f32.mrb[25].mxu1 }
 0x141   : > { %2425 = vmatprep.mubr.bf16.mxu0 %v5083_v22  ;;  %v5366_v38 = vadd.f32 %v3718_v18, %v3717_v60  ;;  %v3720_v13 = vpop.f32.mrb[26].mxu1 }
 0x142   : > { %v3721_v55 = vpop.f32.mrb[27].mxu1 }
 0x143   : > { %v3611_v29 = vpop.f32.mrb[28].mxu0  ;;  %v5368_v47 = vadd.f32 %v3721_v55, %v3720_v13 }
 0x144   : > { %v3612_v42 = vpop.f32.mrb[29].mxu0  ;;  %4094 = vmatmul.mubr.bf16.gmra.mrb[4].mxu1 %v4865_v48 }
 0x145   : > { %v5371_v34 = vadd.f32 %v3612_v42, %v3611_v29  ;;  %v3614_v56 = vpop.f32.mrb[30].mxu0  ;;  %4097 = vmatprep.mubr.bf16.mxu1 %v4909_v14 }
 0x146   : > { %v3615_v39 = vpop.f32.mrb[31].mxu0 }
 0x147   : > { %v5374_v26 = vadd.f32 %v3615_v39, %v3614_v56  ;;  %v3723_v45 = vpop.f32.mrb[28].mxu1 }
 0x148   : > { %2426 = vmatmul.mubr.bf16.gmra.mrb[136].mxu0 %v5243_v16  ;;  %v3724_v22 = vpop.f32.mrb[29].mxu1 }
 0x149   : > { %2433 = vmatprep.mubr.bf16.mxu0 %v5737_v63  ;;  %v5378_v4 = vadd.f32 %v3724_v22, %v3723_v45  ;;  %v3726_v9 = vpop.f32.mrb[30].mxu1 }
 0x14a   : > { %v3727_v15 = vpop.f32.mrb[31].mxu1 }
 0x14b   : > { %v3617_v30 = vpop.f32.mrb[32].mxu0  ;;  %v5380_v48 = vadd.f32 %v3727_v15, %v3726_v9 }
 0x14c   : > { %v3618_v8 = vpop.f32.mrb[33].mxu0  ;;  %4098 = vmatmul.mubr.bf16.gmra.mrb[8].mxu1 %v4931_v17 }
 0x14d   : > { %v3619_v35 = vadd.f32 %v3618_v8, %v3617_v30  ;;  %v3620_v14 = vpop.f32.mrb[34].mxu0  ;;  %4101 = vmatprep.mubr.bf16.mxu1 %v5312_v59 }
 0x14e   : > { %v3621_v52 = vpop.f32.mrb[35].mxu0 }
 0x14f   : > { %v3622_v61 = vadd.f32 %v3621_v52, %v3620_v14  ;;  %v3729_v16 = vpop.f32.mrb[32].mxu1 }
 0x150   : > { %2434 = vmatmul.mubr.bf16.gmra.mrb[140].mxu0 %v5737_v63  ;;  %v3730_v0 = vpop.f32.mrb[33].mxu1 }
 0x151   : > { %v5385_v36 = vadd.f32 %v3730_v0, %v3729_v16  ;;  %v3732_v28 = vpop.f32.mrb[34].mxu1 }
 0x152   : > { %v3733_v6 = vpop.f32.mrb[35].mxu1 }
 0x153   : > { %v3623_v23 = vpop.f32.mrb[36].mxu0  ;;  %v5387_v24 = vadd.f32 %v3733_v6, %v3732_v28 }
 0x154   : > { %v3624_v44 = vpop.f32.mrb[37].mxu0  ;;  %4102 = vmatmul.mubr.bf16.gmra.mrb[12].mxu1 %v5737_v63 }
 0x155   : > { %v3625_v17 = vadd.f32 %v3624_v44, %v3623_v23  ;;  %v3626_v54 = vpop.f32.mrb[38].mxu0 }
 0x156   : > { %v3627_v37 = vpop.f32.mrb[39].mxu0 }
 0x157   : > { %v3628_v46 = vadd.f32 %v3627_v37, %v3626_v54  ;;  %v3735_v59 = vpop.f32.mrb[36].mxu1 }
 0x158   : > { %v3736_v27 = vpop.f32.mrb[37].mxu1 }
 0x159   : > { %v5390_v1 = vadd.f32 %v3736_v27, %v3735_v59  ;;  %v3738_v32 = vpop.f32.mrb[38].mxu1 }
 0x15a   : > { %v3739_v20 = vpop.f32.mrb[39].mxu1 }
 0x15b   : > { %v3629_v51 = vpop.f32.mrb[40].mxu0  ;;  %v5392_v58 = vadd.f32 %v3739_v20, %v3738_v32  ;;  %v5417_v20 = vld [vmem:[%s5720_s4] ss:$0 sm:$0xff] }
 0x15c   : > { %v3630_v10 = vpop.f32.mrb[41].mxu0 }
 0x15d   : > { %v5394_v50 = vadd.f32 %v3630_v10, %v3629_v51  ;;  %v3632_v60 = vpop.f32.mrb[42].mxu0  ;;  %v4205_v10 = vadd.f32 %v3619_v35, %v5417_v20 }
 0x15e   : > { %v3633_v18 = vpop.f32.mrb[43].mxu0 }
 0x15f   : > { %v5396_v13 = vadd.f32 %v3633_v18, %v3632_v60  ;;  %v3741_v63 = vpop.f32.mrb[40].mxu1 }
 0x160   : > { %v3742_v55 = vpop.f32.mrb[41].mxu1 }
 0x161   : > { %v5398_v29 = vadd.f32 %v3742_v55, %v3741_v63  ;;  %v3744_v42 = vpop.f32.mrb[42].mxu1 }
 0x162   : > { %v3745_v56 = vpop.f32.mrb[43].mxu1 }
 0x163   : > { %v3635_v39 = vpop.f32.mrb[44].mxu0  ;;  %v5400_v45 = vadd.f32 %v3745_v56, %v3744_v42  ;;  %v4213_v42 = vadd.f32 %v3622_v61, %v5417_v20 }
 0x164   : > { %v3636_v22 = vpop.f32.mrb[45].mxu0 }
 0x165   : > { %v5402_v9 = vadd.f32 %v3636_v22, %v3635_v39  ;;  %v3638_v15 = vpop.f32.mrb[46].mxu0 }
 0x166   : > { %v3639_v30 = vpop.f32.mrb[47].mxu0 }
 0x167   : > { %v5404_v8 = vadd.f32 %v3639_v30, %v3638_v15  ;;  %v3747_v14 = vpop.f32.mrb[44].mxu1 }
 0x168   : > { %v3748_v52 = vpop.f32.mrb[45].mxu1 }
 0x169   : > { %v5406_v16 = vadd.f32 %v3748_v52, %v3747_v14  ;;  %v3750_v0 = vpop.f32.mrb[46].mxu1 }
 0x16a   : > { %v3751_v28 = vpop.f32.mrb[47].mxu1 }
 0x16b   : > { %v3641_v6 = vpop.f32.mrb[48].mxu0  ;;  %v5408_v23 = vadd.f32 %v3751_v28, %v3750_v0 }
 0x16c   : > { %v3642_v44 = vpop.f32.mrb[49].mxu0 }
 0x16d   : > { %v5410_v54 = vadd.f32 %v3642_v44, %v3641_v6  ;;  %v3644_v37 = vpop.f32.mrb[50].mxu0  ;;  %v4201_v6 = vadd.f32 %v3625_v17, %v5417_v20 }
 0x16e   : > { %v3645_v59 = vpop.f32.mrb[51].mxu0 }
 0x16f   : > { %v5412_v27 = vadd.f32 %v3645_v59, %v3644_v37  ;;  %v3753_v32 = vpop.f32.mrb[48].mxu1 }
 0x170   : > { %v3754_v51 = vpop.f32.mrb[49].mxu1 }
 0x171   : > { %v3755_v60 = vadd.f32 %v3754_v51, %v3753_v32  ;;  %v3756_v18 = vpop.f32.mrb[50].mxu1  ;;  %v4209_v32 = vadd.f32 %v3628_v46, %v5417_v20 }
 0x172   : > { %v3757_v63 = vpop.f32.mrb[51].mxu1 }
 0x173   : > { %v3647_v55 = vpop.f32.mrb[52].mxu0  ;;  %v5421_v56 = vadd.f32 %v4205_v10, %v3755_v60  ;;  %v3758_v39 = vadd.f32 %v3757_v63, %v3756_v18 }
 0x174   : > { %v3648_v22 = vpop.f32.mrb[53].mxu0 }
 0x175   : > { %v5423_v15 = vadd.f32 %v3648_v22, %v3647_v55  ;;  %v3650_v30 = vpop.f32.mrb[54].mxu0  ;;  %v5425_v14 = vadd.f32 %v4213_v42, %v3758_v39 }
 0x176   : > { %v3651_v52 = vpop.f32.mrb[55].mxu0 }
 0x177   : > { %v5427_v0 = vadd.f32 %v3651_v52, %v3650_v30  ;;  %v3759_v28 = vpop.f32.mrb[52].mxu1  ;;  %v4221_v30 = vadd.f32 %v5394_v50, %v5417_v20 }
 0x178   : > { %v3760_v35 = vpop.f32.mrb[53].mxu1 }
 0x179   : > { %v3761_v44 = vadd.f32 %v3760_v35, %v3759_v28  ;;  %v3762_v37 = vpop.f32.mrb[54].mxu1 }
 0x17a   : > { %v3763_v59 = vpop.f32.mrb[55].mxu1 }
 0x17b   : > { %v3653_v61 = vpop.f32.mrb[56].mxu0  ;;  %v5431_v51 = vadd.f32 %v4201_v6, %v3761_v44  ;;  %v3764_v10 = vadd.f32 %v3763_v59, %v3762_v37  ;;  %v4229_v6 = vadd.f32 %v5396_v13, %v5417_v20  ;;  %v4121_v13 = vadd.f32 %v5304_v33, %v5417_v20 }
 0x17c   : > { %v3654_v60 = vpop.f32.mrb[57].mxu0  ;;  %v4136_v33 = vadd.f32 %v5292_v53, %v5417_v20  ;;  %v4237_v53 = vadd.f32 %v5410_v54, %v5417_v20 }
 0x17d   : > { %v5433_v18 = vadd.f32 %v3654_v60, %v3653_v61  ;;  %v3656_v63 = vpop.f32.mrb[58].mxu0  ;;  %v5435_v55 = vadd.f32 %v4209_v32, %v3764_v10 }
 0x17e   : > { %v3657_v42 = vpop.f32.mrb[59].mxu0 }
 0x17f   : > { %5738 = vst [vmem:[#allocation3_spill] sm:$0xff] %v5435_v55  ;;  %v5437_v39 = vadd.f32 %v3657_v42, %v3656_v63  ;;  %v3765_v22 = vpop.f32.mrb[56].mxu1 }
 0x180   : > { %v3766_v17 = vpop.f32.mrb[57].mxu1 }
 0x181   : > { %v3767_v52 = vadd.f32 %v3766_v17, %v3765_v22  ;;  %v3768_v28 = vpop.f32.mrb[58].mxu1  ;;  %v4217_v22 = vadd.f32 %v5402_v9, %v5417_v20 }
 0x182   : > { %v3769_v46 = vpop.f32.mrb[59].mxu1 }
 0x183   : > { %v3659_v35 = vpop.f32.mrb[60].mxu0  ;;  %v5443_v44 = vadd.f32 %v4221_v30, %v3767_v52  ;;  %v3770_v37 = vadd.f32 %v3769_v46, %v3768_v28  ;;  %v4126_v28 = vadd.f32 %v5290_v43, %v5417_v20  ;;  %v4131_v46 = vadd.f32 %v5307_v19, %v5417_v20 }
 0x184   : > { %v3660_v59 = vpop.f32.mrb[61].mxu0 }
 0x185   : > { %v5445_v61 = vadd.f32 %v3660_v59, %v3659_v35  ;;  %v3662_v32 = vpop.f32.mrb[62].mxu0  ;;  %v5447_v10 = vadd.f32 %v4229_v6, %v3770_v37  ;;  %v4225_v35 = vadd.f32 %v5404_v8, %v5417_v20 }
 0x186   : > { %v3663_v60 = vpop.f32.mrb[63].mxu0 }
 0x187   : > { %5739 = vst [vmem:[#allocation4_spill] sm:$0xff] %v5447_v10  ;;  %v5449_v63 = vadd.f32 %v3663_v60, %v3662_v32  ;;  %v3771_v50 = vpop.f32.mrb[60].mxu1 }
 0x188   : > { %v3772_v42 = vpop.f32.mrb[61].mxu1 }
 0x189   : > { %v3773_v17 = vadd.f32 %v3772_v42, %v3771_v50  ;;  %v3774_v55 = vpop.f32.mrb[62].mxu1 }
 0x18a   : > { %v3775_v30 = vpop.f32.mrb[63].mxu1 }
 0x18b   : > { %v3979_v52 = vpop.f32.mrb[64].mxu0  ;;  %v5461_v6 = vadd.f32 %v4217_v22, %v3773_v17  ;;  %v3776_v37 = vadd.f32 %v3775_v30, %v3774_v55 }
 0x18c   : > { %v4122_v9 = vadd.f32 %v4121_v13, %v3979_v52  ;;  %v1278_v59 = vpop.f32.mrb[65].mxu0  ;;  %v4141_v52 = vadd.f32 %v5325_v12, %v5417_v20  ;;  %v4156_v12 = vadd.f32 %v5320_v62, %v5417_v20  ;;  %v4233_v62 = vadd.f32 %v5423_v15, %v5417_v20 }
 0x18d   : > { %v4127_v32 = vadd.f32 %v4126_v28, %v1278_v59  ;;  %v3980_v60 = vpop.f32.mrb[66].mxu0  ;;  %v5465_v50 = vadd.f32 %v4225_v35, %v3776_v37 }
 0x18e   : > { %v5468_v43 = vadd.f32 %v4122_v9, %v5354_v31  ;;  %v4132_v42 = vadd.f32 %v4131_v46, %v3980_v60  ;;  %v1281_v19 = vpop.f32.mrb[67].mxu0  ;;  %v4146_v46 = vadd.f32 %v5317_v40, %v5417_v20 }
 0x18f   : > { %v5471_v10 = vadd.f32 %v4127_v32, %v5342_v3  ;;  %v4137_v8 = vadd.f32 %v4136_v33, %v1281_v19  ;;  %v3777_v22 = vpop.f32.mrb[64].mxu1 }
 0x190   : > { %v5474_v55 = vadd.f32 %v4132_v42, %v5356_v5  ;;  %v3778_v17 = vpop.f32.mrb[65].mxu1  ;;  %v4151_v5 = vadd.f32 %v5328_v7, %v5417_v20 }
 0x191   : > { %v5477_v13 = vadd.f32 %v4137_v8, %v5344_v41  ;;  %v3779_v30 = vadd.f32 %v3778_v17, %v3777_v22  ;;  %v3780_v31 = vpop.f32.mrb[66].mxu1  ;;  %v4245_v41 = vadd.f32 %v5412_v27, %v5417_v20 }
 0x192   : > { %v3781_v28 = vpop.f32.mrb[67].mxu1 }
 0x193   : > { %v3983_v3 = vpop.f32.mrb[68].mxu0  ;;  %v5489_v35 = vadd.f32 %v4237_v53, %v3779_v30  ;;  %v3782_v37 = vadd.f32 %v3781_v28, %v3780_v31  ;;  %v4161_v30 = vadd.f32 %v5347_v2, %v5417_v20  ;;  %v4176_v2 = vadd.f32 %v5338_v49, %v5417_v20 }
 0x194   : > { %v4142_v54 = vadd.f32 %v4141_v52, %v3983_v3  ;;  %v1294_v9 = vpop.f32.mrb[69].mxu0  ;;  %v4166_v52 = vadd.f32 %v5335_v25, %v5417_v20  ;;  %v4253_v49 = vadd.f32 %v5433_v18, %v5417_v20 }
 0x195   : > { %v4147_v59 = vadd.f32 %v4146_v46, %v1294_v9  ;;  %v3984_v32 = vpop.f32.mrb[70].mxu0  ;;  %v5493_v60 = vadd.f32 %v4245_v41, %v3782_v37 }
 0x196   : > { %v5496_v40 = vadd.f32 %v4142_v54, %v5378_v4  ;;  %v4152_v33 = vadd.f32 %v4151_v5, %v3984_v32  ;;  %v1297_v7 = vpop.f32.mrb[71].mxu0 }
 0x197   : > { %v5499_v42 = vadd.f32 %v4147_v59, %v5366_v38  ;;  %v4157_v27 = vadd.f32 %v4156_v12, %v1297_v7  ;;  %v3783_v19 = vpop.f32.mrb[68].mxu1 }
 0x198   : > { %v5502_v8 = vadd.f32 %v4152_v33, %v5380_v48  ;;  %v3784_v22 = vpop.f32.mrb[69].mxu1  ;;  %v4171_v48 = vadd.f32 %v5350_v11, %v5417_v20 }
 0x199   : > { %v5505_v17 = vadd.f32 %v4157_v27, %v5368_v47  ;;  %v3785_v53 = vadd.f32 %v3784_v22, %v3783_v19  ;;  %v3786_v4 = vpop.f32.mrb[70].mxu1  ;;  %v4241_v47 = vadd.f32 %v5427_v0, %v5417_v20  ;;  %v4181_v27 = vadd.f32 %v5371_v34, %v5417_v20 }
 0x19a   : > { %v3787_v31 = vpop.f32.mrb[71].mxu1  ;;  %v4186_v22 = vadd.f32 %v5359_v21, %v5417_v20  ;;  %v4196_v34 = vadd.f32 %v5362_v57, %v5417_v20  ;;  %v4249_v57 = vadd.f32 %v5445_v61, %v5417_v20  ;;  %v4436_v61 = vmov 0.0  }
 0x19b   : > { %v3987_v38 = vpop.f32.mrb[72].mxu0  ;;  %v5517_v28 = vadd.f32 %v4233_v62, %v3785_v53  ;;  %v3788_v3 = vadd.f32 %v3787_v31, %v3786_v4  ;;  %831 = vst [vmem:[%s5578_s30] sm:$0x3] %v4436_v61 }
 0x19c   : > { %v4162_v15 = vadd.f32 %v4161_v30, %v3987_v38  ;;  %v1310_v46 = vpop.f32.mrb[73].mxu0 }
 0x19d   : > { %v4167_v5 = vadd.f32 %v4166_v52, %v1310_v46  ;;  %v3988_v41 = vpop.f32.mrb[74].mxu0  ;;  %v5521_v37 = vadd.f32 %v4241_v47, %v3788_v3 }
 0x19e   : > { %v5524_v25 = vadd.f32 %v4162_v15, %v5390_v1  ;;  %v4172_v54 = vadd.f32 %v4171_v48, %v3988_v41  ;;  %v1313_v11 = vpop.f32.mrb[75].mxu0 }
 0x19f   : > { %v5527_v9 = vadd.f32 %v4167_v5, %v5385_v36  ;;  %v4177_v0 = vadd.f32 %v4176_v2, %v1313_v11  ;;  %v3789_v59 = vpop.f32.mrb[72].mxu1 }
 0x1a0   : > { %v5530_v32 = vadd.f32 %v4172_v54, %v5392_v58  ;;  %v3790_v12 = vpop.f32.mrb[73].mxu1  ;;  %v4191_v58 = vadd.f32 %v5374_v26, %v5417_v20 }
 0x1a1   : > { %v5533_v33 = vadd.f32 %v4177_v0, %v5387_v24  ;;  %v3791_v7 = vadd.f32 %v3790_v12, %v3789_v59  ;;  %v3792_v1 = vpop.f32.mrb[74].mxu1  ;;  %v4261_v24 = vadd.f32 %v5437_v39, %v5417_v20 }
 0x1a2   : > { %v3793_v19 = vpop.f32.mrb[75].mxu1 }
 0x1a3   : > { %v3991_v36 = vpop.f32.mrb[76].mxu0  ;;  %v5545_v62 = vadd.f32 %v4253_v49, %v3791_v7  ;;  %v3794_v53 = vadd.f32 %v3793_v19, %v3792_v1 }
 0x1a4   : > { %v4182_v18 = vadd.f32 %v4181_v27, %v3991_v36  ;;  %v1326_v4 = vpop.f32.mrb[77].mxu0 }
 0x1a5   : > { %v4187_v30 = vadd.f32 %v4186_v22, %v1326_v4  ;;  %v3992_v31 = vpop.f32.mrb[78].mxu0  ;;  %v5549_v38 = vadd.f32 %v4261_v24, %v3794_v53 }
 0x1a6   : > { %v5552_v21 = vadd.f32 %v4182_v18, %v5406_v16  ;;  %v4192_v52 = vadd.f32 %v4191_v58, %v3992_v31  ;;  %v1329_v26 = vpop.f32.mrb[79].mxu0 }
 0x1a7   : > { %v5555_v48 = vadd.f32 %v4187_v30, %v5398_v29  ;;  %v4197_v39 = vadd.f32 %v4196_v34, %v1329_v26  ;;  %v3795_v47 = vpop.f32.mrb[76].mxu1  ;;  %v4257_v29 = vadd.f32 %v5449_v63, %v5417_v20 }
 0x1a8   : > { %v5558_v3 = vadd.f32 %v4192_v52, %v5408_v23  ;;  %v3796_v15 = vpop.f32.mrb[77].mxu1 }
 0x1a9   : > { %v5561_v46 = vadd.f32 %v4197_v39, %v5400_v45  ;;  %v3797_v16 = vadd.f32 %v3796_v15, %v3795_v47  ;;  %v3798_v5 = vpop.f32.mrb[78].mxu1 }
 0x1aa   : > { %v3799_v41 = vpop.f32.mrb[79].mxu1 }
 0x1ab   : > { %v3841_v2 = vpop.f32.mrb[80].mxu0  ;;  %v5567_v54 = vadd.f32 %v4249_v57, %v3797_v16  ;;  %v3800_v11 = vadd.f32 %v3799_v41, %v3798_v5 }
 0x1ac   : > { %v3842_v23 = vpop.f32.mrb[81].mxu0 }
 0x1ad   : > { %v3843_v0 = vadd.f32 %v3842_v23, %v3841_v2  ;;  %v3844_v59 = vpop.f32.mrb[82].mxu0  ;;  %v5569_v12 = vadd.f32 %v4257_v29, %v3800_v11 }
 0x1ae   : > { %v3845_v45 = vpop.f32.mrb[83].mxu0 }
 0x1af   : > { %v3846_v49 = vadd.f32 %v3845_v45, %v3844_v59  ;;  %v5572_v7 = vadd.f32 %v5471_v10, %v3843_v0 }
 0x1b1   : > { %v5581_v20 = vadd.f32 %v5477_v13, %v3846_v49 }
 0x1b3   : > { %v3847_v63 = vpop.f32.mrb[84].mxu0 }
 0x1b4   : > { %v3848_v1 = vpop.f32.mrb[85].mxu0 }
 0x1b5   : > { %v3849_v27 = vadd.f32 %v3848_v1, %v3847_v63  ;;  %v3850_v19 = vpop.f32.mrb[86].mxu0 }
 0x1b6   : > { %v3851_v36 = vpop.f32.mrb[87].mxu0 }
 0x1b7   : > { %v3852_v22 = vadd.f32 %v3851_v36, %v3850_v19  ;;  %v4124_v10 = vadd.f32 %v5468_v43, %v3849_v27 }
 0x1b9   : > { %v4134_v58 = vadd.f32 %v5474_v55, %v3852_v22 }
 0x1bb   : > { %v3853_v24 = vpop.f32.mrb[88].mxu0 }
 0x1bc   : > { %v3854_v53 = vpop.f32.mrb[89].mxu0 }
 0x1bd   : > { %v3855_v18 = vadd.f32 %v3854_v53, %v3853_v24  ;;  %v3856_v4 = vpop.f32.mrb[90].mxu0 }
 0x1be   : > { %v3857_v30 = vpop.f32.mrb[91].mxu0 }
 0x1bf   : > { %v3858_v31 = vadd.f32 %v3857_v30, %v3856_v4  ;;  %v5587_v13 = vadd.f32 %v5499_v42, %v3855_v18 }
 0x1c1   : > { %v5590_v34 = vadd.f32 %v5505_v17, %v3858_v31 }
 0x1c3   : > { %v3859_v52 = vpop.f32.mrb[92].mxu0 }
 0x1c4   : > { %v3860_v26 = vpop.f32.mrb[93].mxu0 }
 0x1c5   : > { %v3861_v39 = vadd.f32 %v3860_v26, %v3859_v52  ;;  %v3862_v47 = vpop.f32.mrb[94].mxu0 }
 0x1c6   : > { %v3863_v15 = vpop.f32.mrb[95].mxu0 }
 0x1c7   : > { %v3864_v43 = vadd.f32 %v3863_v15, %v3862_v47  ;;  %v5593_v55 = vadd.f32 %v5496_v40, %v3861_v39 }
 0x1c9   : > { %v5596_v57 = vadd.f32 %v5502_v8, %v3864_v43 }
 0x1cb   : > { %v3865_v16 = vpop.f32.mrb[96].mxu0 }
 0x1cc   : > { %v3866_v5 = vpop.f32.mrb[97].mxu0 }
 0x1cd   : > { %v3867_v41 = vadd.f32 %v3866_v5, %v3865_v16  ;;  %v3868_v42 = vpop.f32.mrb[98].mxu0 }
 0x1ce   : > { %v3869_v2 = vpop.f32.mrb[99].mxu0 }
 0x1cf   : > { %v3870_v29 = vadd.f32 %v3869_v2, %v3868_v42  ;;  %v5599_v17 = vadd.f32 %v5527_v9, %v3867_v41 }
 0x1d1   : > { %v5602_v11 = vadd.f32 %v5533_v33, %v3870_v29 }
 0x1d3   : > { %v3871_v23 = vpop.f32.mrb[100].mxu0 }
 0x1d4   : > { %v3872_v0 = vpop.f32.mrb[101].mxu0 }
 0x1d5   : > { %v3873_v59 = vadd.f32 %v3872_v0, %v3871_v23  ;;  %v3874_v40 = vpop.f32.mrb[102].mxu0 }
 0x1d6   : > { %v3875_v45 = vpop.f32.mrb[103].mxu0 }
 0x1d7   : > { %v3876_v49 = vadd.f32 %v3875_v45, %v3874_v40  ;;  %v5605_v8 = vadd.f32 %v5524_v25, %v3873_v59 }
 0x1d9   : > { %v5608_v61 = vadd.f32 %v5530_v32, %v3876_v49 }
 0x1db   : > { %v3877_v63 = vpop.f32.mrb[104].mxu0 }
 0x1dc   : > { %v3878_v1 = vpop.f32.mrb[105].mxu0 }
 0x1dd   : > { %v3879_v27 = vadd.f32 %v3878_v1, %v3877_v63  ;;  %v3880_v9 = vpop.f32.mrb[106].mxu0 }
 0x1de   : > { %v3881_v19 = vpop.f32.mrb[107].mxu0 }
 0x1df   : > { %v3882_v36 = vadd.f32 %v3881_v19, %v3880_v9  ;;  %v5611_v33 = vadd.f32 %v5555_v48, %v3879_v27 }
 0x1e1   : > { %v5614_v22 = vadd.f32 %v5561_v46, %v3882_v36 }
 0x1e3   : > { %v3883_v24 = vpop.f32.mrb[108].mxu0 }
 0x1e4   : > { %v3884_v53 = vpop.f32.mrb[109].mxu0 }
 0x1e5   : > { %v3885_v18 = vadd.f32 %v3884_v53, %v3883_v24  ;;  %v3886_v25 = vpop.f32.mrb[110].mxu0  ;;  %v5740_v24 = vld [vmem:[#allocation3_spill] sm:$0xff] }
 0x1e6   : > { %v3887_v4 = vpop.f32.mrb[111].mxu0 }
 0x1e7   : > { %v3888_v30 = vadd.f32 %v3887_v4, %v3886_v25  ;;  %v5617_v32 = vadd.f32 %v5552_v21, %v3885_v18 }
 0x1e9   : > { %v5620_v31 = vadd.f32 %v5558_v3, %v3888_v30 }
 0x1eb   : > { %v3889_v52 = vpop.f32.mrb[112].mxu0 }
 0x1ec   : > { %v3890_v26 = vpop.f32.mrb[113].mxu0 }
 0x1ed   : > { %v3891_v48 = vadd.f32 %v3890_v26, %v3889_v52  ;;  %v3892_v39 = vpop.f32.mrb[114].mxu0 }
 0x1ee   : > { %v3893_v47 = vpop.f32.mrb[115].mxu0 }
 0x1ef   : > { %v3894_v46 = vadd.f32 %v3893_v47, %v3892_v39  ;;  %v5623_v15 = vadd.f32 %v5421_v56, %v3891_v48  ;;  %v4075_v43 = vpop.f32.mrb[80].mxu1 }
 0x1f0   : > { %v4125_v16 = vadd.f32 %v4124_v10, %v4075_v43  ;;  %v2476_v5 = vpop.f32.mrb[81].mxu1 }
 0x1f1   : > { %v5626_v41 = vadd.f32 %v5425_v14, %v3894_v46  ;;  %v4130_v21 = vadd.f32 %v5572_v7, %v2476_v5  ;;  %v4076_v3 = vpop.f32.mrb[82].mxu1 }
 0x1f2   : > { %v4135_v42 = vadd.f32 %v4134_v58, %v4076_v3  ;;  %v2479_v2 = vpop.f32.mrb[83].mxu1  ;;  %v2834_v1 = vmul.f32 %v4125_v16, %v4125_v16 }
 0x1f3   : > { %v3895_v29 = vpop.f32.mrb[116].mxu0  ;;  %v4140_v56 = vadd.f32 %v5581_v20, %v2479_v2  ;;  %v2832_v59 = vmul.f32 %v4130_v21, %v4130_v21 }
 0x1f4   : > { %v3896_v10 = vpop.f32.mrb[117].mxu0  ;;  %v3451_v23 = vpack.c.bf16 %v4135_v42, %v4125_v16  ;;  %v2835_v18 = vmul.f32 %v4135_v42, %v4135_v42 }
 0x1f5   : > { %v3897_v14 = vadd.f32 %v3896_v10, %v3895_v29  ;;  %v3898_v0 = vpop.f32.mrb[118].mxu0  ;;  %v3446_v7 = vpack.c.bf16 %v4140_v56, %v4130_v21  ;;  %v2795_v40 = vadd.f32 %v4140_v56, %v4130_v21  ;;  %v2833_v58 = vmul.f32 %v4140_v56, %v4140_v56 }
 0x1f6   : > { %v3899_v45 = vpop.f32.mrb[119].mxu0  ;;  %3538 = vst [vmem:[%s5634_s9 + $0x8] sm:$0xff] %v3451_v23  }
 0x1f7   : > { %v3900_v49 = vadd.f32 %v3899_v45, %v3898_v0  ;;  %v5639_v63 = vadd.f32 %v5431_v51, %v3897_v14  ;;  %3447 = vst [vmem:[%s5634_s9] sm:$0xff] %v3446_v7   ;;  %v2796_v27 = vadd.f32 %v4125_v16, %v2795_v40  ;;  %v2864_v9 = vadd.f32 %v2833_v58, %v2832_v59  ;;  %v4079_v19 = vpop.f32.mrb[84].mxu1  ;;  %v5741_v7 = vld [vmem:[#allocation4_spill] sm:$0xff] }
 0x1f8   : > { %v4145_v20 = vadd.f32 %v5593_v55, %v4079_v19  ;;  %v2492_v36 = vpop.f32.mrb[85].mxu1 }
 0x1f9   : > { %v5644_v53 = vadd.f32 %v5740_v24, %v3900_v49  ;;  %v2865_v25 = vadd.f32 %v2864_v9, %v2834_v1  ;;  %v4150_v4 = vadd.f32 %v5587_v13, %v2492_v36  ;;  %v2797_v30 = vadd.f32 %v4135_v42, %v2796_v27  ;;  %v4080_v52 = vpop.f32.mrb[86].mxu1 }
 0x1fa   : > { %v4155_v51 = vadd.f32 %v5596_v57, %v4080_v52  ;;  %v2495_v26 = vpop.f32.mrb[87].mxu1  ;;  %v2838_v10 = vmul.f32 %v4145_v20, %v4145_v20 }
 0x1fb   : > { %v3901_v48 = vpop.f32.mrb[120].mxu0  ;;  %v2798_v39 = vadd.f32 %v4150_v4, %v2797_v30  ;;  %v2836_v47 = vmul.f32 %v4150_v4, %v4150_v4  ;;  %v2866_v46 = vadd.f32 %v2865_v25, %v2835_v18  ;;  %v4160_v55 = vadd.f32 %v5590_v34, %v2495_v26 }
 0x1fc   : > { %v3902_v43 = vpop.f32.mrb[121].mxu0  ;;  %v3461_v16 = vpack.c.bf16 %v4155_v51, %v4145_v20  ;;  %v2839_v58 = vmul.f32 %v4155_v51, %v4155_v51 }
 0x1fd   : > { %v3903_v5 = vadd.f32 %v3902_v43, %v3901_v48  ;;  %v3904_v21 = vpop.f32.mrb[122].mxu0  ;;  %v2867_v3 = vadd.f32 %v2866_v46, %v2836_v47  ;;  %v3456_v2 = vpack.c.bf16 %v4160_v55, %v4150_v4  ;;  %v2799_v13 = vadd.f32 %v4160_v55, %v2798_v39 }
 0x1fe   : > { %v2837_v42 = vmul.f32 %v4160_v55, %v4160_v55  ;;  %v3905_v29 = vpop.f32.mrb[123].mxu0  ;;  %3540 = vst [vmem:[%s5634_s9 + $0x18] sm:$0xff] %v3461_v16  }
 0x1ff   : > { %v3906_v57 = vadd.f32 %v3905_v29, %v3904_v21  ;;  %v5651_v56 = vadd.f32 %v5443_v44, %v3903_v5  ;;  %3539 = vst [vmem:[%s5634_s9 + $0x10] sm:$0xff] %v3456_v2   ;;  %v2800_v23 = vadd.f32 %v4145_v20, %v2799_v13  ;;  %v4083_v0 = vpop.f32.mrb[88].mxu1 }
 0x200   : > { %v2868_v14 = vadd.f32 %v2867_v3, %v2837_v42  ;;  %v4165_v34 = vadd.f32 %v5605_v8, %v4083_v0  ;;  %v2508_v59 = vpop.f32.mrb[89].mxu1 }
 0x201   : > { %v5656_v40 = vadd.f32 %v5741_v7, %v3906_v57  ;;  %v4170_v49 = vadd.f32 %v5599_v17, %v2508_v59  ;;  %v2801_v1 = vadd.f32 %v4155_v51, %v2800_v23  ;;  %v4084_v27 = vpop.f32.mrb[90].mxu1 }
 0x202   : > { %v2869_v45 = vadd.f32 %v2868_v14, %v2838_v10  ;;  %v4175_v44 = vadd.f32 %v5608_v61, %v4084_v27  ;;  %v2511_v9 = vpop.f32.mrb[91].mxu1  ;;  %v2842_v47 = vmul.f32 %v4165_v34, %v4165_v34 }
 0x203   : > { %v3907_v19 = vpop.f32.mrb[124].mxu0  ;;  %v2802_v20 = vadd.f32 %v4170_v49, %v2801_v1  ;;  %v2840_v36 = vmul.f32 %v4170_v49, %v4170_v49  ;;  %v4180_v8 = vadd.f32 %v5602_v11, %v2511_v9 }
 0x204   : > { %v2870_v24 = vadd.f32 %v2869_v45, %v2839_v58  ;;  %v3908_v18 = vpop.f32.mrb[125].mxu0  ;;  %v3471_v25 = vpack.c.bf16 %v4175_v44, %v4165_v34  ;;  %v2843_v21 = vmul.f32 %v4175_v44, %v4175_v44 }
 0x205   : > { %v3909_v4 = vadd.f32 %v3908_v18, %v3907_v19  ;;  %v3910_v30 = vpop.f32.mrb[126].mxu0  ;;  %v3466_v26 = vpack.c.bf16 %v4180_v8, %v4170_v49  ;;  %v2803_v17 = vadd.f32 %v4180_v8, %v2802_v20  ;;  %v2841_v51 = vmul.f32 %v4180_v8, %v4180_v8 }
 0x206   : > { %v2871_v52 = vadd.f32 %v2870_v24, %v2840_v36  ;;  %v3911_v48 = vpop.f32.mrb[127].mxu0  ;;  %3542 = vst [vmem:[%s5634_s9 + $0x28] sm:$0xff] %v3471_v25  }
 0x207   : > { %v3912_v61 = vadd.f32 %v3911_v48, %v3910_v30  ;;  %v5663_v39 = vadd.f32 %v5461_v6, %v3909_v4  ;;  %3541 = vst [vmem:[%s5634_s9 + $0x20] sm:$0xff] %v3466_v26   ;;  %v2804_v46 = vadd.f32 %v4165_v34, %v2803_v17  ;;  %v4087_v43 = vpop.f32.mrb[92].mxu1 }
 0x208   : > { %v2872_v55 = vadd.f32 %v2871_v52, %v2841_v51  ;;  %v4185_v11 = vadd.f32 %v5617_v32, %v4087_v43  ;;  %v2524_v16 = vpop.f32.mrb[93].mxu1 }
 0x209   : > { %v5668_v5 = vadd.f32 %v5465_v50, %v3912_v61  ;;  %v4190_v2 = vadd.f32 %v5611_v33, %v2524_v16  ;;  %v2805_v13 = vadd.f32 %v4175_v44, %v2804_v46  ;;  %v4088_v42 = vpop.f32.mrb[94].mxu1 }
 0x20a   : > { %v2873_v3 = vadd.f32 %v2872_v55, %v2842_v47  ;;  %v4195_v6 = vadd.f32 %v5620_v31, %v4088_v42  ;;  %v2527_v29 = vpop.f32.mrb[95].mxu1  ;;  %v2846_v27 = vmul.f32 %v4185_v11, %v4185_v11 }
 0x20b   : > { %v3913_v57 = vpop.f32.mrb[128].mxu0  ;;  %v2806_v10 = vadd.f32 %v4190_v2, %v2805_v13  ;;  %v2844_v23 = vmul.f32 %v4190_v2, %v4190_v2  ;;  %v4200_v32 = vadd.f32 %v5614_v22, %v2527_v29 }
 0x20c   : > { %v2874_v14 = vadd.f32 %v2873_v3, %v2843_v21  ;;  %v3914_v0 = vpop.f32.mrb[129].mxu0  ;;  %v3481_v50 = vpack.c.bf16 %v4195_v6, %v4185_v11  ;;  %v2847_v24 = vmul.f32 %v4195_v6, %v4195_v6 }
 0x20d   : > { %v3915_v34 = vadd.f32 %v3914_v0, %v3913_v57  ;;  %v3916_v59 = vpop.f32.mrb[130].mxu0  ;;  %v3476_v58 = vpack.c.bf16 %v4200_v32, %v4190_v2  ;;  %v2807_v33 = vadd.f32 %v4200_v32, %v2806_v10  ;;  %v2845_v45 = vmul.f32 %v4200_v32, %v4200_v32 }
 0x20e   : > { %v2875_v7 = vadd.f32 %v2874_v14, %v2844_v23  ;;  %v3917_v49 = vpop.f32.mrb[131].mxu0  ;;  %3544 = vst [vmem:[%s5634_s9 + $0x38] sm:$0xff] %v3481_v50  }
 0x20f   : > { %v3918_v31 = vadd.f32 %v3917_v49, %v3916_v59  ;;  %v5675_v1 = vadd.f32 %v5489_v35, %v3915_v34  ;;  %3543 = vst [vmem:[%s5634_s9 + $0x30] sm:$0xff] %v3476_v58   ;;  %v2808_v44 = vadd.f32 %v4185_v11, %v2807_v33  ;;  %v4091_v19 = vpop.f32.mrb[0].mxu1 }
 0x210   : > { %v2876_v9 = vadd.f32 %v2875_v7, %v2845_v45  ;;  %v4204_v22 = vadd.f32 %v5639_v63, %v4091_v19  ;;  %v2540_v20 = vpop.f32.mrb[1].mxu1 }
 0x211   : > { %v5680_v36 = vadd.f32 %v5493_v60, %v3918_v31  ;;  %v4208_v18 = vadd.f32 %v5623_v15, %v2540_v20  ;;  %v2809_v25 = vadd.f32 %v4195_v6, %v2808_v44  ;;  %v4092_v4 = vpop.f32.mrb[2].mxu1 }
 0x212   : > { %v2877_v8 = vadd.f32 %v2876_v9, %v2846_v27  ;;  %v4212_v35 = vadd.f32 %v5644_v53, %v4092_v4  ;;  %v2543_v30 = vpop.f32.mrb[3].mxu1  ;;  %v2850_v21 = vmul.f32 %v4204_v22, %v4204_v22 }
 0x213   : > { %v3919_v52 = vpop.f32.mrb[132].mxu0  ;;  %v2810_v26 = vadd.f32 %v4208_v18, %v2809_v25  ;;  %v2848_v17 = vmul.f32 %v4208_v18, %v4208_v18  ;;  %v4216_v63 = vadd.f32 %v5626_v41, %v2543_v30 }
 0x214   : > { %v2878_v51 = vadd.f32 %v2877_v8, %v2847_v24  ;;  %v3920_v48 = vpop.f32.mrb[133].mxu0  ;;  %v3491_v60 = vpack.c.bf16 %v4212_v35, %v4204_v22  ;;  %v2851_v29 = vmul.f32 %v4212_v35, %v4212_v35 }
 0x215   : > { %v3921_v61 = vadd.f32 %v3920_v48, %v3919_v52  ;;  %v3922_v47 = vpop.f32.mrb[134].mxu0  ;;  %v3486_v55 = vpack.c.bf16 %v4216_v63, %v4208_v18  ;;  %v2811_v15 = vadd.f32 %v4216_v63, %v2810_v26  ;;  %v2849_v43 = vmul.f32 %v4216_v63, %v4216_v63 }
 0x216   : > { %v2879_v46 = vadd.f32 %v2878_v51, %v2848_v17  ;;  %v3923_v11 = vpop.f32.mrb[135].mxu0  ;;  %3546 = vst [vmem:[%s5634_s9 + $0x48] sm:$0xff] %v3491_v60  }
 0x217   : > { %v3924_v53 = vadd.f32 %v3923_v11, %v3922_v47  ;;  %v4235_v16 = vadd.f32 %v5517_v28, %v3921_v61  ;;  %3545 = vst [vmem:[%s5634_s9 + $0x40] sm:$0xff] %v3486_v55   ;;  %v2812_v3 = vadd.f32 %v4204_v22, %v2811_v15  ;;  %v4095_v13 = vpop.f32.mrb[4].mxu1 }
 0x218   : > { %v2880_v2 = vadd.f32 %v2879_v46, %v2849_v43  ;;  %v4220_v41 = vadd.f32 %v5663_v39, %v4095_v13  ;;  %v2556_v42 = vpop.f32.mrb[5].mxu1 }
 0x219   : > { %v4243_v6 = vadd.f32 %v5521_v37, %v3924_v53  ;;  %v4224_v10 = vadd.f32 %v5651_v56, %v2556_v42  ;;  %v2813_v23 = vadd.f32 %v4212_v35, %v2812_v3  ;;  %v4096_v14 = vpop.f32.mrb[6].mxu1 }
 0x21a   : > { %v2881_v57 = vadd.f32 %v2880_v2, %v2850_v21  ;;  %v4228_v32 = vadd.f32 %v5668_v5, %v4096_v14  ;;  %v2559_v28 = vpop.f32.mrb[7].mxu1  ;;  %v2854_v9 = vmul.f32 %v4220_v41, %v4220_v41 }
 0x21b   : > { %v3925_v0 = vpop.f32.mrb[136].mxu0  ;;  %v2814_v50 = vadd.f32 %v4224_v10, %v2813_v23  ;;  %v2852_v34 = vmul.f32 %v4224_v10, %v4224_v10  ;;  %v4232_v39 = vadd.f32 %v5656_v40, %v2559_v28 }
 0x21c   : > { %v2882_v59 = vadd.f32 %v2881_v57, %v2851_v29  ;;  %v3926_v7 = vpop.f32.mrb[137].mxu0  ;;  %v3501_v58 = vpack.c.bf16 %v4228_v32, %v4220_v41  ;;  %v2855_v18 = vmul.f32 %v4228_v32, %v4228_v32 }
 0x21d   : > { %v3927_v37 = vadd.f32 %v3926_v7, %v3925_v0  ;;  %v3928_v33 = vpop.f32.mrb[138].mxu0  ;;  %v3496_v49 = vpack.c.bf16 %v4232_v39, %v4224_v10  ;;  %v2815_v56 = vadd.f32 %v4232_v39, %v2814_v50  ;;  %v2853_v31 = vmul.f32 %v4232_v39, %v4232_v39 }
 0x21e   : > { %v2883_v45 = vadd.f32 %v2882_v59, %v2852_v34  ;;  %v3929_v27 = vpop.f32.mrb[139].mxu0  ;;  %3548 = vst [vmem:[%s5634_s9 + $0x58] sm:$0xff] %v3501_v58  }
 0x21f   : > { %v3930_v5 = vadd.f32 %v3929_v27, %v3928_v33  ;;  %v4255_v44 = vadd.f32 %v5545_v62, %v3927_v37  ;;  %3547 = vst [vmem:[%s5634_s9 + $0x50] sm:$0xff] %v3496_v49   ;;  %v2816_v19 = vadd.f32 %v4220_v41, %v2815_v56  ;;  %v4099_v20 = vpop.f32.mrb[8].mxu1 }
 0x220   : > { %v2884_v22 = vadd.f32 %v2883_v45, %v2853_v31  ;;  %v4236_v24 = vadd.f32 %v4235_v16, %v4099_v20  ;;  %v2572_v40 = vpop.f32.mrb[9].mxu1 }
 0x221   : > { %v4263_v8 = vadd.f32 %v5549_v38, %v3930_v5  ;;  %v4240_v4 = vadd.f32 %v5675_v1, %v2572_v40  ;;  %v2817_v35 = vadd.f32 %v4228_v32, %v2816_v19  ;;  %v4100_v30 = vpop.f32.mrb[10].mxu1 }
 0x222   : > { %v2885_v25 = vadd.f32 %v2884_v22, %v2854_v9  ;;  %v4244_v52 = vadd.f32 %v4243_v6, %v4100_v30  ;;  %v2575_v26 = vpop.f32.mrb[11].mxu1  ;;  %v2858_v16 = vmul.f32 %v4236_v24, %v4236_v24 }
 0x223   : > { %v3931_v17 = vpop.f32.mrb[140].mxu0  ;;  %v2818_v62 = vadd.f32 %v4240_v4, %v2817_v35  ;;  %v2856_v51 = vmul.f32 %v4240_v4, %v4240_v4  ;;  %v4248_v48 = vadd.f32 %v5680_v36, %v2575_v26 }
 0x224   : > { %v2886_v63 = vadd.f32 %v2885_v25, %v2855_v18  ;;  %v3932_v60 = vpop.f32.mrb[141].mxu0  ;;  %v3511_v61 = vpack.c.bf16 %v4244_v52, %v4236_v24  ;;  %v2859_v42 = vmul.f32 %v4244_v52, %v4244_v52  ;;  %v2903_v25 = vld [vmem:[%s5578_s30] sm:$0x3] }
 0x225   : > { %v3933_v47 = vadd.f32 %v3932_v60, %v3931_v17  ;;  %v3934_v38 = vpop.f32.mrb[142].mxu0  ;;  %v3506_v55 = vpack.c.bf16 %v4248_v48, %v4240_v4  ;;  %v2819_v15 = vadd.f32 %v4248_v48, %v2818_v62  ;;  %v2857_v1 = vmul.f32 %v4248_v48, %v4248_v48 }
 0x226   : > { %v2887_v46 = vadd.f32 %v2886_v63, %v2856_v51  ;;  %v3935_v43 = vpop.f32.mrb[143].mxu0  ;;  %3550 = vst [vmem:[%s5634_s9 + $0x68] sm:$0xff] %v3511_v61  }
 0x227   : > { %v4251_v11 = vadd.f32 %v5567_v54, %v3933_v47  ;;  %v3936_v53 = vadd.f32 %v3935_v43, %v3934_v38  ;;  %3549 = vst [vmem:[%s5634_s9 + $0x60] sm:$0xff] %v3506_v55   ;;  %v2820_v21 = vadd.f32 %v4236_v24, %v2819_v15  ;;  %v4103_v2 = vpop.f32.mrb[12].mxu1 }
 0x228   : > { %v2888_v3 = vadd.f32 %v2887_v46, %v2857_v1  ;;  %v2588_v36 = vpop.f32.mrb[13].mxu1 }
 0x229   : > { %v4252_v13 = vadd.f32 %v4251_v11, %v4103_v2  ;;  %v4259_v41 = vadd.f32 %v5569_v12, %v3936_v53  ;;  %v4256_v29 = vadd.f32 %v4255_v44, %v2588_v36  ;;  %v2821_v57 = vadd.f32 %v4244_v52, %v2820_v21  ;;  %v4104_v10 = vpop.f32.mrb[14].mxu1 }
 0x22a   : > { %v2889_v6 = vadd.f32 %v2888_v3, %v2858_v16  ;;  %v2591_v14 = vpop.f32.mrb[15].mxu1 }
 0x22b   : > { %v4260_v23 = vadd.f32 %v4259_v41, %v4104_v10  ;;  %v2822_v54 = vadd.f32 %v4256_v29, %v2821_v57  ;;  %v2860_v32 = vmul.f32 %v4256_v29, %v4256_v29  ;;  %v4264_v0 = vadd.f32 %v4263_v8, %v2591_v14 }
 0x22c   : > { %v2890_v28 = vadd.f32 %v2889_v6, %v2859_v42  ;;  %v2862_v50 = vmul.f32 %v4252_v13, %v4252_v13 }
 0x22d   : > { %v3521_v34 = vpack.c.bf16 %v4260_v23, %v4252_v13  ;;  %v3516_v39 = vpack.c.bf16 %v4264_v0, %v4256_v29  ;;  %v2823_v7 = vadd.f32 %v4264_v0, %v2822_v54  ;;  %v2861_v58 = vmul.f32 %v4264_v0, %v4264_v0 }
 0x22e   : > { %v2891_v59 = vadd.f32 %v2890_v28, %v2860_v32  ;;  %v2863_v12 = vmul.f32 %v4260_v23, %v4260_v23 }
 0x22f   : > { %3552 = vst [vmem:[%s5634_s9 + $0x78] sm:$0xff] %v3521_v34   ;;  %3551 = vst [vmem:[%s5634_s9 + $0x70] sm:$0xff] %v3516_v39   ;;  %v2824_v37 = vadd.f32 %v4252_v13, %v2823_v7 }
 0x230   : > { %v2892_v33 = vadd.f32 %v2891_v59, %v2861_v58 }
 0x231   : > { %v2825_v45 = vadd.f32 %v4260_v23, %v2824_v37 }
 0x232   : > { %v2893_v49 = vadd.f32 %v2892_v33, %v2862_v50 }
 0x233   : > { %v2826_v56 = vrot.slane %v2825_v45, 4 }
 0x234   : > { %v2894_v31 = vadd.f32 %v2893_v49, %v2863_v12 }
 0x235   : > { %v2827_v27 = vadd.f32 %v2826_v56, %v2825_v45 }
 0x236   : > { %v2895_v5 = vrot.slane %v2894_v31, 4 }
 0x237   : > { %v2828_v44 = vrot.slane %v2827_v27, 2 }
 0x238   : > { %v2896_v9 = vadd.f32 %v2895_v5, %v2894_v31 }
 0x239   : > { %v2829_v19 = vadd.f32 %v2828_v44, %v2827_v27 }
 0x23a   : > { %v2897_v22 = vrot.slane %v2896_v9, 2 }
 0x23b   : > { %v2830_v20 = vrot.slane %v2829_v19, 1 }
 0x23c   : > { %v2898_v24 = vadd.f32 %v2897_v22, %v2896_v9 }
 0x23d   : > { %v2831_v8 = vadd.f32 %v2830_v20, %v2829_v19 }
 0x23e   : > { %v2899_v40 = vrot.slane %v2898_v24, 1 }
 0x240   : > { %v2900_v18 = vadd.f32 %v2899_v40, %v2898_v24 }
 0x242   : > { %v2902_v4 = vsel %vm2901_vm5, %v2831_v8, %v2900_v18 }
 0x243   : > { %v2904_v35 = vadd.f32 %v2903_v25, %v2902_v4 }
 0x245   : > { %2905 = vst [vmem:[%s5578_s30] sm:$0x3] %v2904_v35 }
 0x246 PF: > { %s17_s23 = sadd.s32 1, %s4433_s23   ;;  %s5742_s21 = smov %s4429_s22 }
 0x247   : > { %p14_p5 = scmp.ge.s32.totalorder %s17_s23, 4   ;;  %s5743_s22 = smov %s5745_s24 }
 0x249   :  { %16 = sbr.rel (!%p14_p5) target bundleno = 2 (0x2), region = 92 }

// kernel: _lambda_.5
= control target key start
LH: loop header
LB: loop body
LE: loop exit
PB: predicated region body
PF: predicated region fallthrough
CT: control target
= control target key end

     0   :  { %s4917_s18 = smov 0   ;;  %s4919_s19 = smov 0   ;;  %s6480_s0 = inlined_call_operand.vmem [shape: bf16[2,16,16,64], index: 0, kind: input, shape index: {}]   ;;  %s6481_s1 = inlined_call_operand.vmem [shape: bf16[2,16,16,64], index: 1, kind: input, shape index: {}]   ;;  %s6482_s2 = inlined_call_operand.vmem [shape: bf16[3,384,128], index: 2, kind: input, shape index: {}]   ;;  %s6483_s3 = inlined_call_operand.vmem [shape: f32[1,128], index: 3, kind: input, shape index: {}]   ;;  %s6484_s4 = inlined_call_operand.vmem [shape: bf16[2,16,16,128], index: 4, kind: output, shape index: {0}]   ;;  %s6485_s5 = inlined_call_operand.vmem [shape: f32[2,2,128], index: 5, kind: output, shape index: {1}]  }
   0x1   :  { %s4921_s20 = smov 0  }
   0x2 LB: > { %s28_s21 = sadd.s32 1, %s4878_s19  ;;  %p3498_p0 = scmp.ge.s32.totalorder %s4882_s20, 1  ;;  %s4882_s20 = sphi %s4921_s20, %s16_s20   ;;  %s4878_s19 = sphi %s4919_s19, %s6507_s19   ;;  %s4874_s18 = sphi %s4917_s18, %s6506_s18  }
   0x3   : > { %p30_p1 = scmp.ge.s32.totalorder %s28_s21, 2  ;;  %p214_p2 = scmp.lt.s32.totalorder %s4882_s20, 3 }
   0x5   : > { %s6509_s21 = smov (%p30_p1, %s28_s21), 0  ;;  %p215_p3 = pnand %p3498_p0, %p214_p2 }
   0x7   : > { %218 = sbr.rel (%p215_p3) target bundleno = 671 (0x29f), region = 36 }
   0xe   : > { %p256_p4 = scmp.lt.s32.totalorder %s4874_s18, 1  ;;  %v4769_v0 = vld [vmem:[%s6482_s2 + $0x40] sm:$0xff]   ;;  %v4884_v2 = vmov 0   ;;  %v4772_v4 = vld [vmem:[%s6482_s2 + $0x48] sm:$0xff]   ;;  %s4885_s11 = smov 64   ;;  %v4775_v56 = vld [vmem:[%s6482_s2 + $0x50] sm:$0xff]  }
   0xf   : > { %v4770_v1 = vld [vmem:[%s6482_s2] sm:$0xff]   ;;  %286 = vst [vmem:[#allocation2] sm:$0xff] %v4884_v2  ;;  %290 = vst [vmem:[#allocation2 + $0x20] sm:$0xff] %v4884_v2  ;;  %1563 = vmatprep.mubr.bf16.mxu0 %v4884_v2  ;;  %3967 = vmatprep.subr.bf16.mxu0 %v4769_v0  ;;  %v4773_v5 = vld [vmem:[%s6482_s2 + $0x8] sm:$0xff]   ;;  %vm581_vm0 = vcmask 523264   ;;  %vm1035_vm2 = vcmask 1048064  }
  0x10   : > { %s6511_s18 = smov (!%p256_p4, %s4874_s18), 1  ;;  %293 = vst [vmem:[#allocation2 + $0x38] sm:$0xff] %v4884_v2  ;;  %296 = vst [vmem:[#allocation2 + $0x50] sm:$0xff] %v4884_v2  ;;  %v4964_v3 = vld [vmem:[%s6482_s2 + $0x80] sm:$0xff]   ;;  %3968 = vmatpush3.bf16.msra.mxu0 %v4770_v1  ;;  %v5077_v52 = vld [vmem:[%s6482_s2 + $0x88] sm:$0xff]   ;;  %vm3349_vm8 = vcmask 1040384  }
  0x11   : > { %299 = vst [vmem:[#allocation2 + $0x68] sm:$0xff] %v4884_v2  ;;  %302 = vst [vmem:[#allocation2 + $0x80] sm:$0xff] %v4884_v2  ;;  %s4967_s28 = sshll.u32 %s6511_s18, 7  ;;  %4519 = vmatprep.subr.bf16.mxu1 %v4964_v3  ;;  %3969 = vmatprep.subr.bf16.mxu0 %v4772_v4  ;;  %v4776_v59 = vld [vmem:[%s6482_s2 + $0x10] sm:$0xff]   ;;  %v4778_v4 = vld [vmem:[%s6482_s2 + $0x58] sm:$0xff]   ;;  %s3505_s17 = sshll.u32 %s6511_s18, 1 }
  0x12   : > { %305 = vst [vmem:[#allocation2 + $0x98] sm:$0xff] %v4884_v2  ;;  %308 = vst [vmem:[#allocation2 + $0xb0] sm:$0xff] %v4884_v2  ;;  %s4976_s8 = scalar_lea.vmem %s6481_s1, %s4967_s28  ;;  %4527 = vmatpush3.bf16.msra.mxu1 %v4964_v3  ;;  %v5106_v63 = vld [vmem:[%s6482_s2 + $0x90] sm:$0xff]   ;;  %s5163_s16 = scalar_lea.vmem %s6480_s0, %s4967_s28  ;;  %vm713_vm1 = vsmask.f32 7424 }
  0x13   : > { %311 = vst [vmem:[#allocation2 + $0xc8] sm:$0xff] %v4884_v2  ;;  %314 = vst [vmem:[#allocation2 + $0xe0] sm:$0xff] %v4884_v2  ;;  %v4983_v6 = vld [vmem:[%s4976_s8 + $0x38] sm:$0xff]   ;;  %v4987_v7 = vld [vmem:[%s4976_s8 + $0x48] sm:$0xff]   ;;  %4520 = vmatprep.subr.bf16.mxu1 %v5077_v52  ;;  %vm582_vm4 = vsmask.f32 7938  ;;  %s6405_s24 = scalar_lea.vmem %s6484_s4, %s4967_s28 }
  0x14   : > { %317 = vst [vmem:[#allocation2 + $0xf8] sm:$0xff] %v4884_v2  ;;  %320 = vst [vmem:[#allocation2 + $0x110] sm:$0xff] %v4884_v2  ;;  %v925_v8 = vshrl.u32 %v4983_v6, 16  ;;  %v928_v9 = vshll.u32 %v4983_v6, 16  ;;  %3970 = vmatpush3.bf16.msra.mxu0 %v4773_v5  ;;  %v939_v10 = vshrl.u32 %v4987_v7, 16  ;;  %v942_v11 = vshll.u32 %v4987_v7, 16 }
  0x15   : > { %323 = vst [vmem:[#allocation2 + $0x128] sm:$0xff] %v4884_v2  ;;  %326 = vst [vmem:[#allocation2 + $0x140] sm:$0xff] %v4884_v2  ;;  %v4994_v12 = vld [vmem:[%s4976_s8 + $0x40] sm:$0xff]   ;;  %v5010_v21 = vld [vmem:[%s4976_s8 + $0x58] sm:$0xff]   ;;  %3971 = vmatprep.subr.bf16.mxu0 %v4775_v56 }
  0x16   : > { %329 = vst [vmem:[#allocation2 + $0x158] sm:$0xff] %v4884_v2  ;;  %332 = vst [vmem:[#allocation2 + $0x170] sm:$0xff] %v4884_v2  ;;  %v4997_v13 = vld [vmem:[%s4976_s8] sm:$0xff]   ;;  %v1164_v14 = vrot.slane %v928_v9, 1  ;;  %v1168_v15 = vrot.slane %v942_v11, 1  ;;  %v932_v16 = vshrl.u32 %v4994_v12, 16  ;;  %4528 = vmatpush3.bf16.msra.mxu1 %v5077_v52 }
  0x17   : > { %335 = vst [vmem:[#allocation2 + $0x188] sm:$0xff] %v4884_v2  ;;  %v935_v17 = vshll.u32 %v4994_v12, 16  ;;  %v876_v19 = vshrl.u32 %v4997_v13, 16  ;;  %v879_v20 = vshll.u32 %v4997_v13, 16  ;;  %v5013_v22 = vld [vmem:[%s4976_s8 + $0x50] sm:$0xff]   ;;  %v5020_v25 = vld [vmem:[%s4976_s8 + $0x8] sm:$0xff]   ;;  %4521 = vmatprep.subr.bf16.mxu1 %v5106_v63  ;;  %vm5447_vm3 = vmand %vm581_vm0, %vm713_vm1 }
  0x18   : > { %v1165_v18 = vor.u32 %v1164_v14, %v925_v8  ;;  %v1169_v23 = vor.u32 %v1168_v15, %v939_v10  ;;  %v956_v27 = vshll.u32 %v5010_v21, 16  ;;  %v946_v29 = vshrl.u32 %v5013_v22, 16  ;;  %v5035_v33 = vld [vmem:[%s4976_s8 + $0x60] sm:$0xff]   ;;  %v5042_v37 = vld [vmem:[%s4976_s8 + $0x68] sm:$0xff]   ;;  %v5054_v42 = vld [vmem:[%s4976_s8 + $0x10] sm:$0xff]   ;;  %3972 = vmatpush3.bf16.msra.mxu0 %v4776_v59 }
  0x19   : > { %v1166_v24 = vrot.slane %v935_v17, 1  ;;  %v878_v26 = vrot.slane %v876_v19, 7  ;;  %v949_v30 = vshll.u32 %v5013_v22, 16  ;;  %v883_v31 = vshrl.u32 %v5020_v25, 16  ;;  %v5062_v45 = vld [vmem:[%s4976_s8 + $0x70] sm:$0xff]   ;;  %v5083_v55 = vld [vmem:[%s4976_s8 + $0x18] sm:$0xff]   ;;  %3973 = vmatprep.subr.bf16.mxu0 %v4778_v4  ;;  %vm5459_vm5 = vmand %vm1035_vm2, %vm713_vm1 }
  0x1a   : > { %1196 = vrot.lane.b32.xlu0 %v1165_v18, %s4885_s11  ;;  %1200 = vrot.lane.b32.xlu1 %v1169_v23, %s4885_s11  ;;  %v953_v34 = vshrl.u32 %v5010_v21, 16  ;;  %v886_v36 = vshll.u32 %v5020_v25, 16  ;;  %v1172_v38 = vrot.slane %v956_v27, 1  ;;  %v963_v41 = vshll.u32 %v5035_v33, 16  ;;  %v5099_v61 = vld [vmem:[%s4976_s8 + $0x20] sm:$0xff]   ;;  %v4779_v15 = vld [vmem:[%s6482_s2 + $0x18] sm:$0xff]   ;;  %vm5481_vm6 = vmand %vm581_vm0, %vm582_vm4 }
  0x1b   : > { %v1167_v28 = vor.u32 %v1166_v24, %v932_v16  ;;  %v881_v32 = vor.u32 %v879_v20, %v878_v26  ;;  %v1170_v35 = vrot.slane %v949_v30, 1  ;;  %v885_v39 = vrot.slane %v883_v31, 7  ;;  %4529 = vmatpush3.bf16.msra.mxu1 %v5106_v63  ;;  %v5130_v23 = vld [vmem:[%s6482_s2 + $0x98] sm:$0xff]   ;;  %v4781_v24 = vld [vmem:[%s6482_s2 + $0x60] sm:$0xff]   ;;  %vm5500_vm7 = vmand %vm1035_vm2, %vm582_vm4 }
  0x1c   : > { %v970_v43 = vshll.u32 %v5042_v37, 16  ;;  %v1173_v44 = vor.u32 %v1172_v38, %v953_v34  ;;  %v960_v47 = vshrl.u32 %v5035_v33, 16  ;;  %v1174_v48 = vrot.slane %v963_v41, 1  ;;  %3974 = vmatpush3.bf16.msra.mxu0 %v4779_v15  ;;  %4522 = vmatprep.subr.bf16.mxu1 %v5130_v23  ;;  %v5186_v56 = vld [vmem:[%s5163_s16 + $0x38] sm:$0xff]   ;;  %v5214_v15 = vld [vmem:[%s5163_s16 + $0x48] sm:$0xff]  }
  0x1d   : > { %v1171_v40 = vor.u32 %v1170_v35, %v946_v29  ;;  %v888_v46 = vor.u32 %v886_v36, %v885_v39  ;;  %v890_v49 = vshrl.u32 %v5054_v42, 16  ;;  %v967_v50 = vshrl.u32 %v5042_v37, 16  ;;  %v4782_v35 = vld [vmem:[%s6482_s2 + $0x20] sm:$0xff]   ;;  %3975 = vmatprep.subr.bf16.mxu0 %v4781_v24  ;;  %656 = vst.msk [vmem:[#allocation2 + $0xc8] sm:$0xff] %vm581_vm0, %v5186_v56  ;;  %658 = vst.msk [vmem:[#allocation2 + $0xf8] sm:$0xff] %vm581_vm0, %v5214_v15 }
  0x1e   : > { %1198 = vrot.lane.b32.xlu0 %v1167_v28, %s4885_s11  ;;  %987 = vrot.lane.b32.xlu1 %v881_v32, %s4885_s11  ;;  %v1176_v51 = vrot.slane %v970_v43, 1  ;;  %v893_v53 = vshll.u32 %v5054_v42, 16  ;;  %v977_v54 = vshll.u32 %v5062_v45, 16  ;;  %v1175_v57 = vor.u32 %v1174_v48, %v960_v47  ;;  %v5141_v32 = vld [vmem:[%s4976_s8 + $0x28] sm:$0xff]   ;;  %v5217_v24 = vld [vmem:[%s5163_s16 + $0x40] sm:$0xff]  }
  0x1f   : > { %v892_v58 = vrot.slane %v890_v49, 7  ;;  %v974_v60 = vshrl.u32 %v5062_v45, 16  ;;  %v897_v62 = vshrl.u32 %v5083_v55, 16  ;;  %v900_v1 = vshll.u32 %v5083_v55, 16  ;;  %4530 = vmatpush3.bf16.msra.mxu1 %v5130_v23  ;;  %657 = vst.msk [vmem:[#allocation2 + $0xe0] sm:$0xff] %vm581_vm0, %v5217_v24 }
  0x20   : > { %v1177_v0 = vor.u32 %v1176_v51, %v967_v50  ;;  %v1178_v14 = vrot.slane %v977_v54, 1  ;;  %v904_v18 = vshrl.u32 %v5099_v61, 16  ;;  %v1150_v26 = vrot.slane %v879_v20, 1  ;;  %v5153_v20 = vld [vmem:[%s6482_s2 + $0xa0] sm:$0xff]   ;;  %3976 = vmatpush3.bf16.msra.mxu0 %v4782_v35  ;;  %v5183_v51 = vld [vmem:[%s4976_s8 + $0x30] sm:$0xff]  }
  0x21   : > { %v895_v5 = vor.u32 %v893_v53, %v892_v58  ;;  %v899_v28 = vrot.slane %v897_v62, 7  ;;  %4523 = vmatprep.subr.bf16.mxu1 %v5153_v20  ;;  %v911_v48 = vshrl.u32 %v5141_v32, 16  ;;  %v914_v58 = vshll.u32 %v5141_v32, 16 }
  0x22   : > { %1085 = vrot.lane.b32.xlu0 %v4997_v13, %s4885_s11  ;;  %1202 = vrot.lane.b32.xlu1 %v1171_v40, %s4885_s11  ;;  %v1179_v38 = vor.u32 %v1178_v14, %v974_v60  ;;  %v5157_v39 = vor.u32 %v1150_v26, %v876_v19  ;;  %v4784_v40 = vld [vmem:[%s6482_s2 + $0x68] sm:$0xff]   ;;  %v918_v59 = vshrl.u32 %v5183_v51, 16  ;;  %v4789_v14 = vld [vmem:[%s6482_s2 + $0x30] sm:$0xff]   ;;  %v921_v35 = vshll.u32 %v5183_v51, 16 }
  0x23   : > { %v4785_v13 = vld [vmem:[%s6482_s2 + $0x28] sm:$0xff]   ;;  %v902_v19 = vor.u32 %v900_v1, %v899_v28  ;;  %3977 = vmatprep.subr.bf16.mxu0 %v4784_v40  ;;  %4531 = vmatpush3.bf16.msra.mxu1 %v5153_v20  ;;  %v913_v4 = vrot.slane %v911_v48, 7  ;;  %v4793_v40 = vld [vmem:[%s6482_s2 + $0x78] sm:$0xff]  }
  0x24   : > { %3978 = vmatpush3.bf16.msra.mxu0 %v4785_v13  ;;  %v920_v28 = vrot.slane %v918_v59, 7  ;;  %v4794_v13 = vld [vmem:[%s6482_s2 + $0x38] sm:$0xff]  }
  0x25   : > { %v916_v26 = vor.u32 %v914_v58, %v913_v4  ;;  %v5255_v4 = vld [vmem:[%s6482_s2 + $0xb8] sm:$0xff]  }
  0x26   : > { %1204 = vrot.lane.b32.xlu0 %v1173_v44, %s4885_s11  ;;  %989 = vrot.lane.b32.xlu1 %v888_v46, %s4885_s11  ;;  %v907_v44 = vshll.u32 %v5099_v61, 16  ;;  %v906_v46 = vrot.slane %v904_v18, 7 }
  0x2a   : > { %1087 = vrot.lane.b32.xlu0 %v5020_v25, %s4885_s11  ;;  %1206 = vrot.lane.b32.xlu1 %v1175_v57, %s4885_s11  ;;  %v5192_v57 = vld [vmem:[%s6482_s2 + $0xa8] sm:$0xff]  }
  0x2b   : > { %4524 = vmatprep.subr.bf16.mxu1 %v5192_v57 }
  0x2c   : > { %4532 = vmatpush3.bf16.msra.mxu1 %v5192_v57 }
  0x2e   : > { %1208 = vrot.lane.b32.xlu0 %v1177_v0, %s4885_s11  ;;  %991 = vrot.lane.b32.xlu1 %v895_v5, %s4885_s11  ;;  %v909_v0 = vor.u32 %v907_v44, %v906_v46  ;;  %v4788_v5 = vld [vmem:[%s6482_s2 + $0x70] sm:$0xff]   ;;  %v927_v46 = vrot.slane %v925_v8, 7 }
  0x2f   : > { %3979 = vmatprep.subr.bf16.mxu0 %v4788_v5  ;;  %v5262_v5 = vld [vmem:[%s5163_s16 + $0x58] sm:$0xff]   ;;  %v5265_v8 = vld [vmem:[%s5163_s16 + $0x50] sm:$0xff]  }
  0x30   : > { %3980 = vmatpush3.bf16.msra.mxu0 %v4789_v14  ;;  %660 = vst.msk [vmem:[#allocation2 + $0x128] sm:$0xff] %vm581_vm0, %v5262_v5  ;;  %659 = vst.msk [vmem:[#allocation2 + $0x110] sm:$0xff] %vm581_vm0, %v5265_v8  ;;  %v4799_v14 = vld [vmem:[%s6482_s2 + $0x100] sm:$0xff]  }
  0x31   : > { %3981 = vmatprep.subr.bf16.mxu0 %v4793_v40  ;;  %v941_v40 = vrot.slane %v939_v10, 7  ;;  %v5307_v10 = vld [vmem:[%s5163_s16 + $0x60] sm:$0xff]  }
  0x32   : > { %1089 = vrot.lane.b32.xlu0 %v5054_v42, %s4885_s11  ;;  %1210 = vrot.lane.b32.xlu1 %v1179_v38, %s4885_s11  ;;  %v5230_v38 = vld [vmem:[%s6482_s2 + $0xb0] sm:$0xff]   ;;  %661 = vst.msk [vmem:[#allocation2 + $0x140] sm:$0xff] %vm581_vm0, %v5307_v10  ;;  %v1162_v42 = vrot.slane %v921_v35, 1 }
  0x33   : > { %4525 = vmatprep.subr.bf16.mxu1 %v5230_v38 }
  0x34   : > { %4533 = vmatpush3.bf16.msra.mxu1 %v5230_v38  ;;  %3982 = vmatpush3.bf16.msra.mxu0 %v4794_v13 }
  0x35   : > { %4375 = vmatprep.subr.bf16.mxu0 %v4964_v3  ;;  %4526 = vmatprep.subr.bf16.mxu1 %v5255_v4 }
  0x36   : > { %993 = vrot.lane.b32.xlu0 %v902_v19, %s4885_s11  ;;  %1091 = vrot.lane.b32.xlu1 %v5083_v55, %s4885_s11  ;;  %v5245_v19 = vld [vmem:[%s5163_s16] sm:$0xff]   ;;  %v1163_v55 = vor.u32 %v1162_v42, %v918_v59 }
  0x37   : > { %649 = vst.msk [vmem:[#allocation2 + $0x20] sm:$0xff] %vm581_vm0, %v5245_v19  ;;  %1564 = vmatmul.mubr.bf16.vlgmr.msra.gmra.mrb[0].mxu0 %v4884_v2  ;;  %v934_v2 = vrot.slane %v932_v16, 7  ;;  %v944_v16 = vor.u32 %v942_v11, %v941_v40  ;;  %v453_v59 = vshrl.u32 %v5245_v19, 16 }
  0x38   : > { %4534 = vmatpush3.bf16.msra.mxu1 %v5255_v4  ;;  %4376 = vmatpush3.bf16.msra.mxu0 %v4964_v3  ;;  %v5298_v3 = vld [vmem:[%s5163_s16 + $0x68] sm:$0xff]  }
  0x39   : > { %4103 = vmatprep.subr.bf16.mxu1 %v4799_v14  ;;  %4377 = vmatprep.subr.bf16.mxu0 %v5077_v52  ;;  %662 = vst.msk [vmem:[#allocation2 + $0x158] sm:$0xff] %vm581_vm0, %v5298_v3  ;;  %v455_v14 = vrot.slane %v453_v59, 7 }
  0x3a   : > { %995 = vrot.lane.b32.xlu0 %v909_v0, %s4885_s11  ;;  %1093 = vrot.lane.b32.xlu1 %v5099_v61, %s4885_s11  ;;  %v923_v0 = vor.u32 %v921_v35, %v920_v28  ;;  %v5287_v28 = vld [vmem:[%s5163_s16 + $0x8] sm:$0xff]  }
  0x3b   : > { %650 = vst.msk [vmem:[#allocation2 + $0x38] sm:$0xff] %vm581_vm0, %v5287_v28 }
  0x3c   : > { %4378 = vmatpush3.bf16.msra.mxu0 %v5077_v52  ;;  %v962_v52 = vrot.slane %v960_v47, 7 }
  0x3d   : > { %4379 = vmatprep.subr.bf16.mxu0 %v5106_v63 }
  0x3e   : > { %997 = vrot.lane.b32.xlu0 %v916_v26, %s4885_s11  ;;  %1095 = vrot.lane.b32.xlu1 %v5141_v32, %s4885_s11  ;;  %v930_v26 = vor.u32 %v928_v9, %v927_v46  ;;  %v937_v9 = vor.u32 %v935_v17, %v934_v2  ;;  %v948_v17 = vrot.slane %v946_v29, 7  ;;  %v955_v29 = vrot.slane %v953_v34, 7 }
  0x3f   : > { %v502_v32 = vshrl.u32 %v5186_v56, 16  ;;  %v533_v2 = vshll.u32 %v5262_v5, 16 }
  0x40   : > { %4380 = vmatpush3.bf16.msra.mxu0 %v5106_v63  ;;  %v951_v11 = vor.u32 %v949_v30, %v948_v17  ;;  %v5342_v30 = vld [vmem:[%s5163_s16 + $0x18] sm:$0xff]   ;;  %v958_v34 = vor.u32 %v956_v27, %v955_v29  ;;  %v969_v27 = vrot.slane %v967_v50, 7  ;;  %v5380_v50 = vld [vmem:[%s5163_s16 + $0x30] sm:$0xff]  }
  0x41   : > { %4381 = vmatprep.subr.bf16.mxu0 %v5130_v23  ;;  %652 = vst.msk [vmem:[#allocation2 + $0x68] sm:$0xff] %vm581_vm0, %v5342_v30  ;;  %v4816_v63 = vld [vmem:[%s4976_s8 + $0x78] sm:$0xff]   ;;  %655 = vst.msk [vmem:[#allocation2 + $0xb0] sm:$0xff] %vm581_vm0, %v5380_v50  ;;  %s6360_s8 = scalar_lea.vmem %s6485_s5, %s3505_s17 }
  0x42   : > { %999 = vrot.lane.b32.xlu0 %v923_v0, %s4885_s11  ;;  %1097 = vrot.lane.b32.xlu1 %v5183_v51, %s4885_s11  ;;  %v972_v47 = vor.u32 %v970_v43, %v969_v27  ;;  %v516_v51 = vshrl.u32 %v5214_v15, 16 }
  0x44   : > { %4382 = vmatpush3.bf16.msra.mxu0 %v5130_v23  ;;  %v981_v23 = vshrl.u32 %v4816_v63, 16 }
  0x45   : > { %4383 = vmatprep.subr.bf16.mxu0 %v5153_v20 }
  0x46   : > { %1001 = vrot.lane.b32.xlu0 %v930_v26, %s4885_s11  ;;  %1099 = vrot.lane.b32.xlu1 %v4983_v6, %s4885_s11  ;;  %v5320_v6 = vld [vmem:[%s5163_s16 + $0x10] sm:$0xff]   ;;  %v526_v26 = vshll.u32 %v5265_v8, 16 }
  0x47   : > { %651 = vst.msk [vmem:[#allocation2 + $0x50] sm:$0xff] %vm581_vm0, %v5320_v6 }
  0x48   : > { %4384 = vmatpush3.bf16.msra.mxu0 %v5153_v20  ;;  %v1160_v20 = vrot.slane %v914_v58, 1 }
  0x49   : > { %4385 = vmatprep.subr.bf16.mxu0 %v5192_v57 }
  0x4a   : > { %1003 = vrot.lane.b32.xlu0 %v937_v9, %s4885_s11  ;;  %1101 = vrot.lane.b32.xlu1 %v4994_v12, %s4885_s11  ;;  %v5334_v12 = vld [vmem:[%s5163_s16 + $0x70] sm:$0xff]   ;;  %v1161_v25 = vor.u32 %v1160_v20, %v911_v48  ;;  %v512_v48 = vshll.u32 %v5217_v24, 16  ;;  %v5463_v9 = vld [vmem:[#allocation2] sm:$0xff] }
  0x4b   : > { %663 = vst.msk [vmem:[#allocation2 + $0x170] sm:$0xff] %vm581_vm0, %v5334_v12 }
  0x4c   : > { %4386 = vmatpush3.bf16.msra.mxu0 %v5192_v57  ;;  %v681_v13 = vrot.slane %v512_v48, 1 }
  0x4d   : > { %4387 = vmatprep.subr.bf16.mxu0 %v5230_v38 }
  0x4e   : > { %1005 = vrot.lane.b32.xlu0 %v944_v16, %s4885_s11  ;;  %1103 = vrot.lane.b32.xlu1 %v4987_v7, %s4885_s11  ;;  %v965_v7 = vor.u32 %v963_v41, %v962_v52  ;;  %v976_v41 = vrot.slane %v974_v60, 7  ;;  %v1152_v60 = vrot.slane %v886_v36, 1  ;;  %v1158_v36 = vrot.slane %v907_v44, 1 }
  0x4f   : > { %v984_v44 = vshll.u32 %v4816_v63, 16 }
  0x50   : > { %4388 = vmatpush3.bf16.msra.mxu0 %v5230_v38  ;;  %v979_v43 = vor.u32 %v977_v54, %v976_v41  ;;  %v1156_v54 = vrot.slane %v900_v1, 1  ;;  %v983_v1 = vrot.slane %v981_v23, 7  ;;  %v509_v38 = vshrl.u32 %v5217_v24, 16 }
  0x51   : > { %4389 = vmatprep.subr.bf16.mxu0 %v5255_v4 }
  0x52   : > { %1007 = vrot.lane.b32.xlu0 %v951_v11, %s4885_s11  ;;  %1105 = vrot.lane.b32.xlu1 %v5013_v22, %s4885_s11  ;;  %v5363_v22 = vld [vmem:[%s5163_s16 + $0x20] sm:$0xff]   ;;  %v1157_v57 = vor.u32 %v1156_v54, %v897_v62  ;;  %v505_v62 = vshll.u32 %v5186_v56, 16  ;;  %v682_v17 = vor.u32 %v681_v13, %v509_v38  ;;  %v460_v11 = vshrl.u32 %v5287_v28, 16 }
  0x53   : > { %653 = vst.msk [vmem:[#allocation2 + $0x80] sm:$0xff] %vm581_vm0, %v5363_v22 }
  0x54   : > { %4390 = vmatpush3.bf16.msra.mxu0 %v5255_v4  ;;  %v456_v4 = vshll.u32 %v5245_v19, 16  ;;  %v740_v54 = vsel %vm5447_vm3, %v682_v17, %v5463_v9  ;;  %v4831_v17 = vld [vmem:[%s6482_s2 + $0x1c0] sm:$0xff]  }
  0x55   : > { %4239 = vmatprep.subr.bf16.mxu0 %v4831_v17 }
  0x56   : > { %1009 = vrot.lane.b32.xlu0 %v958_v34, %s4885_s11  ;;  %1107 = vrot.lane.b32.xlu1 %v5010_v21, %s4885_s11  ;;  %v5377_v21 = vld [vmem:[%s5163_s16 + $0x28] sm:$0xff]   ;;  %v458_v52 = vor.u32 %v456_v4, %v455_v14  ;;  %v523_v34 = vshrl.u32 %v5265_v8, 16 }
  0x57   : > { %654 = vst.msk [vmem:[#allocation2 + $0x98] sm:$0xff] %vm581_vm0, %v5377_v21 }
  0x5a   : > { %1011 = vrot.lane.b32.xlu0 %v965_v7, %s4885_s11  ;;  %1109 = vrot.lane.b32.xlu1 %v5035_v33, %s4885_s11  ;;  %v1154_v33 = vrot.slane %v893_v53, 1  ;;  %v685_v7 = vrot.slane %v526_v26, 1 }
  0x5c   : > { %v1155_v53 = vor.u32 %v1154_v33, %v890_v49  ;;  %v1180_v49 = vrot.slane %v984_v44, 1  ;;  %v687_v33 = vrot.slane %v533_v2, 1 }
  0x5e   : > { %1013 = vrot.lane.b32.xlu0 %v972_v47, %s4885_s11  ;;  %1111 = vrot.lane.b32.xlu1 %v5042_v37, %s4885_s11  ;;  %v1153_v37 = vor.u32 %v1152_v60, %v883_v31  ;;  %v986_v31 = vor.u32 %v984_v44, %v983_v1  ;;  %v1181_v61 = vor.u32 %v1180_v49, %v981_v23  ;;  %v530_v60 = vshrl.u32 %v5262_v5, 16  ;;  %v4800_v1 = vld [vmem:[%s6482_s2 + $0xc0] sm:$0xff]  }
  0x5f   : > { %v462_v23 = vrot.slane %v460_v11, 7  ;;  %v540_v44 = vshll.u32 %v5307_v10, 16 }
  0x60   : > { %v688_v42 = vor.u32 %v687_v33, %v530_v60 }
  0x61   : > { %v689_v13 = vrot.slane %v540_v44, 1 }
  0x62   : > { %1015 = vrot.lane.b32.xlu0 %v979_v43, %s4885_s11  ;;  %1113 = vrot.lane.b32.xlu1 %v5062_v45, %s4885_s11  ;;  %v1159_v45 = vor.u32 %v1158_v36, %v904_v18  ;;  %v519_v18 = vshll.u32 %v5214_v15, 16  ;;  %v463_v36 = vshll.u32 %v5287_v28, 16 }
  0x64   : > { %v683_v58 = vrot.slane %v519_v18, 1 }
  0x66   : > { %1182 = vrot.lane.b32.xlu0 %v5157_v39, %s4885_s11  ;;  %1184 = vrot.lane.b32.xlu1 %v1153_v37, %s4885_s11  ;;  %v679_v39 = vrot.slane %v505_v62, 1  ;;  %v684_v0 = vor.u32 %v683_v58, %v516_v51  ;;  %v585_v37 = vsel %vm5481_vm6, %v458_v52, %v5463_v9  ;;  %v4803_v58 = vld [vmem:[%s6482_s2 + $0xc8] sm:$0xff]  }
  0x68   : > { %v680_v35 = vor.u32 %v679_v39, %v502_v32  ;;  %v743_v29 = vsel %vm5447_vm3, %v684_v0, %v5463_v9  ;;  %v467_v0 = vshrl.u32 %v5320_v6, 16 }
  0x6a   : > { %1186 = vrot.lane.b32.xlu0 %v1155_v53, %s4885_s11  ;;  %1188 = vrot.lane.b32.xlu1 %v1157_v57, %s4885_s11  ;;  %v737_v16 = vsel %vm5447_vm3, %v680_v35, %v5463_v9  ;;  %v686_v53 = vor.u32 %v685_v7, %v523_v34  ;;  %v537_v35 = vshrl.u32 %v5307_v10, 16 }
  0x6c   : > { %v746_v39 = vsel %vm5447_vm3, %v686_v53, %v5463_v9  ;;  %v690_v33 = vor.u32 %v689_v13, %v537_v35  ;;  %v551_v13 = vshrl.u32 %v5334_v12, 16 }
  0x6e   : > { %1190 = vrot.lane.b32.xlu0 %v1159_v45, %s4885_s11  ;;  %1192 = vrot.lane.b32.xlu1 %v1161_v25, %s4885_s11  ;;  %v4802_v45 = vld [vmem:[%s6482_s2 + $0x108] sm:$0xff]  }
  0x72   : > { %1017 = vrot.lane.b32.xlu0 %v986_v31, %s4885_s11  ;;  %1115 = vrot.lane.b32.xlu1 %v4816_v63, %s4885_s11 }
  0x76   : > { %1194 = vrot.lane.b32.xlu0 %v1163_v55, %s4885_s11  ;;  %1212 = vrot.lane.b32.xlu1 %v1181_v61, %s4885_s11  ;;  %v465_v55 = vor.u32 %v463_v36, %v462_v23  ;;  %v547_v61 = vshll.u32 %v5298_v3, 16  ;;  %v469_v23 = vrot.slane %v467_v0, 7 }
  0x8c   : > { %v1197_v27 = vpop.permute.xlu0 %1196  ;;  %v1201_v43 = vpop.permute.xlu1 %1200 }
  0x8d   : > { %v1253_v41 = vsel %vm5459_vm5, %v1197_v27, %v737_v16  ;;  %v1259_v63 = vsel %vm5459_vm5, %v1201_v43, %v743_v29  ;;  %v4806_v16 = vld [vmem:[%s6482_s2 + $0x110] sm:$0xff]   ;;  %v749_v29 = vsel %vm5447_vm3, %v688_v42, %v5463_v9  ;;  %v588_v27 = vsel %vm5481_vm6, %v465_v55, %v5463_v9 }
  0x8e   : > { %1254 = vst [vmem:[#allocation2 + $0xd0] sm:$0xff] %v1253_v41  ;;  %4407 = vmatprep.mubr.bf16.mxu1 %v1253_v41  ;;  %1260 = vst [vmem:[#allocation2 + $0x100] sm:$0xff] %v1259_v63  ;;  %v544_v41 = vshrl.u32 %v5298_v3, 16  ;;  %v691_v43 = vrot.slane %v547_v61, 1  ;;  %v752_v55 = vsel %vm5447_vm3, %v690_v33, %v5463_v9 }
  0x90   : > { %v1199_v57 = vpop.permute.xlu0 %1198  ;;  %v988_v31 = vpop.permute.xlu1 %987  ;;  %v692_v42 = vor.u32 %v691_v43, %v544_v41  ;;  %v6486_v43 = vshrl.u32 %v5363_v22, 16 }
  0x91   : > { %v1256_v25 = vsel %vm5459_vm5, %v1199_v57, %v740_v54  ;;  %v5522_v49 = vsel %vm5500_vm7, %v988_v31, %v585_v37  ;;  %v470_v54 = vshll.u32 %v5320_v6, 16  ;;  %v554_v37 = vshll.u32 %v5334_v12, 16 }
  0x92   : > { %1257 = vst [vmem:[#allocation2 + $0xe8] sm:$0xff] %v1256_v25  ;;  %4408 = vmatmul.mubr.bf16.vlgmr.msra.gmra.mrb[0].mxu1 %v1256_v25  ;;  %v6487_v25 = vshrl.u32 %v5342_v30, 16  ;;  %v755_v33 = vsel %vm5447_vm3, %v692_v42, %v5463_v9  ;;  %v4815_v42 = vld [vmem:[%s6482_s2 + $0x128] sm:$0xff]  }
  0x93   : > { %4104 = vmatpush3.bf16.msra.mxu1 %v4800_v1  ;;  %4411 = vmatprep.mubr.bf16.mxu1 %v1259_v63  ;;  %v4807_v63 = vld [vmem:[%s6482_s2 + $0xd0] sm:$0xff]   ;;  %v4809_v1 = vld [vmem:[%s6482_s2 + $0x118] sm:$0xff]   ;;  %v669_v12 = vrot.slane %v470_v54, 1 }
  0x94   : > { %v1086_v14 = vpop.permute.xlu0 %1085  ;;  %4105 = vmatprep.subr.bf16.mxu1 %v4802_v45  ;;  %v1203_v52 = vpop.permute.xlu1 %1202 }
  0x95   : > { %1134 = vst.msk [vmem:[#allocation2 + $0x20] sm:$0xff] %vm1035_vm2, %v1086_v14  ;;  %v1262_v7 = vsel %vm5459_vm5, %v1203_v52, %v746_v39  ;;  %v472_v39 = vor.u32 %v470_v54, %v469_v23  ;;  %v693_v14 = vrot.slane %v554_v37, 1  ;;  %v5606_v23 = vld [vmem:[%s5163_s16 + $0x78] sm:$0xff]   ;;  %v670_v19 = vor.u32 %v669_v12, %v467_v0 }
  0x96   : > { %1263 = vst [vmem:[#allocation2 + $0x118] sm:$0xff] %v1262_v7  ;;  %664 = vst.msk [vmem:[#allocation2 + $0x188] sm:$0xff] %vm581_vm0, %v5606_v23  ;;  %v6500_v0 = vshrl.u32 %v5342_v30, 16 }
  0x97   : > { %4106 = vmatpush3.bf16.msra.mxu1 %v4803_v58  ;;  %v4810_v58 = vld [vmem:[%s6482_s2 + $0xd8] sm:$0xff]  }
  0x98   : > { %v1205_v53 = vpop.permute.xlu0 %1204  ;;  %4107 = vmatprep.subr.bf16.mxu1 %v4806_v16  ;;  %v990_v45 = vpop.permute.xlu1 %989 }
  0x99   : > { %v1265_v57 = vsel %vm5459_vm5, %v1205_v53, %v749_v29  ;;  %v5572_v31 = vsel %vm5500_vm7, %v990_v45, %v588_v27  ;;  %v4812_v29 = vld [vmem:[%s6482_s2 + $0x120] sm:$0xff]   ;;  %v477_v27 = vshll.u32 %v5342_v30, 16  ;;  %v591_v53 = vsel %vm5481_vm6, %v472_v39, %v5463_v9 }
  0x9a   : > { %1266 = vst [vmem:[#allocation2 + $0x130] sm:$0xff] %v1265_v57  ;;  %4412 = vmatmul.mubr.bf16.gmra.mrb[4].mxu1 %v1262_v7  ;;  %1042 = vst [vmem:[#allocation2 + $0x30] sm:$0xff] %v5572_v31  ;;  %v476_v7 = vrot.slane %v6487_v25, 7  ;;  %v6501_v30 = vshrl.u32 %v5363_v22, 16 }
  0x9b   : > { %4108 = vmatpush3.bf16.msra.mxu1 %v4807_v63  ;;  %4415 = vmatprep.mubr.bf16.mxu1 %v1265_v57  ;;  %v4813_v57 = vld [vmem:[%s6482_s2 + $0xe0] sm:$0xff]  }
  0x9c   : > { %v1088_v16 = vpop.permute.xlu0 %1087  ;;  %v5588_v17 = vld [vmem:[#allocation2 + $0x20] sm:$0xff]  ;;  %4109 = vmatprep.subr.bf16.mxu1 %v4809_v1  ;;  %v1207_v52 = vpop.permute.xlu1 %1206  ;;  %v694_v1 = vor.u32 %v693_v14, %v551_v13  ;;  %v483_v14 = vrot.slane %v6486_v43, 7 }
  0x9d   : > { %1135 = vst.msk [vmem:[#allocation2 + $0x38] sm:$0xff] %vm1035_vm2, %v1088_v16  ;;  %1571 = vmatprep.mubr.bf16.mxu0 %v5588_v17  ;;  %v1268_v63 = vsel %vm5459_vm5, %v1207_v52, %v752_v55  ;;  %v6489_v16 = vshll.u32 %v5363_v22, 16  ;;  %v6488_v52 = vshrl.u32 %v5377_v21, 16 }
  0x9e   : > { %1572 = vmatmul.mubr.bf16.gmra.mrb[4].mxu0 %v5522_v49  ;;  %1269 = vst [vmem:[#allocation2 + $0x148] sm:$0xff] %v1268_v63 }
  0x9f   : > { %4110 = vmatpush3.bf16.msra.mxu1 %v4810_v58  ;;  %v479_v58 = vor.u32 %v477_v27, %v476_v7  ;;  %v4817_v7 = vld [vmem:[%s6482_s2 + $0xe8] sm:$0xff]  }
  0xa0   : > { %v1209_v45 = vpop.permute.xlu0 %1208  ;;  %4111 = vmatprep.subr.bf16.mxu1 %v4812_v29  ;;  %v992_v39 = vpop.permute.xlu1 %991 }
  0xa1   : > { %v1271_v55 = vsel %vm5459_vm5, %v1209_v45, %v755_v33  ;;  %v5630_v29 = vsel %vm5500_vm7, %v992_v39, %v591_v53  ;;  %v758_v33 = vsel %vm5447_vm3, %v694_v1, %v5463_v9  ;;  %v594_v1 = vsel %vm5481_vm6, %v479_v58, %v5463_v9  ;;  %v4819_v58 = vld [vmem:[%s6482_s2 + $0xf0] sm:$0xff]  }
  0xa2   : > { %1272 = vst [vmem:[#allocation2 + $0x160] sm:$0xff] %v1271_v55  ;;  %4416 = vmatmul.mubr.bf16.gmra.mrb[8].mxu1 %v1268_v63  ;;  %1045 = vst [vmem:[#allocation2 + $0x48] sm:$0xff] %v5630_v29  ;;  %v4818_v63 = vld [vmem:[%s6482_s2 + $0x130] sm:$0xff]   ;;  %v491_v39 = vshll.u32 %v5377_v21, 16 }
  0xa3   : > { %4112 = vmatpush3.bf16.msra.mxu1 %v4813_v57  ;;  %4419 = vmatprep.mubr.bf16.mxu1 %v1271_v55  ;;  %v486_v57 = vor.u32 %v6489_v16, %v483_v14  ;;  %v490_v55 = vrot.slane %v6488_v52, 7  ;;  %v4821_v14 = vld [vmem:[%s6482_s2 + $0x138] sm:$0xff]   ;;  %v498_v16 = vshll.u32 %v5380_v50, 16 }
  0xa4   : > { %v1090_v45 = vpop.permute.xlu0 %1089  ;;  %v1298_v43 = vld [vmem:[#allocation2 + $0x38] sm:$0xff]  ;;  %4113 = vmatprep.subr.bf16.mxu1 %v4815_v42  ;;  %v1211_v53 = vpop.permute.xlu1 %1210 }
  0xa5   : > { %1136 = vst.msk [vmem:[#allocation2 + $0x50] sm:$0xff] %vm1035_vm2, %v1090_v45  ;;  %1579 = vmatprep.mubr.bf16.mxu0 %v1298_v43  ;;  %v1274_v42 = vsel %vm5459_vm5, %v1211_v53, %v758_v33  ;;  %v6490_v45 = vshrl.u32 %v5380_v50, 16 }
  0xa6   : > { %1580 = vmatmul.mubr.bf16.gmra.mrb[8].mxu0 %v5572_v31  ;;  %1275 = vst [vmem:[#allocation2 + $0x178] sm:$0xff] %v1274_v42 }
  0xa7   : > { %4114 = vmatpush3.bf16.msra.mxu1 %v4817_v7  ;;  %v597_v7 = vsel %vm5481_vm6, %v486_v57, %v5463_v9  ;;  %v497_v52 = vrot.slane %v6490_v45, 7  ;;  %v4823_v57 = vld [vmem:[%s6482_s2 + $0x140] sm:$0xff]  }
  0xa8   : > { %v994_v25 = vpop.permute.xlu0 %993  ;;  %4115 = vmatprep.subr.bf16.mxu1 %v4818_v63  ;;  %v1092_v53 = vpop.permute.xlu1 %1091  ;;  %v493_v63 = vor.u32 %v491_v39, %v490_v55 }
  0xa9   : > { %v5664_v33 = vsel %vm5500_vm7, %v994_v25, %v594_v1  ;;  %1137 = vst.msk [vmem:[#allocation2 + $0x68] sm:$0xff] %vm1035_vm2, %v1092_v53  ;;  %v4822_v25 = vld [vmem:[%s6482_s2 + $0xf8] sm:$0xff]  }
  0xaa   : > { %1048 = vst [vmem:[#allocation2 + $0x60] sm:$0xff] %v5664_v33  ;;  %4420 = vmatmul.mubr.bf16.gmra.mrb[12].mxu1 %v1274_v42 }
  0xab   : > { %4116 = vmatpush3.bf16.msra.mxu1 %v4819_v58  ;;  %2162 = vmatprep.mubr.bf16.mxu1 %v5588_v17  ;;  %v600_v17 = vsel %vm5481_vm6, %v493_v63, %v5463_v9  ;;  %v500_v58 = vor.u32 %v498_v16, %v497_v52 }
  0xac   : > { %v1301_v1 = vld [vmem:[#allocation2 + $0x50] sm:$0xff]  ;;  %v996_v42 = vpop.permute.xlu0 %995  ;;  %4117 = vmatprep.subr.bf16.mxu1 %v4821_v14  ;;  %v1094_v53 = vpop.permute.xlu1 %1093  ;;  %v504_v14 = vrot.slane %v502_v32, 7 }
  0xad   : > { %1587 = vmatprep.mubr.bf16.mxu0 %v1301_v1  ;;  %v5685_v55 = vsel %vm5500_vm7, %v996_v42, %v597_v7  ;;  %1138 = vst.msk [vmem:[#allocation2 + $0x80] sm:$0xff] %vm1035_vm2, %v1094_v53  ;;  %v4826_v7 = vld [vmem:[%s6482_s2 + $0x148] sm:$0xff]   ;;  %v603_v32 = vsel %vm5481_vm6, %v500_v58, %v5463_v9 }
  0xae   : > { %1588 = vmatmul.mubr.bf16.gmra.mrb[12].mxu0 %v5630_v29  ;;  %v507_v52 = vor.u32 %v505_v62, %v504_v14 }
  0xaf   : > { %4118 = vmatpush3.bf16.msra.mxu1 %v4822_v25  ;;  %v511_v25 = vrot.slane %v509_v38, 7  ;;  %v518_v38 = vrot.slane %v516_v51, 7  ;;  %v525_v51 = vrot.slane %v523_v34, 7  ;;  %v532_v34 = vrot.slane %v530_v60, 7 }
  0xb0   : > { %4423 = vmatprep.subr.bf16.mxu1 %v4823_v57  ;;  %v998_v45 = vpop.permute.xlu0 %997  ;;  %v5699_v42 = vld [vmem:[#allocation2 + $0x68] sm:$0xff]  ;;  %v1096_v63 = vpop.permute.xlu1 %1095  ;;  %v606_v56 = vsel %vm5481_vm6, %v507_v52, %v5463_v9  ;;  %v539_v60 = vrot.slane %v537_v35, 7 }
  0xb1   : > { %v5703_v53 = vsel %vm5500_vm7, %v998_v45, %v600_v17  ;;  %1595 = vmatprep.mubr.bf16.mxu0 %v5699_v42  ;;  %1139 = vst.msk [vmem:[#allocation2 + $0x98] sm:$0xff] %vm1035_vm2, %v1096_v63  ;;  %v514_v62 = vor.u32 %v512_v48, %v511_v25  ;;  %v521_v48 = vor.u32 %v519_v18, %v518_v38 }
  0xb2   : > { %2163 = vmatmul.mubr.bf16.vlgmr.msra.gmra.mrb[16].mxu1 %v5522_v49  ;;  %v4827_v49 = vld [vmem:[%s6482_s2 + $0x150] sm:$0xff]   ;;  %v528_v18 = vor.u32 %v526_v26, %v525_v51  ;;  %v535_v26 = vor.u32 %v533_v2, %v532_v34  ;;  %v542_v35 = vor.u32 %v540_v44, %v539_v60 }
  0xb3   : > { %4424 = vmatpush3.bf16.msra.mxu1 %v4823_v57  ;;  %2170 = vmatprep.mubr.bf16.mxu1 %v1298_v43  ;;  %v4828_v57 = vld [vmem:[%s6482_s2 + $0x158] sm:$0xff]   ;;  %v609_v24 = vsel %vm5481_vm6, %v514_v62, %v5463_v9  ;;  %v612_v15 = vsel %vm5481_vm6, %v521_v48, %v5463_v9 }
  0xb4   : > { %v1000_v45 = vpop.permute.xlu0 %999  ;;  %4425 = vmatprep.subr.bf16.mxu1 %v4826_v7  ;;  %v5718_v17 = vld [vmem:[#allocation2 + $0x80] sm:$0xff]  ;;  %v1098_v58 = vpop.permute.xlu1 %1097  ;;  %v615_v8 = vsel %vm5481_vm6, %v528_v18, %v5463_v9  ;;  %v618_v2 = vsel %vm5481_vm6, %v535_v26, %v5463_v9  ;;  %v621_v10 = vsel %vm5481_vm6, %v542_v35, %v5463_v9  ;;  %v667_v18 = vrot.slane %v463_v36, 1 }
  0xb5   : > { %v5722_v63 = vsel %vm5500_vm7, %v1000_v45, %v603_v32  ;;  %1140 = vst.msk [vmem:[#allocation2 + $0xb0] sm:$0xff] %vm1035_vm2, %v1098_v58 }
  0xb6   : > { %1596 = vmatmul.mubr.bf16.gmra.mrb[16].mxu0 %v5664_v33 }
  0xb7   : > { %1603 = vmatprep.mubr.bf16.mxu0 %v5718_v17  ;;  %4426 = vmatpush3.bf16.msra.mxu1 %v4826_v7 }
  0xb8   : > { %v1002_v43 = vpop.permute.xlu0 %1001  ;;  %4427 = vmatprep.subr.bf16.mxu1 %v4827_v49  ;;  %v1100_v32 = vpop.permute.xlu1 %1099  ;;  %v5750_v7 = vld [vmem:[#allocation2 + $0x98] sm:$0xff] }
  0xb9   : > { %v5739_v14 = vsel %vm5500_vm7, %v1002_v43, %v606_v56  ;;  %1141 = vst.msk [vmem:[#allocation2 + $0xc8] sm:$0xff] %vm1035_vm2, %v1100_v32 }
  0xba   : > { %2171 = vmatmul.mubr.bf16.gmra.mrb[20].mxu1 %v5572_v31  ;;  %v4829_v31 = vld [vmem:[%s6482_s2 + $0x160] sm:$0xff]  }
  0xbb   : > { %2178 = vmatprep.mubr.bf16.mxu1 %v1301_v1  ;;  %4428 = vmatpush3.bf16.msra.mxu1 %v4827_v49  ;;  %v4830_v49 = vld [vmem:[%s6482_s2 + $0x168] sm:$0xff]  }
  0xbc   : > { %v1004_v52 = vpop.permute.xlu0 %1003  ;;  %4429 = vmatprep.subr.bf16.mxu1 %v4828_v57  ;;  %v1102_v45 = vpop.permute.xlu1 %1101  ;;  %v5786_v62 = vld [vmem:[#allocation2 + $0xb0] sm:$0xff] }
  0xbd   : > { %v5757_v25 = vsel %vm5500_vm7, %v1004_v52, %v609_v24  ;;  %1142 = vst.msk [vmem:[#allocation2 + $0xe0] sm:$0xff] %vm1035_vm2, %v1102_v45  ;;  %v4843_v24 = vld [vmem:[%s6482_s2 + $0x178] sm:$0xff]  }
  0xbe   : > { %1604 = vmatmul.mubr.bf16.gmra.mrb[20].mxu0 %v5685_v55 }
  0xbf   : > { %1611 = vmatprep.mubr.bf16.mxu0 %v5750_v7  ;;  %4430 = vmatpush3.bf16.msra.mxu1 %v4828_v57  ;;  %v546_v57 = vrot.slane %v544_v41, 7  ;;  %v553_v41 = vrot.slane %v551_v13, 7 }
  0xc0   : > { %v1006_v1 = vpop.permute.xlu0 %1005  ;;  %4431 = vmatprep.subr.bf16.mxu1 %v4829_v31  ;;  %v1104_v56 = vpop.permute.xlu1 %1103  ;;  %v5822_v52 = vld [vmem:[#allocation2 + $0xc8] sm:$0xff] }
  0xc1   : > { %v5774_v58 = vsel %vm5500_vm7, %v1006_v1, %v612_v15  ;;  %1143 = vst.msk [vmem:[#allocation2 + $0xf8] sm:$0xff] %vm1035_vm2, %v1104_v56  ;;  %v549_v44 = vor.u32 %v547_v61, %v546_v57  ;;  %v556_v13 = vor.u32 %v554_v37, %v553_v41  ;;  %v665_v15 = vrot.slane %v456_v4, 1 }
  0xc2   : > { %2179 = vmatmul.mubr.bf16.gmra.mrb[24].mxu1 %v5630_v29  ;;  %v4833_v29 = vld [vmem:[%s6482_s2 + $0x170] sm:$0xff]   ;;  %v668_v37 = vor.u32 %v667_v18, %v460_v11  ;;  %v671_v56 = vrot.slane %v477_v27, 1  ;;  %v558_v27 = vshrl.u32 %v5606_v23, 16  ;;  %v722_v57 = vsel %vm5447_vm3, %v670_v19, %v5463_v9 }
  0xc3   : > { %2186 = vmatprep.mubr.bf16.mxu1 %v5699_v42  ;;  %4432 = vmatpush3.bf16.msra.mxu1 %v4829_v31  ;;  %v624_v61 = vsel %vm5481_vm6, %v549_v44, %v5463_v9  ;;  %v627_v4 = vsel %vm5481_vm6, %v556_v13, %v5463_v9  ;;  %v666_v36 = vor.u32 %v665_v15, %v453_v59  ;;  %v6499_v59 = vshll.u32 %v5363_v22, 16 }
  0xc4   : > { %v1008_v38 = vpop.permute.xlu0 %1007  ;;  %4433 = vmatprep.subr.bf16.mxu1 %v4830_v49  ;;  %v1106_v5 = vpop.permute.xlu1 %1105  ;;  %v5864_v54 = vld [vmem:[#allocation2 + $0xe0] sm:$0xff]  ;;  %v719_v6 = vsel %vm5447_vm3, %v668_v37, %v5463_v9  ;;  %v6502_v44 = vshrl.u32 %v5377_v21, 16  ;;  %v677_v15 = vrot.slane %v498_v16, 1 }
  0xc5   : > { %v5793_v43 = vsel %vm5500_vm7, %v1008_v38, %v615_v8  ;;  %1144 = vst.msk [vmem:[#allocation2 + $0x110] sm:$0xff] %vm1035_vm2, %v1106_v5  ;;  %v716_v28 = vsel %vm5447_vm3, %v666_v36, %v5463_v9  ;;  %v673_v11 = vrot.slane %v6499_v59, 1  ;;  %v672_v38 = vor.u32 %v671_v56, %v6500_v0 }
  0xc6   : > { %1612 = vmatmul.mubr.bf16.gmra.mrb[24].mxu0 %v5703_v53  ;;  %v6503_v36 = vshrl.u32 %v5380_v50, 16 }
  0xc7   : > { %1619 = vmatprep.mubr.bf16.mxu0 %v5786_v62  ;;  %4434 = vmatpush3.bf16.msra.mxu1 %v4830_v49 }
  0xc8   : > { %v1010_v32 = vpop.permute.xlu0 %1009  ;;  %4435 = vmatprep.subr.bf16.mxu1 %v4833_v29  ;;  %v1108_v51 = vpop.permute.xlu1 %1107  ;;  %v678_v37 = vor.u32 %v677_v15, %v6503_v36  ;;  %v4844_v15 = vld [vmem:[%s6482_s2 + $0x1e8] sm:$0xff]   ;;  %v3684_v36 = vld [vmem:[#allocation2 + $0x38] sm:$0xff] }
  0xc9   : > { %v5810_v48 = vsel %vm5500_vm7, %v1010_v32, %v618_v2  ;;  %1145 = vst.msk [vmem:[#allocation2 + $0x128] sm:$0xff] %vm1035_vm2, %v1108_v51  ;;  %v561_v51 = vshll.u32 %v5606_v23, 16 }
  0xca   : > { %2187 = vmatmul.mubr.bf16.gmra.mrb[28].mxu1 %v5664_v33  ;;  %v5827_v33 = vld [vmem:[%s6482_s2 + $0x200] sm:$0xff]   ;;  %v734_v47 = vsel %vm5447_vm3, %v678_v37, %v5463_v9  ;;  %v4849_v37 = vld [vmem:[%s6482_s2 + $0x1b8] sm:$0xff]  }
  0xcb   : > { %2194 = vmatprep.mubr.bf16.mxu1 %v5718_v17  ;;  %4436 = vmatpush3.bf16.msra.mxu1 %v4833_v29  ;;  %v675_v29 = vrot.slane %v491_v39, 1  ;;  %v560_v39 = vrot.slane %v558_v27, 7 }
  0xcc   : > { %v1012_v31 = vpop.permute.xlu0 %1011  ;;  %4437 = vmatprep.subr.bf16.mxu1 %v4843_v24  ;;  %v1110_v3 = vpop.permute.xlu1 %1109  ;;  %v5944_v56 = vld [vmem:[#allocation2 + $0x110] sm:$0xff] }
  0xcd   : > { %v5831_v45 = vsel %vm5500_vm7, %v1012_v31, %v621_v10  ;;  %1146 = vst.msk [vmem:[#allocation2 + $0x140] sm:$0xff] %vm1035_vm2, %v1110_v3  ;;  %v725_v10 = vsel %vm5447_vm3, %v672_v38, %v5463_v9  ;;  %v676_v41 = vor.u32 %v675_v29, %v6502_v44  ;;  %v5909_v31 = vld [vmem:[#allocation2 + $0xf8] sm:$0xff]  ;;  %v563_v21 = vor.u32 %v561_v51, %v560_v39  ;;  %v4832_v29 = vld [vmem:[%s6482_s2 + $0x180] sm:$0xff]   ;;  %v4837_v44 = vld [vmem:[%s6482_s2 + $0x190] sm:$0xff]  }
  0xce   : > { %1620 = vmatmul.mubr.bf16.gmra.mrb[28].mxu0 %v5722_v63 }
  0xcf   : > { %1627 = vmatprep.mubr.bf16.mxu0 %v5822_v52  ;;  %4438 = vmatpush3.bf16.msra.mxu1 %v4843_v24  ;;  %v674_v24 = vor.u32 %v673_v11, %v6501_v30  ;;  %v731_v18 = vsel %vm5447_vm3, %v676_v41, %v5463_v9  ;;  %v4839_v41 = vld [vmem:[%s6482_s2 + $0x1d8] sm:$0xff]  }
  0xd0   : > { %v1014_v34 = vpop.permute.xlu0 %1013  ;;  %4471 = vmatprep.subr.bf16.mxu1 %v5827_v33  ;;  %v1112_v49 = vpop.permute.xlu1 %1111  ;;  %v5969_v38 = vld [vmem:[#allocation2 + $0x128] sm:$0xff] }
  0xd1   : > { %v5848_v1 = vsel %vm5500_vm7, %v1014_v34, %v624_v61  ;;  %1147 = vst.msk [vmem:[#allocation2 + $0x158] sm:$0xff] %vm1035_vm2, %v1112_v49  ;;  %v728_v13 = vsel %vm5447_vm3, %v674_v24, %v5463_v9 }
  0xd2   : > { %2195 = vmatmul.mubr.bf16.gmra.mrb[32].mxu1 %v5685_v55 }
  0xd3   : > { %2202 = vmatprep.mubr.bf16.mxu1 %v5750_v7 }
  0xd4   : > { %v1016_v8 = vpop.permute.xlu0 %1015  ;;  %v1114_v60 = vpop.permute.xlu1 %1113  ;;  %v5975_v46 = vld [vmem:[#allocation2 + $0x140] sm:$0xff] }
  0xd5   : > { %v5868_v26 = vsel %vm5500_vm7, %v1016_v8, %v627_v4  ;;  %1148 = vst.msk [vmem:[#allocation2 + $0x170] sm:$0xff] %vm1035_vm2, %v1114_v60  ;;  %v630_v4 = vsel %vm5481_vm6, %v563_v21, %v5463_v9  ;;  %v4842_v21 = vld [vmem:[%s6482_s2 + $0x1a0] sm:$0xff]  }
  0xd6   : > { %1628 = vmatmul.mubr.bf16.gmra.mrb[32].mxu0 %v5739_v14 }
  0xd7   : > { %1635 = vmatprep.mubr.bf16.mxu0 %v5864_v54 }
  0xd8   : > { %v1183_v5 = vpop.permute.xlu0 %1182  ;;  %v1185_v35 = vpop.permute.xlu1 %1184  ;;  %v5981_v40 = vld [vmem:[#allocation2 + $0x158] sm:$0xff] }
  0xd9   : > { %v5890_v2 = vsel %vm5459_vm5, %v1183_v5, %v716_v28  ;;  %v5898_v32 = vsel %vm5459_vm5, %v1185_v35, %v719_v6  ;;  %v695_v28 = vrot.slane %v561_v51, 1  ;;  %v4834_v5 = vld [vmem:[%s6482_s2 + $0x1c8] sm:$0xff]   ;;  %v4836_v51 = vld [vmem:[%s6482_s2 + $0x1d0] sm:$0xff]  }
  0xda   : > { %2203 = vmatmul.mubr.bf16.gmra.mrb[36].mxu1 %v5703_v53 }
  0xdb   : > { %2210 = vmatprep.mubr.bf16.mxu1 %v5786_v62  ;;  %v696_v50 = vor.u32 %v695_v28, %v558_v27  ;;  %v3687_v28 = vld [vmem:[#allocation2 + $0x50] sm:$0xff] }
  0xdc   : > { %v1187_v3 = vpop.permute.xlu0 %1186  ;;  %v1189_v22 = vpop.permute.xlu1 %1188  ;;  %v5987_v27 = vld [vmem:[#allocation2 + $0x170] sm:$0xff] }
  0xdd   : > { %v5913_v61 = vsel %vm5459_vm5, %v1187_v3, %v722_v57  ;;  %v5918_v23 = vsel %vm5459_vm5, %v1189_v22, %v725_v10  ;;  %v761_v6 = vsel %vm5447_vm3, %v696_v50, %v5463_v9  ;;  %v4840_v3 = vld [vmem:[%s6482_s2 + $0x198] sm:$0xff]   ;;  %v4841_v22 = vld [vmem:[%s6482_s2 + $0x1e0] sm:$0xff]   ;;  %v3686_v50 = vld [vmem:[#allocation2 + $0x48] sm:$0xff] }
  0xde   : > { %1636 = vmatmul.mubr.bf16.gmra.mrb[36].mxu0 %v5757_v25 }
  0xdf   : > { %1643 = vmatprep.mubr.bf16.mxu0 %v5909_v31 }
  0xe0   : > { %v1191_v34 = vpop.permute.xlu0 %1190  ;;  %v1193_v12 = vpop.permute.xlu1 %1192 }
  0xe1   : > { %v5931_v49 = vsel %vm5459_vm5, %v1191_v34, %v728_v13  ;;  %v5939_v16 = vsel %vm5459_vm5, %v1193_v12, %v731_v18  ;;  %v4845_v18 = vld [vmem:[%s6482_s2 + $0x1a8] sm:$0xff]   ;;  %v4846_v34 = vld [vmem:[%s6482_s2 + $0x1f0] sm:$0xff]  }
  0xe2   : > { %2211 = vmatmul.mubr.bf16.gmra.mrb[40].mxu1 %v5722_v63  ;;  %v4847_v12 = vld [vmem:[%s6482_s2 + $0x1b0] sm:$0xff]  }
  0xe3   : > { %2218 = vmatprep.mubr.bf16.mxu1 %v5822_v52 }
  0xe4   : > { %v1018_v8 = vpop.permute.xlu0 %1017  ;;  %v1116_v19 = vpop.permute.xlu1 %1115 }
  0xe5   : > { %v5948_v60 = vsel %vm5500_vm7, %v1018_v8, %v630_v4  ;;  %1149 = vst.msk [vmem:[#allocation2 + $0x188] sm:$0xff] %vm1035_vm2, %v1116_v19  ;;  %v4848_v4 = vld [vmem:[%s6482_s2 + $0x1f8] sm:$0xff]   ;;  %v4851_v8 = vld [vmem:[%s6482_s2 + $0x208] sm:$0xff]   ;;  %v3683_v19 = vld [vmem:[#allocation2 + $0x30] sm:$0xff] }
  0xe6   : > { %1644 = vmatmul.mubr.bf16.gmra.mrb[40].mxu0 %v5774_v58 }
  0xe7   : > { %1651 = vmatprep.mubr.bf16.mxu0 %v5944_v56 }
  0xe8   : > { %v1195_v59 = vpop.permute.xlu0 %1194  ;;  %v1213_v20 = vpop.permute.xlu1 %1212 }
  0xe9   : > { %v5958_v11 = vsel %vm5459_vm5, %v1195_v59, %v734_v47  ;;  %v5966_v0 = vsel %vm5459_vm5, %v1213_v20, %v761_v6  ;;  %v4853_v47 = vld [vmem:[%s6482_s2 + $0x218] sm:$0xff]   ;;  %v4855_v59 = vld [vmem:[%s6482_s2 + $0x228] sm:$0xff]   ;;  %v4856_v20 = vld [vmem:[%s6482_s2 + $0x230] sm:$0xff]  }
  0xea   : > { %2219 = vmatmul.mubr.bf16.gmra.mrb[44].mxu1 %v5739_v14  ;;  %v3689_v6 = vld [vmem:[#allocation2 + $0x60] sm:$0xff] }
  0xeb   : > { %2226 = vmatprep.mubr.bf16.mxu1 %v5864_v54 }
  0xec   : > { %v6031_v13 = vld [vmem:[#allocation2 + $0x188] sm:$0xff] }
  0xee   : > { %1652 = vmatmul.mubr.bf16.gmra.mrb[44].mxu0 %v5793_v43 }
  0xef   : > { %1659 = vmatprep.mubr.bf16.mxu0 %v5969_v38 }
  0xf2   : > { %2227 = vmatmul.mubr.bf16.gmra.mrb[48].mxu1 %v5757_v25 }
  0xf3   : > { %2234 = vmatprep.mubr.bf16.mxu1 %v5909_v31 }
  0xf6   : > { %1660 = vmatmul.mubr.bf16.gmra.mrb[48].mxu0 %v5810_v48 }
  0xf7   : > { %1667 = vmatprep.mubr.bf16.mxu0 %v5975_v46 }
  0xfa   : > { %2235 = vmatmul.mubr.bf16.gmra.mrb[52].mxu1 %v5774_v58 }
  0xfb   : > { %2242 = vmatprep.mubr.bf16.mxu1 %v5944_v56 }
  0xfe   : > { %1668 = vmatmul.mubr.bf16.gmra.mrb[52].mxu0 %v5831_v45 }
  0xff   : > { %1675 = vmatprep.mubr.bf16.mxu0 %v5981_v40 }
 0x102   : > { %2243 = vmatmul.mubr.bf16.gmra.mrb[56].mxu1 %v5793_v43 }
 0x103   : > { %2250 = vmatprep.mubr.bf16.mxu1 %v5969_v38 }
 0x106   : > { %1676 = vmatmul.mubr.bf16.gmra.mrb[56].mxu0 %v5848_v1 }
 0x107   : > { %1683 = vmatprep.mubr.bf16.mxu0 %v5987_v27 }
 0x10a   : > { %2251 = vmatmul.mubr.bf16.gmra.mrb[60].mxu1 %v5810_v48  ;;  %v3983_v35 = vpop.f32.mrb[0].mxu0 }
 0x10b   : > { %2258 = vmatprep.mubr.bf16.mxu1 %v5975_v46  ;;  %v3984_v57 = vpop.f32.mrb[1].mxu0 }
 0x10c   : > { %v6004_v30 = vadd.f32 %v3984_v57, %v3983_v35  ;;  %v3986_v24 = vpop.f32.mrb[2].mxu0  ;;  %v6096_v35 = vld [vmem:[#allocation2 + $0x118] sm:$0xff]  ;;  %v6101_v57 = vld [vmem:[#allocation2 + $0x130] sm:$0xff] }
 0x10d   : > { %v3987_v39 = vpop.f32.mrb[3].mxu0 }
 0x10e   : > { %1684 = vmatmul.mubr.bf16.gmra.mrb[60].mxu0 %v5868_v26  ;;  %v6013_v10 = vadd.f32 %v3987_v39, %v3986_v24  ;;  %v6104_v24 = vld [vmem:[#allocation2 + $0x148] sm:$0xff] }
 0x10f   : > { %4391 = vmatprep.mubr.bf16.mxu0 %v5463_v9  ;;  %v4835_v9 = vld [vmem:[%s6482_s2 + $0x188] sm:$0xff]  }
 0x112   : > { %2259 = vmatmul.mubr.bf16.gmra.mrb[64].mxu1 %v5831_v45 }
 0x113   : > { %2266 = vmatprep.mubr.bf16.mxu1 %v5981_v40 }
 0x116   : > { %4392 = vmatmul.mubr.bf16.vlgmr.msra.gmra.mrb[64].mxu0 %v5890_v2 }
 0x117   : > { %4240 = vmatpush3.bf16.msra.mxu0 %v4832_v29  ;;  %4395 = vmatprep.mubr.bf16.mxu0 %v5898_v32  ;;  %v3586_v29 = vld [vmem:[#allocation2 + $0xd0] sm:$0xff] }
 0x118   : > { %4241 = vmatprep.subr.bf16.mxu0 %v4834_v5  ;;  %v6091_v5 = vld [vmem:[#allocation2 + $0xe8] sm:$0xff] }
 0x11a   : > { %2267 = vmatmul.mubr.bf16.gmra.mrb[68].mxu1 %v5848_v1 }
 0x11b   : > { %4242 = vmatpush3.bf16.msra.mxu0 %v4835_v9  ;;  %2274 = vmatprep.mubr.bf16.mxu1 %v5987_v27 }
 0x11c   : > { %4243 = vmatprep.subr.bf16.mxu0 %v4836_v51 }
 0x11e   : > { %4396 = vmatmul.mubr.bf16.gmra.mrb[68].mxu0 %v5913_v61 }
 0x11f   : > { %4244 = vmatpush3.bf16.msra.mxu0 %v4837_v44  ;;  %4399 = vmatprep.mubr.bf16.mxu0 %v5918_v23 }
 0x120   : > { %4245 = vmatprep.subr.bf16.mxu0 %v4839_v41 }
 0x122   : > { %2275 = vmatmul.mubr.bf16.gmra.mrb[72].mxu1 %v5868_v26 }
 0x123   : > { %4246 = vmatpush3.bf16.msra.mxu0 %v4840_v3  ;;  %2282 = vmatprep.mubr.bf16.mxu1 %v6031_v13 }
 0x124   : > { %4247 = vmatprep.subr.bf16.mxu0 %v4841_v22 }
 0x126   : > { %4400 = vmatmul.mubr.bf16.gmra.mrb[72].mxu0 %v5931_v49 }
 0x127   : > { %4248 = vmatpush3.bf16.msra.mxu0 %v4842_v21  ;;  %4403 = vmatprep.mubr.bf16.mxu0 %v5939_v16 }
 0x128   : > { %4249 = vmatprep.subr.bf16.mxu0 %v4844_v15 }
 0x12a   : > { %2283 = vmatmul.mubr.bf16.gmra.mrb[76].mxu1 %v5948_v60 }
 0x12b   : > { %4250 = vmatpush3.bf16.msra.mxu0 %v4845_v18  ;;  %4439 = vmatprep.mubr.bf16.mxu1 %v5890_v2  ;;  %v4852_v2 = vld [vmem:[%s6482_s2 + $0x210] sm:$0xff]  }
 0x12c   : > { %4251 = vmatprep.subr.bf16.mxu0 %v4846_v34 }
 0x12e   : > { %4404 = vmatmul.mubr.bf16.gmra.mrb[76].mxu0 %v5958_v11 }
 0x12f   : > { %4252 = vmatpush3.bf16.msra.mxu0 %v4847_v12  ;;  %2761 = vmatprep.mubr.bf16.mxu0 %v3684_v36 }
 0x130   : > { %4253 = vmatprep.subr.bf16.mxu0 %v4848_v4 }
 0x132   : > { %4440 = vmatmul.mubr.bf16.vlgmr.msra.gmra.mrb[80].mxu1 %v5898_v32 }
 0x133   : > { %4254 = vmatpush3.bf16.msra.mxu0 %v4849_v37  ;;  %4472 = vmatpush3.bf16.msra.mxu1 %v5827_v33  ;;  %v4854_v33 = vld [vmem:[%s6482_s2 + $0x220] sm:$0xff]  }
 0x134   : > { %4443 = vmatprep.mubr.bf16.mxu1 %v5913_v61  ;;  %4473 = vmatprep.subr.bf16.mxu1 %v4851_v8 }
 0x136   : > { %2762 = vmatmul.mubr.bf16.vlgmr.msra.gmra.mrb[80].mxu0 %v3683_v19 }
 0x137   : > { %2769 = vmatprep.mubr.bf16.mxu0 %v3687_v28  ;;  %4474 = vmatpush3.bf16.msra.mxu1 %v4851_v8 }
 0x138   : > { %4475 = vmatprep.subr.bf16.mxu1 %v4852_v2 }
 0x13a   : > { %4444 = vmatmul.mubr.bf16.gmra.mrb[84].mxu1 %v5918_v23 }
 0x13b   : > { %4447 = vmatprep.mubr.bf16.mxu1 %v5931_v49  ;;  %4476 = vmatpush3.bf16.msra.mxu1 %v4852_v2 }
 0x13c   : > { %4477 = vmatprep.subr.bf16.mxu1 %v4853_v47 }
 0x13e   : > { %2770 = vmatmul.mubr.bf16.gmra.mrb[84].mxu0 %v3686_v50 }
 0x13f   : > { %2777 = vmatprep.mubr.bf16.mxu0 %v5699_v42  ;;  %4478 = vmatpush3.bf16.msra.mxu1 %v4853_v47  ;;  %v4857_v42 = vld [vmem:[%s6482_s2 + $0x238] sm:$0xff]  }
 0x140   : > { %4479 = vmatprep.subr.bf16.mxu1 %v4854_v33 }
 0x142   : > { %4448 = vmatmul.mubr.bf16.gmra.mrb[88].mxu1 %v5939_v16 }
 0x143   : > { %4451 = vmatprep.mubr.bf16.mxu1 %v5958_v11  ;;  %4480 = vmatpush3.bf16.msra.mxu1 %v4854_v33 }
 0x144   : > { %4481 = vmatprep.subr.bf16.mxu1 %v4855_v59 }
 0x146   : > { %2778 = vmatmul.mubr.bf16.gmra.mrb[88].mxu0 %v3689_v6 }
 0x147   : > { %2785 = vmatprep.mubr.bf16.mxu0 %v5718_v17  ;;  %4482 = vmatpush3.bf16.msra.mxu1 %v4855_v59  ;;  %v3592_v17 = vld [vmem:[#allocation2 + $0x100] sm:$0xff] }
 0x148   : > { %4483 = vmatprep.subr.bf16.mxu1 %v4856_v20 }
 0x14a   : > { %4452 = vmatmul.mubr.bf16.gmra.mrb[92].mxu1 %v3586_v29 }
 0x14b   : > { %4455 = vmatprep.mubr.bf16.mxu1 %v6091_v5  ;;  %4484 = vmatpush3.bf16.msra.mxu1 %v4856_v20 }
 0x14c   : > { %4485 = vmatprep.subr.bf16.mxu1 %v4857_v42 }
 0x14e   : > { %2786 = vmatmul.mubr.bf16.gmra.mrb[92].mxu0 %v5685_v55  ;;  %v6109_v55 = vld [vmem:[#allocation2 + $0x160] sm:$0xff] }
 0x14f   : > { %2793 = vmatprep.mubr.bf16.mxu0 %v5750_v7  ;;  %4486 = vmatpush3.bf16.msra.mxu1 %v4857_v42  ;;  %v6112_v7 = vld [vmem:[#allocation2 + $0x178] sm:$0xff] }
 0x152   : > { %4456 = vmatmul.mubr.bf16.gmra.mrb[0].mxu1 %v3592_v17 }
 0x153   : > { %4459 = vmatprep.mubr.bf16.mxu1 %v6096_v35 }
 0x156   : > { %2794 = vmatmul.mubr.bf16.gmra.mrb[96].mxu0 %v5703_v53 }
 0x157   : > { %2801 = vmatprep.mubr.bf16.mxu0 %v5786_v62 }
 0x15a   : > { %4460 = vmatmul.mubr.bf16.gmra.mrb[4].mxu1 %v6101_v57 }
 0x15b   : > { %4463 = vmatprep.mubr.bf16.mxu1 %v6104_v24 }
 0x15e   : > { %2802 = vmatmul.mubr.bf16.gmra.mrb[100].mxu0 %v5722_v63 }
 0x15f   : > { %2809 = vmatprep.mubr.bf16.mxu0 %v5822_v52 }
 0x162   : > { %4464 = vmatmul.mubr.bf16.gmra.mrb[8].mxu1 %v6109_v55 }
 0x163   : > { %4467 = vmatprep.mubr.bf16.mxu1 %v6112_v7 }
 0x166   : > { %2810 = vmatmul.mubr.bf16.gmra.mrb[104].mxu0 %v5739_v14 }
 0x167   : > { %2817 = vmatprep.mubr.bf16.mxu0 %v5864_v54 }
 0x16a   : > { %4468 = vmatmul.mubr.bf16.gmra.mrb[12].mxu1 %v5966_v0 }
 0x16b   : > { %4487 = vmatprep.mubr.bf16.mxu1 %v5898_v32 }
 0x16e   : > { %2818 = vmatmul.mubr.bf16.gmra.mrb[108].mxu0 %v5757_v25 }
 0x16f   : > { %2825 = vmatprep.mubr.bf16.mxu0 %v5909_v31 }
 0x171   : > { %v3989_v53 = vpop.f32.mrb[4].mxu0 }
 0x172   : > { %v3990_v63 = vpop.f32.mrb[5].mxu0  ;;  %4488 = vmatmul.mubr.bf16.vlgmr.msra.gmra.mrb[80].mxu1 %v5913_v61 }
 0x173   : > { %v6122_v62 = vadd.f32 %v3990_v63, %v3989_v53  ;;  %v3992_v52 = vpop.f32.mrb[6].mxu0  ;;  %4491 = vmatprep.mubr.bf16.mxu1 %v5918_v23 }
 0x174   : > { %v3993_v14 = vpop.f32.mrb[7].mxu0 }
 0x175   : > { %v6125_v9 = vadd.f32 %v3993_v14, %v3992_v52 }
 0x176   : > { %2826 = vmatmul.mubr.bf16.gmra.mrb[112].mxu0 %v5774_v58 }
 0x177   : > { %2833 = vmatprep.mubr.bf16.mxu0 %v5944_v56 }
 0x179   : > { %v3995_v54 = vpop.f32.mrb[8].mxu0 }
 0x17a   : > { %v3996_v25 = vpop.f32.mrb[9].mxu0  ;;  %4492 = vmatmul.mubr.bf16.gmra.mrb[84].mxu1 %v5931_v49 }
 0x17b   : > { %v6130_v32 = vadd.f32 %v3996_v25, %v3995_v54  ;;  %v3998_v31 = vpop.f32.mrb[10].mxu0  ;;  %4495 = vmatprep.mubr.bf16.mxu1 %v5939_v16 }
 0x17c   : > { %v3999_v61 = vpop.f32.mrb[11].mxu0 }
 0x17d   : > { %v6133_v39 = vadd.f32 %v3999_v61, %v3998_v31 }
 0x17e   : > { %2834 = vmatmul.mubr.bf16.gmra.mrb[116].mxu0 %v5793_v43 }
 0x17f   : > { %2841 = vmatprep.mubr.bf16.mxu0 %v5969_v38 }
 0x181   : > { %v4001_v23 = vpop.f32.mrb[12].mxu0 }
 0x182   : > { %v4002_v58 = vpop.f32.mrb[13].mxu0  ;;  %4496 = vmatmul.mubr.bf16.gmra.mrb[88].mxu1 %v5958_v11 }
 0x183   : > { %v6138_v56 = vadd.f32 %v4002_v58, %v4001_v23  ;;  %v4004_v51 = vpop.f32.mrb[14].mxu0  ;;  %4499 = vmatprep.mubr.bf16.mxu1 %v3586_v29  ;;  %v4859_v58 = vld [vmem:[#allocation2] sm:$0xff] }
 0x184   : > { %v4005_v49 = vpop.f32.mrb[15].mxu0 }
 0x185   : > { %v6140_v44 = vadd.f32 %v4005_v49, %v4004_v51  ;;  %v4119_v41 = vpop.f32.mrb[16].mxu1 }
 0x186   : > { %2842 = vmatmul.mubr.bf16.gmra.mrb[120].mxu0 %v5810_v48  ;;  %v4120_v16 = vpop.f32.mrb[17].mxu1 }
 0x187   : > { %2849 = vmatprep.mubr.bf16.mxu0 %v5975_v46  ;;  %v6144_v43 = vadd.f32 %v4120_v16, %v4119_v41  ;;  %v4122_v38 = vpop.f32.mrb[18].mxu1 }
 0x188   : > { %v4123_v3 = vpop.f32.mrb[19].mxu1 }
 0x189   : > { %v4007_v22 = vpop.f32.mrb[16].mxu0  ;;  %v6146_v21 = vadd.f32 %v4123_v3, %v4122_v38 }
 0x18a   : > { %v4008_v11 = vpop.f32.mrb[17].mxu0  ;;  %4500 = vmatmul.mubr.bf16.gmra.mrb[92].mxu1 %v6091_v5 }
 0x18b   : > { %v6149_v15 = vadd.f32 %v4008_v11, %v4007_v22  ;;  %v4010_v18 = vpop.f32.mrb[18].mxu0  ;;  %4503 = vmatprep.mubr.bf16.mxu1 %v3592_v17 }
 0x18c   : > { %v4011_v34 = vpop.f32.mrb[19].mxu0 }
 0x18d   : > { %v6151_v12 = vadd.f32 %v4011_v34, %v4010_v18  ;;  %v4125_v48 = vpop.f32.mrb[20].mxu1 }
 0x18e   : > { %2850 = vmatmul.mubr.bf16.gmra.mrb[124].mxu0 %v5831_v45  ;;  %v4126_v46 = vpop.f32.mrb[21].mxu1 }
 0x18f   : > { %2857 = vmatprep.mubr.bf16.mxu0 %v5981_v40  ;;  %v6155_v4 = vadd.f32 %v4126_v46, %v4125_v48  ;;  %v4128_v36 = vpop.f32.mrb[22].mxu1 }
 0x190   : > { %v4129_v37 = vpop.f32.mrb[23].mxu1 }
 0x191   : > { %v4013_v8 = vpop.f32.mrb[20].mxu0  ;;  %v6157_v2 = vadd.f32 %v4129_v37, %v4128_v36 }
 0x192   : > { %v4014_v19 = vpop.f32.mrb[21].mxu0  ;;  %4504 = vmatmul.mubr.bf16.gmra.mrb[0].mxu1 %v6096_v35 }
 0x193   : > { %v6160_v28 = vadd.f32 %v4014_v19, %v4013_v8  ;;  %v4016_v47 = vpop.f32.mrb[22].mxu0  ;;  %4507 = vmatprep.mubr.bf16.mxu1 %v6101_v57 }
 0x194   : > { %v4017_v33 = vpop.f32.mrb[23].mxu0 }
 0x195   : > { %v6163_v45 = vadd.f32 %v4017_v33, %v4016_v47  ;;  %v4131_v50 = vpop.f32.mrb[24].mxu1 }
 0x196   : > { %2858 = vmatmul.mubr.bf16.gmra.mrb[128].mxu0 %v5848_v1  ;;  %v4132_v40 = vpop.f32.mrb[25].mxu1 }
 0x197   : > { %2865 = vmatprep.mubr.bf16.mxu0 %v5987_v27  ;;  %v6167_v59 = vadd.f32 %v4132_v40, %v4131_v50  ;;  %v4134_v20 = vpop.f32.mrb[26].mxu1 }
 0x198   : > { %v4135_v6 = vpop.f32.mrb[27].mxu1 }
 0x199   : > { %v4019_v42 = vpop.f32.mrb[24].mxu0  ;;  %v6169_v29 = vadd.f32 %v4135_v6, %v4134_v20 }
 0x19a   : > { %v4020_v5 = vpop.f32.mrb[25].mxu0  ;;  %4508 = vmatmul.mubr.bf16.gmra.mrb[4].mxu1 %v6104_v24 }
 0x19b   : > { %v6172_v17 = vadd.f32 %v4020_v5, %v4019_v42  ;;  %v4022_v35 = vpop.f32.mrb[26].mxu0  ;;  %4511 = vmatprep.mubr.bf16.mxu1 %v6109_v55 }
 0x19c   : > { %v4023_v57 = vpop.f32.mrb[27].mxu0 }
 0x19d   : > { %v6175_v1 = vadd.f32 %v4023_v57, %v4022_v35  ;;  %v4137_v53 = vpop.f32.mrb[28].mxu1 }
 0x19e   : > { %2866 = vmatmul.mubr.bf16.gmra.mrb[132].mxu0 %v5868_v26  ;;  %v4138_v27 = vpop.f32.mrb[29].mxu1 }
 0x19f   : > { %2873 = vmatprep.mubr.bf16.mxu0 %v6031_v13  ;;  %v6179_v63 = vadd.f32 %v4138_v27, %v4137_v53  ;;  %v4140_v52 = vpop.f32.mrb[30].mxu1 }
 0x1a0   : > { %v4141_v14 = vpop.f32.mrb[31].mxu1 }
 0x1a1   : > { %v4025_v54 = vpop.f32.mrb[28].mxu0  ;;  %v6181_v24 = vadd.f32 %v4141_v14, %v4140_v52 }
 0x1a2   : > { %v4026_v25 = vpop.f32.mrb[29].mxu0  ;;  %4512 = vmatmul.mubr.bf16.gmra.mrb[8].mxu1 %v6112_v7 }
 0x1a3   : > { %v6184_v55 = vadd.f32 %v4026_v25, %v4025_v54  ;;  %v4028_v31 = vpop.f32.mrb[30].mxu0  ;;  %4515 = vmatprep.mubr.bf16.mxu1 %v5966_v0 }
 0x1a4   : > { %v4029_v61 = vpop.f32.mrb[31].mxu0 }
 0x1a5   : > { %v6187_v26 = vadd.f32 %v4029_v61, %v4028_v31  ;;  %v4143_v23 = vpop.f32.mrb[32].mxu1 }
 0x1a6   : > { %2874 = vmatmul.mubr.bf16.gmra.mrb[136].mxu0 %v5948_v60  ;;  %v4144_v13 = vpop.f32.mrb[33].mxu1 }
 0x1a7   : > { %2881 = vmatprep.mubr.bf16.mxu0 %v4859_v58  ;;  %v6190_v51 = vadd.f32 %v4144_v13, %v4143_v23  ;;  %v4146_v49 = vpop.f32.mrb[34].mxu1 }
 0x1a8   : > { %v4147_v41 = vpop.f32.mrb[35].mxu1 }
 0x1a9   : > { %v4031_v16 = vpop.f32.mrb[32].mxu0  ;;  %v6192_v7 = vadd.f32 %v4147_v41, %v4146_v49 }
 0x1aa   : > { %v4032_v38 = vpop.f32.mrb[33].mxu0  ;;  %4516 = vmatmul.mubr.bf16.gmra.mrb[12].mxu1 %v4859_v58 }
 0x1ab   : > { %v4033_v3 = vadd.f32 %v4032_v38, %v4031_v16  ;;  %v4034_v0 = vpop.f32.mrb[34].mxu0 }
 0x1ac   : > { %v4035_v22 = vpop.f32.mrb[35].mxu0 }
 0x1ad   : > { %v4036_v11 = vadd.f32 %v4035_v22, %v4034_v0  ;;  %v4149_v18 = vpop.f32.mrb[36].mxu1 }
 0x1ae   : > { %2882 = vmatmul.mubr.bf16.gmra.mrb[140].mxu0 %v4859_v58  ;;  %v4150_v34 = vpop.f32.mrb[37].mxu1 }
 0x1af   : > { %v6194_v60 = vadd.f32 %v4150_v34, %v4149_v18  ;;  %v4152_v48 = vpop.f32.mrb[38].mxu1  ;;  %v6209_v34 = vld [vmem:[%s6483_s3] ss:$0 sm:$0xff] }
 0x1b0   : > { %v4153_v46 = vpop.f32.mrb[39].mxu1 }
 0x1b1   : > { %v4037_v36 = vpop.f32.mrb[36].mxu0  ;;  %v6196_v37 = vadd.f32 %v4153_v46, %v4152_v48  ;;  %v4619_v46 = vadd.f32 %v4033_v3, %v6209_v34 }
 0x1b2   : > { %v4038_v8 = vpop.f32.mrb[37].mxu0 }
 0x1b3   : > { %v4039_v19 = vadd.f32 %v4038_v8, %v4037_v36  ;;  %v4040_v47 = vpop.f32.mrb[38].mxu0 }
 0x1b4   : > { %v4041_v33 = vpop.f32.mrb[39].mxu0 }
 0x1b5   : > { %v4042_v50 = vadd.f32 %v4041_v33, %v4040_v47  ;;  %v4155_v40 = vpop.f32.mrb[40].mxu1  ;;  %v4627_v33 = vadd.f32 %v4036_v11, %v6209_v34  ;;  %v4615_v3 = vadd.f32 %v4039_v19, %v6209_v34 }
 0x1b6   : > { %v4156_v20 = vpop.f32.mrb[41].mxu1 }
 0x1b7   : > { %v6198_v6 = vadd.f32 %v4156_v20, %v4155_v40  ;;  %v4158_v42 = vpop.f32.mrb[42].mxu1  ;;  %v4623_v11 = vadd.f32 %v4042_v50, %v6209_v34 }
 0x1b8   : > { %v4159_v5 = vpop.f32.mrb[43].mxu1 }
 0x1b9   : > { %v4043_v35 = vpop.f32.mrb[40].mxu0  ;;  %v6200_v57 = vadd.f32 %v4159_v5, %v4158_v42 }
 0x1ba   : > { %v4044_v53 = vpop.f32.mrb[41].mxu0 }
 0x1bb   : > { %v4045_v27 = vadd.f32 %v4044_v53, %v4043_v35  ;;  %v4046_v52 = vpop.f32.mrb[42].mxu0 }
 0x1bc   : > { %v4047_v14 = vpop.f32.mrb[43].mxu0 }
 0x1bd   : > { %v4048_v54 = vadd.f32 %v4047_v14, %v4046_v52  ;;  %v4161_v25 = vpop.f32.mrb[44].mxu1 }
 0x1be   : > { %v4162_v31 = vpop.f32.mrb[45].mxu1 }
 0x1bf   : > { %v6202_v61 = vadd.f32 %v4162_v31, %v4161_v25  ;;  %v4164_v23 = vpop.f32.mrb[46].mxu1 }
 0x1c0   : > { %v4165_v13 = vpop.f32.mrb[47].mxu1 }
 0x1c1   : > { %v4049_v58 = vpop.f32.mrb[44].mxu0  ;;  %v6204_v49 = vadd.f32 %v4165_v13, %v4164_v23 }
 0x1c2   : > { %v4050_v41 = vpop.f32.mrb[45].mxu0 }
 0x1c3   : > { %v4051_v16 = vadd.f32 %v4050_v41, %v4049_v58  ;;  %v4052_v38 = vpop.f32.mrb[46].mxu0 }
 0x1c4   : > { %v4053_v0 = vpop.f32.mrb[47].mxu0 }
 0x1c5   : > { %v4054_v22 = vadd.f32 %v4053_v0, %v4052_v38  ;;  %v4167_v18 = vpop.f32.mrb[48].mxu1 }
 0x1c6   : > { %v4168_v48 = vpop.f32.mrb[49].mxu1 }
 0x1c7   : > { %v4169_v36 = vadd.f32 %v4168_v48, %v4167_v18  ;;  %v4170_v8 = vpop.f32.mrb[50].mxu1 }
 0x1c8   : > { %v4171_v47 = vpop.f32.mrb[51].mxu1 }
 0x1c9   : > { %v4055_v40 = vpop.f32.mrb[48].mxu0  ;;  %v6213_v20 = vadd.f32 %v4619_v46, %v4169_v36  ;;  %v4172_v42 = vadd.f32 %v4171_v47, %v4170_v8 }
 0x1ca   : > { %v4056_v5 = vpop.f32.mrb[49].mxu0 }
 0x1cb   : > { %v4057_v35 = vadd.f32 %v4056_v5, %v4055_v40  ;;  %v4058_v53 = vpop.f32.mrb[50].mxu0  ;;  %v6215_v52 = vadd.f32 %v4627_v33, %v4172_v42  ;;  %v4635_v42 = vadd.f32 %v4045_v27, %v6209_v34 }
 0x1cc   : > { %v4059_v14 = vpop.f32.mrb[51].mxu0 }
 0x1cd   : > { %v4060_v25 = vadd.f32 %v4059_v14, %v4058_v53  ;;  %v4173_v31 = vpop.f32.mrb[52].mxu1  ;;  %v4643_v14 = vadd.f32 %v4048_v54, %v6209_v34 }
 0x1ce   : > { %v4174_v23 = vpop.f32.mrb[53].mxu1 }
 0x1cf   : > { %v4175_v13 = vadd.f32 %v4174_v23, %v4173_v31  ;;  %v4176_v58 = vpop.f32.mrb[54].mxu1 }
 0x1d0   : > { %v4177_v41 = vpop.f32.mrb[55].mxu1 }
 0x1d1   : > { %v4061_v38 = vpop.f32.mrb[52].mxu0  ;;  %v6219_v0 = vadd.f32 %v4615_v3, %v4175_v13  ;;  %v4178_v18 = vadd.f32 %v4177_v41, %v4176_v58 }
 0x1d2   : > { %v4062_v48 = vpop.f32.mrb[53].mxu0 }
 0x1d3   : > { %v6221_v46 = vadd.f32 %v4062_v48, %v4061_v38  ;;  %v4064_v36 = vpop.f32.mrb[54].mxu0  ;;  %v6223_v8 = vadd.f32 %v4623_v11, %v4178_v18 }
 0x1d4   : > { %v4065_v47 = vpop.f32.mrb[55].mxu0 }
 0x1d5   : > { %v6225_v33 = vadd.f32 %v4065_v47, %v4064_v36  ;;  %v4179_v40 = vpop.f32.mrb[56].mxu1  ;;  %v4631_v36 = vadd.f32 %v4051_v16, %v6209_v34 }
 0x1d6   : > { %v4180_v19 = vpop.f32.mrb[57].mxu1 }
 0x1d7   : > { %v4181_v5 = vadd.f32 %v4180_v19, %v4179_v40  ;;  %v4182_v53 = vpop.f32.mrb[58].mxu1  ;;  %v4639_v19 = vadd.f32 %v4054_v22, %v6209_v34  ;;  %v4535_v22 = vadd.f32 %v6122_v62, %v6209_v34  ;;  %v4550_v62 = vadd.f32 %v6013_v10, %v6209_v34 }
 0x1d8   : > { %v4183_v50 = vpop.f32.mrb[59].mxu1 }
 0x1d9   : > { %v4067_v31 = vpop.f32.mrb[56].mxu0  ;;  %v6229_v23 = vadd.f32 %v4635_v42, %v4181_v5  ;;  %v4184_v3 = vadd.f32 %v4183_v50, %v4182_v53 }
 0x1da   : > { %v4068_v13 = vpop.f32.mrb[57].mxu0 }
 0x1db   : > { %v6231_v58 = vadd.f32 %v4068_v13, %v4067_v31  ;;  %v4070_v41 = vpop.f32.mrb[58].mxu0  ;;  %v6233_v11 = vadd.f32 %v4643_v14, %v4184_v3 }
 0x1dc   : > { %v4071_v38 = vpop.f32.mrb[59].mxu0 }
 0x1dd   : > { %6504 = vst [vmem:[#allocation3_spill] sm:$0xff] %v6233_v11  ;;  %v6235_v18 = vadd.f32 %v4071_v38, %v4070_v41  ;;  %v4185_v48 = vpop.f32.mrb[60].mxu1 }
 0x1de   : > { %v4186_v27 = vpop.f32.mrb[61].mxu1 }
 0x1df   : > { %v4187_v47 = vadd.f32 %v4186_v27, %v4185_v48  ;;  %v4188_v40 = vpop.f32.mrb[62].mxu1  ;;  %v4651_v48 = vadd.f32 %v4057_v35, %v6209_v34  ;;  %v4545_v35 = vadd.f32 %v6125_v9, %v6209_v34 }
 0x1e0   : > { %v4189_v54 = vpop.f32.mrb[63].mxu1 }
 0x1e1   : > { %v4073_v42 = vpop.f32.mrb[60].mxu0  ;;  %v6239_v5 = vadd.f32 %v4631_v36, %v4187_v47  ;;  %v4190_v53 = vadd.f32 %v4189_v54, %v4188_v40  ;;  %v4659_v47 = vadd.f32 %v4060_v25, %v6209_v34  ;;  %v4540_v54 = vadd.f32 %v6004_v30, %v6209_v34 }
 0x1e2   : > { %v4074_v50 = vpop.f32.mrb[61].mxu0 }
 0x1e3   : > { %v6241_v31 = vadd.f32 %v4074_v50, %v4073_v42  ;;  %v4076_v14 = vpop.f32.mrb[62].mxu0  ;;  %v6243_v3 = vadd.f32 %v4639_v19, %v4190_v53 }
 0x1e4   : > { %v4077_v13 = vpop.f32.mrb[63].mxu0 }
 0x1e5   : > { %v6245_v41 = vadd.f32 %v4077_v13, %v4076_v14  ;;  %v4191_v38 = vpop.f32.mrb[64].mxu1 }
 0x1e6   : > { %v4192_v16 = vpop.f32.mrb[65].mxu1 }
 0x1e7   : > { %v4193_v27 = vadd.f32 %v4192_v16, %v4191_v38  ;;  %v4194_v11 = vpop.f32.mrb[66].mxu1 }
 0x1e8   : > { %v4195_v36 = vpop.f32.mrb[67].mxu1 }
 0x1e9   : > { %v4393_v40 = vpop.f32.mrb[64].mxu0  ;;  %v6253_v19 = vadd.f32 %v4651_v48, %v4193_v27  ;;  %v4196_v42 = vadd.f32 %v4195_v36, %v4194_v11  ;;  %v4647_v36 = vadd.f32 %v6221_v46, %v6209_v34 }
 0x1ea   : > { %v4536_v53 = vadd.f32 %v4535_v22, %v4393_v40  ;;  %v1726_v50 = vpop.f32.mrb[65].mxu0  ;;  %v4555_v40 = vadd.f32 %v6138_v56, %v6209_v34  ;;  %v4570_v56 = vadd.f32 %v6133_v39, %v6209_v34 }
 0x1eb   : > { %v4541_v14 = vadd.f32 %v4540_v54, %v1726_v50  ;;  %v4394_v13 = vpop.f32.mrb[66].mxu0  ;;  %v6259_v38 = vadd.f32 %v4659_v47, %v4196_v42 }
 0x1ec   : > { %v6262_v25 = vadd.f32 %v4536_v53, %v6155_v4  ;;  %v4546_v16 = vadd.f32 %v4545_v35, %v4394_v13  ;;  %v1729_v30 = vpop.f32.mrb[67].mxu0 }
 0x1ed   : > { %v6265_v48 = vadd.f32 %v4541_v14, %v6144_v43  ;;  %v4551_v11 = vadd.f32 %v4550_v62, %v1729_v30  ;;  %v4197_v27 = vpop.f32.mrb[68].mxu1  ;;  %v4655_v43 = vadd.f32 %v6225_v33, %v6209_v34 }
 0x1ee   : > { %v6268_v22 = vadd.f32 %v4546_v16, %v6157_v2  ;;  %v4198_v9 = vpop.f32.mrb[69].mxu1  ;;  %v4560_v2 = vadd.f32 %v6130_v32, %v6209_v34 }
 0x1ef   : > { %v6273_v10 = vadd.f32 %v4551_v11, %v6146_v21  ;;  %v4199_v47 = vadd.f32 %v4198_v9, %v4197_v27  ;;  %v4200_v4 = vpop.f32.mrb[70].mxu1  ;;  %v4565_v21 = vadd.f32 %v6140_v44, %v6209_v34 }
 0x1f0   : > { %v4201_v54 = vpop.f32.mrb[71].mxu1 }
 0x1f1   : > { %v4397_v42 = vpop.f32.mrb[68].mxu0  ;;  %v6281_v53 = vadd.f32 %v4647_v36, %v4199_v47  ;;  %v4202_v50 = vadd.f32 %v4201_v54, %v4200_v4  ;;  %v4667_v36 = vadd.f32 %v6231_v58, %v6209_v34  ;;  %v4575_v4 = vadd.f32 %v6160_v28, %v6209_v34 }
 0x1f2   : > { %v4556_v46 = vadd.f32 %v4555_v40, %v4397_v42  ;;  %v1742_v35 = vpop.f32.mrb[69].mxu0  ;;  %v4590_v28 = vadd.f32 %v6151_v12, %v6209_v34 }
 0x1f3   : > { %v4561_v14 = vadd.f32 %v4560_v2, %v1742_v35  ;;  %v4398_v13 = vpop.f32.mrb[70].mxu0  ;;  %v6287_v62 = vadd.f32 %v4655_v43, %v4202_v50 }
 0x1f4   : > { %v6290_v33 = vadd.f32 %v4556_v46, %v6179_v63  ;;  %v4566_v16 = vadd.f32 %v4565_v21, %v4398_v13  ;;  %v1745_v32 = vpop.f32.mrb[71].mxu0 }
 0x1f5   : > { %v6293_v30 = vadd.f32 %v4561_v14, %v6167_v59  ;;  %v4571_v11 = vadd.f32 %v4570_v56, %v1745_v32  ;;  %v4203_v27 = vpop.f32.mrb[72].mxu1  ;;  %v4675_v59 = vadd.f32 %v6235_v18, %v6209_v34  ;;  %v4663_v32 = vadd.f32 %v6241_v31, %v6209_v34 }
 0x1f6   : > { %v6296_v9 = vadd.f32 %v4566_v16, %v6181_v24  ;;  %v4204_v44 = vpop.f32.mrb[73].mxu1  ;;  %v4580_v24 = vadd.f32 %v6149_v15, %v6209_v34 }
 0x1f7   : > { %v6301_v39 = vadd.f32 %v4571_v11, %v6169_v29  ;;  %v4205_v47 = vadd.f32 %v4204_v44, %v4203_v27  ;;  %v4206_v63 = vpop.f32.mrb[74].mxu1  ;;  %v4585_v29 = vadd.f32 %v6163_v45, %v6209_v34  ;;  %v4595_v27 = vadd.f32 %v6184_v55, %v6209_v34 }
 0x1f8   : > { %v4207_v40 = vpop.f32.mrb[75].mxu1  ;;  %v4610_v55 = vadd.f32 %v6175_v1, %v6209_v34 }
 0x1f9   : > { %v4401_v54 = vpop.f32.mrb[72].mxu0  ;;  %v6309_v43 = vadd.f32 %v4667_v36, %v4205_v47  ;;  %v4208_v42 = vadd.f32 %v4207_v40, %v4206_v63 }
 0x1fa   : > { %v4576_v58 = vadd.f32 %v4575_v4, %v4401_v54  ;;  %v1758_v2 = vpop.f32.mrb[73].mxu0 }
 0x1fb   : > { %v4581_v50 = vadd.f32 %v4580_v24, %v1758_v2  ;;  %v4402_v46 = vpop.f32.mrb[74].mxu0  ;;  %v6315_v35 = vadd.f32 %v4675_v59, %v4208_v42 }
 0x1fc   : > { %v6318_v18 = vadd.f32 %v4576_v58, %v6194_v60  ;;  %v4586_v21 = vadd.f32 %v4585_v29, %v4402_v46  ;;  %v1761_v15 = vpop.f32.mrb[75].mxu0 }
 0x1fd   : > { %v6321_v14 = vadd.f32 %v4581_v50, %v6190_v51  ;;  %v4591_v13 = vadd.f32 %v4590_v28, %v1761_v15  ;;  %v4209_v56 = vpop.f32.mrb[76].mxu1  ;;  %v4671_v51 = vadd.f32 %v6245_v41, %v6209_v34 }
 0x1fe   : > { %v6324_v16 = vadd.f32 %v4586_v21, %v6196_v37  ;;  %v4210_v45 = vpop.f32.mrb[77].mxu1  ;;  %v4600_v37 = vadd.f32 %v6172_v17, %v6209_v34 }
 0x1ff   : > { %v6329_v12 = vadd.f32 %v4591_v13, %v6192_v7  ;;  %v4211_v11 = vadd.f32 %v4210_v45, %v4209_v56  ;;  %v4212_v60 = vpop.f32.mrb[78].mxu1  ;;  %v4605_v7 = vadd.f32 %v6187_v26, %v6209_v34 }
 0x200   : > { %v4213_v44 = vpop.f32.mrb[79].mxu1 }
 0x201   : > { %v4405_v36 = vpop.f32.mrb[76].mxu0  ;;  %v6337_v47 = vadd.f32 %v4663_v32, %v4211_v11  ;;  %v4214_v63 = vadd.f32 %v4213_v44, %v4212_v60 }
 0x202   : > { %v4596_v31 = vadd.f32 %v4595_v27, %v4405_v36  ;;  %v1774_v4 = vpop.f32.mrb[77].mxu0 }
 0x203   : > { %v4601_v40 = vadd.f32 %v4600_v37, %v1774_v4  ;;  %v4406_v59 = vpop.f32.mrb[78].mxu0  ;;  %v6343_v54 = vadd.f32 %v4671_v51, %v4214_v63 }
 0x204   : > { %v6346_v41 = vadd.f32 %v4596_v31, %v6202_v61  ;;  %v4606_v17 = vadd.f32 %v4605_v7, %v4406_v59  ;;  %v1777_v24 = vpop.f32.mrb[79].mxu0 }
 0x205   : > { %v4602_v42 = vadd.f32 %v4601_v40, %v6198_v6  ;;  %v4611_v58 = vadd.f32 %v4610_v55, %v1777_v24 }
 0x206   : > { %v6350_v2 = vadd.f32 %v4606_v17, %v6204_v49 }
 0x207   : > { %v4612_v26 = vadd.f32 %v4611_v58, %v6200_v57  ;;  %v4886_v57 = vmov 0.0  }
 0x208   : > { %1279 = vst [vmem:[%s6360_s8] sm:$0x3] %v4886_v57 }
 0x209   : > { %v4255_v29 = vpop.f32.mrb[80].mxu0 }
 0x20a   : > { %v4256_v50 = vpop.f32.mrb[81].mxu0 }
 0x20b   : > { %v4257_v46 = vadd.f32 %v4256_v50, %v4255_v29  ;;  %v4258_v1 = vpop.f32.mrb[82].mxu0 }
 0x20c   : > { %v4259_v34 = vpop.f32.mrb[83].mxu0 }
 0x20d   : > { %v4260_v28 = vadd.f32 %v4259_v34, %v4258_v1  ;;  %v6354_v21 = vadd.f32 %v6265_v48, %v4257_v46 }
 0x20f   : > { %v6363_v6 = vadd.f32 %v6273_v10, %v4260_v28 }
 0x211   : > { %v4261_v61 = vpop.f32.mrb[84].mxu0 }
 0x212   : > { %v4262_v49 = vpop.f32.mrb[85].mxu0 }
 0x213   : > { %v4263_v15 = vadd.f32 %v4262_v49, %v4261_v61  ;;  %v4264_v13 = vpop.f32.mrb[86].mxu0 }
 0x214   : > { %v4265_v56 = vpop.f32.mrb[87].mxu0 }
 0x215   : > { %v4266_v45 = vadd.f32 %v4265_v56, %v4264_v13  ;;  %v4538_v48 = vadd.f32 %v6262_v25, %v4263_v15 }
 0x217   : > { %v4548_v32 = vadd.f32 %v6268_v22, %v4266_v45 }
 0x219   : > { %v4267_v11 = vpop.f32.mrb[88].mxu0 }
 0x21a   : > { %v4268_v60 = vpop.f32.mrb[89].mxu0 }
 0x21b   : > { %v4269_v27 = vadd.f32 %v4268_v60, %v4267_v11  ;;  %v4270_v44 = vpop.f32.mrb[90].mxu0 }
 0x21c   : > { %v4271_v51 = vpop.f32.mrb[91].mxu0 }
 0x21d   : > { %v4272_v36 = vadd.f32 %v4271_v51, %v4270_v44  ;;  %v6369_v10 = vadd.f32 %v6293_v30, %v4269_v27 }
 0x21f   : > { %v6372_v37 = vadd.f32 %v6301_v39, %v4272_v36 }
 0x221   : > { %v4273_v63 = vpop.f32.mrb[92].mxu0 }
 0x222   : > { %v4274_v31 = vpop.f32.mrb[93].mxu0 }
 0x223   : > { %v4275_v4 = vadd.f32 %v4274_v31, %v4273_v63  ;;  %v4276_v7 = vpop.f32.mrb[94].mxu0 }
 0x224   : > { %v4277_v40 = vpop.f32.mrb[95].mxu0 }
 0x225   : > { %v4278_v25 = vadd.f32 %v4277_v40, %v4276_v7  ;;  %v4558_v22 = vadd.f32 %v6290_v33, %v4275_v4 }
 0x227   : > { %v6376_v59 = vadd.f32 %v6296_v9, %v4278_v25 }
 0x229   : > { %v4279_v55 = vpop.f32.mrb[96].mxu0 }
 0x22a   : > { %v4280_v17 = vpop.f32.mrb[97].mxu0 }
 0x22b   : > { %v4281_v24 = vadd.f32 %v4280_v17, %v4279_v55  ;;  %v4282_v58 = vpop.f32.mrb[98].mxu0 }
 0x22c   : > { %v4283_v30 = vpop.f32.mrb[99].mxu0 }
 0x22d   : > { %v4284_v29 = vadd.f32 %v4283_v30, %v4282_v58  ;;  %v6379_v39 = vadd.f32 %v6321_v14, %v4281_v24 }
 0x22f   : > { %v6382_v50 = vadd.f32 %v6329_v12, %v4284_v29 }
 0x231   : > { %v4285_v46 = vpop.f32.mrb[100].mxu0 }
 0x232   : > { %v4286_v1 = vpop.f32.mrb[101].mxu0 }
 0x233   : > { %v4287_v34 = vadd.f32 %v4286_v1, %v4285_v46  ;;  %v4288_v28 = vpop.f32.mrb[102].mxu0 }
 0x234   : > { %v4289_v33 = vpop.f32.mrb[103].mxu0 }
 0x235   : > { %v4290_v57 = vadd.f32 %v4289_v33, %v4288_v28  ;;  %v6385_v9 = vadd.f32 %v6318_v18, %v4287_v34 }
 0x237   : > { %v6388_v61 = vadd.f32 %v6324_v16, %v4290_v57 }
 0x239   : > { %v4291_v49 = vpop.f32.mrb[104].mxu0 }
 0x23a   : > { %v4292_v15 = vpop.f32.mrb[105].mxu0 }
 0x23b   : > { %v4293_v13 = vadd.f32 %v4292_v15, %v4291_v49  ;;  %v4294_v14 = vpop.f32.mrb[106].mxu0 }
 0x23c   : > { %v4295_v56 = vpop.f32.mrb[107].mxu0 }
 0x23d   : > { %v4296_v45 = vadd.f32 %v4295_v56, %v4294_v14  ;;  %v6390_v12 = vadd.f32 %v4602_v42, %v4293_v13 }
 0x23f   : > { %v6392_v11 = vadd.f32 %v4612_v26, %v4296_v45 }
 0x241   : > { %v4297_v60 = vpop.f32.mrb[108].mxu0 }
 0x242   : > { %v4298_v27 = vpop.f32.mrb[109].mxu0 }
 0x243   : > { %v4299_v44 = vadd.f32 %v4298_v27, %v4297_v60  ;;  %v4300_v51 = vpop.f32.mrb[110].mxu0 }
 0x244   : > { %v4301_v18 = vpop.f32.mrb[111].mxu0 }
 0x245   : > { %v4302_v36 = vadd.f32 %v4301_v18, %v4300_v51  ;;  %v4489_v63 = vpop.f32.mrb[80].mxu1  ;;  %v6395_v16 = vadd.f32 %v6346_v41, %v4299_v44 }
 0x246   : > { %v4539_v31 = vadd.f32 %v4538_v48, %v4489_v63  ;;  %v2924_v4 = vpop.f32.mrb[81].mxu1 }
 0x247   : > { %v4544_v7 = vadd.f32 %v6354_v21, %v2924_v4  ;;  %v4490_v40 = vpop.f32.mrb[82].mxu1  ;;  %v6399_v42 = vadd.f32 %v6350_v2, %v4302_v36 }
 0x248   : > { %v4549_v26 = vadd.f32 %v4548_v32, %v4490_v40  ;;  %v2927_v25 = vpop.f32.mrb[83].mxu1  ;;  %v3282_v46 = vmul.f32 %v4539_v31, %v4539_v31 }
 0x249   : > { %v4303_v55 = vpop.f32.mrb[112].mxu0  ;;  %v4554_v41 = vadd.f32 %v6363_v6, %v2927_v25  ;;  %v3280_v17 = vmul.f32 %v4544_v7, %v4544_v7 }
 0x24a   : > { %v4304_v48 = vpop.f32.mrb[113].mxu0  ;;  %v3880_v24 = vpack.c.bf16 %v4549_v26, %v4539_v31  ;;  %v3283_v6 = vmul.f32 %v4549_v26, %v4549_v26 }
 0x24b   : > { %v4305_v21 = vadd.f32 %v4304_v48, %v4303_v55  ;;  %v4306_v58 = vpop.f32.mrb[114].mxu0  ;;  %v3875_v30 = vpack.c.bf16 %v4554_v41, %v4544_v7  ;;  %v3243_v2 = vadd.f32 %v4554_v41, %v4544_v7  ;;  %v3281_v29 = vmul.f32 %v4554_v41, %v4554_v41 }
 0x24c   : > { %v4307_v32 = vpop.f32.mrb[115].mxu0  ;;  %3952 = vst [vmem:[%s6405_s24 + $0x8] sm:$0xff] %v3880_v24  }
 0x24d   : > { %v4308_v1 = vadd.f32 %v4307_v32, %v4306_v58  ;;  %3876 = vst [vmem:[%s6405_s24] sm:$0xff] %v3875_v30   ;;  %v3244_v34 = vadd.f32 %v4539_v31, %v3243_v2  ;;  %v3312_v28 = vadd.f32 %v3281_v29, %v3280_v17  ;;  %v4493_v33 = vpop.f32.mrb[84].mxu1  ;;  %v6411_v57 = vadd.f32 %v6213_v20, %v4305_v21 }
 0x24e   : > { %v4559_v49 = vadd.f32 %v4558_v22, %v4493_v33  ;;  %v2940_v15 = vpop.f32.mrb[85].mxu1 }
 0x24f   : > { %v3313_v13 = vadd.f32 %v3312_v28, %v3282_v46  ;;  %v4564_v14 = vadd.f32 %v6369_v10, %v2940_v15  ;;  %v3245_v56 = vadd.f32 %v4549_v26, %v3244_v34  ;;  %v4494_v45 = vpop.f32.mrb[86].mxu1  ;;  %v6415_v60 = vadd.f32 %v6215_v52, %v4308_v1 }
 0x250   : > { %v4569_v27 = vadd.f32 %v6376_v59, %v4494_v45  ;;  %v2943_v44 = vpop.f32.mrb[87].mxu1  ;;  %v3286_v17 = vmul.f32 %v4559_v49, %v4559_v49 }
 0x251   : > { %v4309_v51 = vpop.f32.mrb[116].mxu0  ;;  %v3246_v18 = vadd.f32 %v4564_v14, %v3245_v56  ;;  %v3284_v20 = vmul.f32 %v4564_v14, %v4564_v14  ;;  %v3314_v36 = vadd.f32 %v3313_v13, %v3283_v6  ;;  %v4574_v22 = vadd.f32 %v6372_v37, %v2943_v44 }
 0x252   : > { %v4310_v63 = vpop.f32.mrb[117].mxu0  ;;  %v3890_v31 = vpack.c.bf16 %v4569_v27, %v4559_v49  ;;  %v3287_v32 = vmul.f32 %v4569_v27, %v4569_v27 }
 0x253   : > { %v4311_v4 = vadd.f32 %v4310_v63, %v4309_v51  ;;  %v4312_v10 = vpop.f32.mrb[118].mxu0  ;;  %v3315_v7 = vadd.f32 %v3314_v36, %v3284_v20  ;;  %v3885_v40 = vpack.c.bf16 %v4574_v22, %v4564_v14  ;;  %v3247_v26 = vadd.f32 %v4574_v22, %v3246_v18 }
 0x254   : > { %v4313_v52 = vpop.f32.mrb[119].mxu0  ;;  %3954 = vst [vmem:[%s6405_s24 + $0x18] sm:$0xff] %v3890_v31   ;;  %v3285_v25 = vmul.f32 %v4574_v22, %v4574_v22 }
 0x255   : > { %v4314_v55 = vadd.f32 %v4313_v52, %v4312_v10  ;;  %3953 = vst [vmem:[%s6405_s24 + $0x10] sm:$0xff] %v3885_v40   ;;  %v3248_v59 = vadd.f32 %v4559_v49, %v3247_v26  ;;  %v4497_v41 = vpop.f32.mrb[88].mxu1  ;;  %v6422_v48 = vadd.f32 %v6219_v0, %v4311_v4  ;;  %v6505_v10 = vld [vmem:[#allocation3_spill] sm:$0xff] }
 0x256   : > { %v3316_v24 = vadd.f32 %v3315_v7, %v3285_v25  ;;  %v4579_v37 = vadd.f32 %v6385_v9, %v4497_v41  ;;  %v2956_v21 = vpop.f32.mrb[89].mxu1 }
 0x257   : > { %v4584_v58 = vadd.f32 %v6379_v39, %v2956_v21  ;;  %v3249_v30 = vadd.f32 %v4569_v27, %v3248_v59  ;;  %v4498_v2 = vpop.f32.mrb[90].mxu1  ;;  %v6427_v29 = vadd.f32 %v6223_v8, %v4314_v55 }
 0x258   : > { %v3317_v46 = vadd.f32 %v3316_v24, %v3286_v17  ;;  %v4589_v1 = vadd.f32 %v6388_v61, %v4498_v2  ;;  %v2959_v34 = vpop.f32.mrb[91].mxu1  ;;  %v3290_v20 = vmul.f32 %v4579_v37, %v4579_v37 }
 0x259   : > { %v4315_v0 = vpop.f32.mrb[120].mxu0  ;;  %v3250_v28 = vadd.f32 %v4584_v58, %v3249_v30  ;;  %v3288_v33 = vmul.f32 %v4584_v58, %v4584_v58  ;;  %v4594_v9 = vadd.f32 %v6382_v50, %v2959_v34 }
 0x25a   : > { %v4316_v6 = vpop.f32.mrb[121].mxu0  ;;  %v3318_v49 = vadd.f32 %v3317_v46, %v3287_v32  ;;  %v3900_v39 = vpack.c.bf16 %v4589_v1, %v4579_v37  ;;  %v3291_v40 = vmul.f32 %v4589_v1, %v4589_v1 }
 0x25b   : > { %v4317_v15 = vadd.f32 %v4316_v6, %v4315_v0  ;;  %v4318_v13 = vpop.f32.mrb[122].mxu0  ;;  %v3895_v14 = vpack.c.bf16 %v4594_v9, %v4584_v58  ;;  %v3251_v8 = vadd.f32 %v4594_v9, %v3250_v28  ;;  %v3289_v56 = vmul.f32 %v4594_v9, %v4594_v9 }
 0x25c   : > { %v4319_v45 = vpop.f32.mrb[123].mxu0  ;;  %v3319_v27 = vadd.f32 %v3318_v49, %v3288_v33  ;;  %3956 = vst [vmem:[%s6405_s24 + $0x28] sm:$0xff] %v3900_v39  }
 0x25d   : > { %v4320_v61 = vadd.f32 %v4319_v45, %v4318_v13  ;;  %3955 = vst [vmem:[%s6405_s24 + $0x20] sm:$0xff] %v3895_v14   ;;  %v3252_v44 = vadd.f32 %v4579_v37, %v3251_v8  ;;  %v4501_v51 = vpop.f32.mrb[92].mxu1  ;;  %v6434_v18 = vadd.f32 %v6229_v23, %v4317_v15 }
 0x25e   : > { %v3320_v50 = vadd.f32 %v3319_v27, %v3289_v56  ;;  %v4599_v36 = vadd.f32 %v6395_v16, %v4501_v51  ;;  %v2972_v22 = vpop.f32.mrb[93].mxu1 }
 0x25f   : > { %v4604_v63 = vadd.f32 %v6390_v12, %v2972_v22  ;;  %v3253_v31 = vadd.f32 %v4589_v1, %v3252_v44  ;;  %v4502_v4 = vpop.f32.mrb[94].mxu1  ;;  %v6439_v7 = vadd.f32 %v6505_v10, %v4320_v61 }
 0x260   : > { %v3321_v26 = vadd.f32 %v3320_v50, %v3290_v20  ;;  %v4609_v52 = vadd.f32 %v6399_v42, %v4502_v4  ;;  %v2975_v25 = vpop.f32.mrb[95].mxu1  ;;  %v3294_v0 = vmul.f32 %v4599_v36, %v4599_v36 }
 0x261   : > { %v4321_v23 = vpop.f32.mrb[124].mxu0  ;;  %v3254_v55 = vadd.f32 %v4604_v63, %v3253_v31  ;;  %v3292_v59 = vmul.f32 %v4604_v63, %v4604_v63  ;;  %v4614_v16 = vadd.f32 %v6392_v11, %v2975_v25 }
 0x262   : > { %v4322_v41 = vpop.f32.mrb[125].mxu0  ;;  %v3322_v17 = vadd.f32 %v3321_v26, %v3291_v40  ;;  %v3910_v12 = vpack.c.bf16 %v4609_v52, %v4599_v36  ;;  %v3295_v15 = vmul.f32 %v4609_v52, %v4609_v52 }
 0x263   : > { %v4323_v24 = vadd.f32 %v4322_v41, %v4321_v23  ;;  %v4324_v37 = vpop.f32.mrb[126].mxu0  ;;  %v3905_v21 = vpack.c.bf16 %v4614_v16, %v4604_v63  ;;  %v3255_v58 = vadd.f32 %v4614_v16, %v3254_v55  ;;  %v3293_v30 = vmul.f32 %v4614_v16, %v4614_v16 }
 0x264   : > { %v4325_v2 = vpop.f32.mrb[127].mxu0  ;;  %v3323_v32 = vadd.f32 %v3322_v17, %v3292_v59  ;;  %3958 = vst [vmem:[%s6405_s24 + $0x38] sm:$0xff] %v3910_v12  }
 0x265   : > { %v4326_v42 = vadd.f32 %v4325_v2, %v4324_v37  ;;  %3957 = vst [vmem:[%s6405_s24 + $0x30] sm:$0xff] %v3905_v21   ;;  %v3256_v46 = vadd.f32 %v4599_v36, %v3255_v58  ;;  %v4505_v1 = vpop.f32.mrb[0].mxu1  ;;  %v4633_v34 = vadd.f32 %v6239_v5, %v4323_v24 }
 0x266   : > { %v3324_v28 = vadd.f32 %v3323_v32, %v3293_v30  ;;  %v4618_v11 = vadd.f32 %v6422_v48, %v4505_v1  ;;  %v2988_v33 = vpop.f32.mrb[1].mxu1 }
 0x267   : > { %v4622_v9 = vadd.f32 %v6411_v57, %v2988_v33  ;;  %v3257_v6 = vadd.f32 %v4609_v52, %v3256_v46  ;;  %v4506_v49 = vpop.f32.mrb[2].mxu1  ;;  %v4641_v39 = vadd.f32 %v6243_v3, %v4326_v42 }
 0x268   : > { %v3325_v13 = vadd.f32 %v3324_v28, %v3294_v0  ;;  %v4626_v14 = vadd.f32 %v6427_v29, %v4506_v49  ;;  %v2991_v8 = vpop.f32.mrb[3].mxu1  ;;  %v3298_v10 = vmul.f32 %v4618_v11, %v4618_v11 }
 0x269   : > { %v4327_v56 = vpop.f32.mrb[128].mxu0  ;;  %v3258_v5 = vadd.f32 %v4622_v9, %v3257_v6  ;;  %v3296_v45 = vmul.f32 %v4622_v9, %v4622_v9  ;;  %v4630_v27 = vadd.f32 %v6415_v60, %v2991_v8 }
 0x26a   : > { %v4328_v48 = vpop.f32.mrb[129].mxu0  ;;  %v3326_v61 = vadd.f32 %v3325_v13, %v3295_v15  ;;  %v3920_v44 = vpack.c.bf16 %v4626_v14, %v4618_v11  ;;  %v3299_v59 = vmul.f32 %v4626_v14, %v4626_v14 }
 0x26b   : > { %v4329_v57 = vadd.f32 %v4328_v48, %v4327_v56  ;;  %v4330_v51 = vpop.f32.mrb[130].mxu0  ;;  %v3915_v20 = vpack.c.bf16 %v4630_v27, %v4622_v9  ;;  %v3259_v50 = vadd.f32 %v4630_v27, %v3258_v5  ;;  %v3297_v3 = vmul.f32 %v4630_v27, %v4630_v27 }
 0x26c   : > { %v4331_v36 = vpop.f32.mrb[131].mxu0  ;;  %v3327_v22 = vadd.f32 %v3326_v61, %v3296_v45  ;;  %3960 = vst [vmem:[%s6405_s24 + $0x48] sm:$0xff] %v3920_v44  }
 0x26d   : > { %v4332_v29 = vadd.f32 %v4331_v36, %v4330_v51  ;;  %3959 = vst [vmem:[%s6405_s24 + $0x40] sm:$0xff] %v3915_v20   ;;  %v3260_v63 = vadd.f32 %v4618_v11, %v3259_v50  ;;  %v4509_v31 = vpop.f32.mrb[4].mxu1  ;;  %v4653_v4 = vadd.f32 %v6253_v19, %v4329_v57 }
 0x26e   : > { %v3328_v40 = vadd.f32 %v3327_v22, %v3297_v3  ;;  %v4634_v60 = vadd.f32 %v4633_v34, %v4509_v31  ;;  %v3004_v26 = vpop.f32.mrb[5].mxu1 }
 0x26f   : > { %v4638_v52 = vadd.f32 %v6434_v18, %v3004_v26  ;;  %v3261_v25 = vadd.f32 %v4626_v14, %v3260_v63  ;;  %v4510_v23 = vpop.f32.mrb[6].mxu1  ;;  %v4661_v55 = vadd.f32 %v6259_v38, %v4332_v29 }
 0x270   : > { %v3329_v16 = vadd.f32 %v3328_v40, %v3298_v10  ;;  %v4642_v41 = vadd.f32 %v4641_v39, %v4510_v23  ;;  %v3007_v17 = vpop.f32.mrb[7].mxu1  ;;  %v3302_v33 = vmul.f32 %v4634_v60, %v4634_v60 }
 0x271   : > { %v4333_v12 = vpop.f32.mrb[132].mxu0  ;;  %v3262_v24 = vadd.f32 %v4638_v52, %v3261_v25  ;;  %v3300_v37 = vmul.f32 %v4638_v52, %v4638_v52  ;;  %v4646_v19 = vadd.f32 %v6439_v7, %v3007_v17 }
 0x272   : > { %v4334_v21 = vpop.f32.mrb[133].mxu0  ;;  %v3330_v58 = vadd.f32 %v3329_v16, %v3299_v59  ;;  %v3930_v30 = vpack.c.bf16 %v4642_v41, %v4634_v60  ;;  %v3303_v14 = vmul.f32 %v4642_v41, %v4642_v41 }
 0x273   : > { %v4335_v2 = vadd.f32 %v4334_v21, %v4333_v12  ;;  %v4336_v18 = vpop.f32.mrb[134].mxu0  ;;  %v3925_v32 = vpack.c.bf16 %v4646_v19, %v4638_v52  ;;  %v3263_v42 = vadd.f32 %v4646_v19, %v3262_v24  ;;  %v3301_v46 = vmul.f32 %v4646_v19, %v4646_v19 }
 0x274   : > { %v4337_v38 = vpop.f32.mrb[135].mxu0  ;;  %v3331_v1 = vadd.f32 %v3330_v58, %v3300_v37  ;;  %3962 = vst [vmem:[%s6405_s24 + $0x58] sm:$0xff] %v3930_v30  }
 0x275   : > { %v4338_v34 = vadd.f32 %v4337_v38, %v4336_v18  ;;  %3961 = vst [vmem:[%s6405_s24 + $0x50] sm:$0xff] %v3925_v32   ;;  %v3264_v0 = vadd.f32 %v4634_v60, %v3263_v42  ;;  %v4513_v28 = vpop.f32.mrb[8].mxu1  ;;  %v4649_v11 = vadd.f32 %v6281_v53, %v4335_v2 }
 0x276   : > { %v3332_v9 = vadd.f32 %v3331_v1, %v3301_v46  ;;  %v3020_v7 = vpop.f32.mrb[9].mxu1 }
 0x277   : > { %v4650_v6 = vadd.f32 %v4649_v11, %v4513_v28  ;;  %v4654_v49 = vadd.f32 %v4653_v4, %v3020_v7  ;;  %v3265_v39 = vadd.f32 %v4642_v41, %v3264_v0  ;;  %v4514_v15 = vpop.f32.mrb[10].mxu1  ;;  %v4657_v13 = vadd.f32 %v6287_v62, %v4338_v34 }
 0x278   : > { %v3333_v8 = vadd.f32 %v3332_v9, %v3302_v33  ;;  %v3023_v56 = vpop.f32.mrb[11].mxu1 }
 0x279   : > { %v4339_v5 = vpop.f32.mrb[136].mxu0  ;;  %v3266_v45 = vadd.f32 %v4654_v49, %v3265_v39  ;;  %v3304_v27 = vmul.f32 %v4654_v49, %v4654_v49  ;;  %v4658_v48 = vadd.f32 %v4657_v13, %v4514_v15  ;;  %v4662_v44 = vadd.f32 %v4661_v55, %v3023_v56 }
 0x27a   : > { %v4340_v61 = vpop.f32.mrb[137].mxu0  ;;  %v3334_v53 = vadd.f32 %v3333_v8, %v3303_v14  ;;  %v3306_v4 = vmul.f32 %v4650_v6, %v4650_v6 }
 0x27b   : > { %v4341_v57 = vadd.f32 %v4340_v61, %v4339_v5  ;;  %v4342_v51 = vpop.f32.mrb[138].mxu0  ;;  %v3940_v20 = vpack.c.bf16 %v4658_v48, %v4650_v6  ;;  %v3935_v36 = vpack.c.bf16 %v4662_v44, %v4654_v49  ;;  %v3267_v22 = vadd.f32 %v4662_v44, %v3266_v45 }
 0x27c   : > { %v4343_v50 = vpop.f32.mrb[139].mxu0  ;;  %v3335_v3 = vadd.f32 %v3334_v53, %v3304_v27  ;;  %v3305_v62 = vmul.f32 %v4662_v44, %v4662_v44  ;;  %v3307_v23 = vmul.f32 %v4658_v48, %v4658_v48 }
 0x27d   : > { %v4344_v29 = vadd.f32 %v4343_v50, %v4342_v51  ;;  %3964 = vst [vmem:[%s6405_s24 + $0x68] sm:$0xff] %v3940_v20   ;;  %v4517_v63 = vpop.f32.mrb[12].mxu1  ;;  %v4669_v31 = vadd.f32 %v6309_v43, %v4341_v57  ;;  %3963 = vst [vmem:[%s6405_s24 + $0x60] sm:$0xff] %v3935_v36   ;;  %v3268_v10 = vadd.f32 %v4650_v6, %v3267_v22 }
 0x27e   : > { %v3336_v40 = vadd.f32 %v3335_v3, %v3305_v62  ;;  %v3036_v60 = vpop.f32.mrb[13].mxu1 }
 0x27f   : > { %v4670_v26 = vadd.f32 %v4669_v31, %v3036_v60  ;;  %v4518_v52 = vpop.f32.mrb[14].mxu1  ;;  %v4677_v25 = vadd.f32 %v6315_v35, %v4344_v29  ;;  %v3269_v59 = vadd.f32 %v4658_v48, %v3268_v10  ;;  %v3351_v48 = vld [vmem:[%s6360_s8] sm:$0x3] }
 0x280   : > { %v3337_v55 = vadd.f32 %v3336_v40, %v3306_v4  ;;  %v3039_v16 = vpop.f32.mrb[15].mxu1 }
 0x281   : > { %v4345_v41 = vpop.f32.mrb[140].mxu0  ;;  %v3308_v17 = vmul.f32 %v4670_v26, %v4670_v26  ;;  %v4678_v12 = vadd.f32 %v4677_v25, %v3039_v16  ;;  %v3270_v37 = vadd.f32 %v4670_v26, %v3269_v59 }
 0x282   : > { %v4346_v24 = vpop.f32.mrb[141].mxu0  ;;  %v3338_v43 = vadd.f32 %v3337_v55, %v3307_v23 }
 0x283   : > { %v4347_v19 = vadd.f32 %v4346_v24, %v4345_v41  ;;  %v4348_v21 = vpop.f32.mrb[142].mxu0  ;;  %v3945_v58 = vpack.c.bf16 %v4678_v12, %v4670_v26  ;;  %v3309_v30 = vmul.f32 %v4678_v12, %v4678_v12  ;;  %v3271_v32 = vadd.f32 %v4678_v12, %v3270_v37 }
 0x284   : > { %v4349_v2 = vpop.f32.mrb[143].mxu0  ;;  %v3339_v18 = vadd.f32 %v3338_v43, %v3308_v17 }
 0x285   : > { %v4350_v35 = vadd.f32 %v4349_v2, %v4348_v21  ;;  %v4665_v42 = vadd.f32 %v6337_v47, %v4347_v19  ;;  %3965 = vst [vmem:[%s6405_s24 + $0x70] sm:$0xff] %v3945_v58  }
 0x286   : > { %v3340_v46 = vadd.f32 %v3339_v18, %v3309_v30 }
 0x287   : > { %v4666_v38 = vadd.f32 %v4665_v42, %v4517_v63  ;;  %v4673_v1 = vadd.f32 %v6343_v54, %v4350_v35 }
 0x289   : > { %v3310_v34 = vmul.f32 %v4666_v38, %v4666_v38  ;;  %v4674_v0 = vadd.f32 %v4673_v1, %v4518_v52  ;;  %v3272_v28 = vadd.f32 %v4666_v38, %v3271_v32 }
 0x28b   : > { %v3950_v11 = vpack.c.bf16 %v4674_v0, %v4666_v38  ;;  %v3311_v33 = vmul.f32 %v4674_v0, %v4674_v0  ;;  %v3273_v9 = vadd.f32 %v4674_v0, %v3272_v28  ;;  %v3341_v7 = vadd.f32 %v3340_v46, %v3310_v34 }
 0x28d   : > { %3966 = vst [vmem:[%s6405_s24 + $0x78] sm:$0xff] %v3950_v11   ;;  %v3274_v6 = vrot.slane %v3273_v9, 4  ;;  %v3342_v49 = vadd.f32 %v3341_v7, %v3311_v33 }
 0x28f   : > { %v3275_v39 = vadd.f32 %v3274_v6, %v3273_v9  ;;  %v3343_v15 = vrot.slane %v3342_v49, 4 }
 0x291   : > { %v3276_v47 = vrot.slane %v3275_v39, 2  ;;  %v3344_v13 = vadd.f32 %v3343_v15, %v3342_v49 }
 0x293   : > { %v3277_v14 = vadd.f32 %v3276_v47, %v3275_v39  ;;  %v3345_v8 = vrot.slane %v3344_v13, 2 }
 0x295   : > { %v3278_v56 = vrot.slane %v3277_v14, 1  ;;  %v3346_v54 = vadd.f32 %v3345_v8, %v3344_v13 }
 0x297   : > { %v3347_v5 = vrot.slane %v3346_v54, 1  ;;  %v3279_v45 = vadd.f32 %v3278_v56, %v3277_v14 }
 0x299   : > { %v3348_v27 = vadd.f32 %v3347_v5, %v3346_v54 }
 0x29b   : > { %v3350_v61 = vsel %vm3349_vm8, %v3279_v45, %v3348_v27 }
 0x29c   : > { %v3352_v53 = vadd.f32 %v3351_v48, %v3350_v61 }
 0x29e   : > { %3353 = vst [vmem:[%s6360_s8] sm:$0x3] %v3352_v53 }
 0x29f PF: > { %s16_s20 = sadd.s32 1, %s4882_s20   ;;  %s6506_s18 = smov %s4878_s19 }
 0x2a0   : > { %p13_p5 = scmp.ge.s32.totalorder %s16_s20, 4   ;;  %s6507_s19 = smov %s6509_s21 }
 0x2a2   :  { %15 = sbr.rel (!%p13_p5) target bundleno = 2 (0x2), region = 91 }

</bundles_post_ra>
